<compile_context>
chip_gen: v6e
topology: v6e:2x2x1
jax: 0.10.0
libtpu: 0.0.40
codegen_flags: <defaults>
</compile_context>

<pallas_src>
import jax
import jax.numpy as jnp
from jax import lax
from jax.experimental import pallas as pl
from jax.experimental.pallas import tpu as pltpu


EPS = 1e-5
NEG_SLOPE = 0.1
HEAD_PAD = 128   # lane-dense padded width for the out_features==1 head


def _lrelu(v):
    # LeakyReLU(0.1): max(v, 0.1*v) == where(v>0, v, 0.1*v) for slope in (0,1).
    return jnp.maximum(v, NEG_SLOPE * v)


def _layernorm(v, gamma, beta, inv_n):
    # Fused sum / sum-of-squares with folded 1/H (one fewer XLU reduce per LN).
    s = jnp.sum(v, axis=-1, keepdims=True)
    s2 = jnp.sum(v * v, axis=-1, keepdims=True)
    mu = s * inv_n
    var = s2 * inv_n - mu * mu
    return (v - mu) * lax.rsqrt(var + EPS) * gamma + beta


def discriminator_kernel(
    x_ref,                    # (TILE_B, D)        f32
    w1_ref, b1_ref,           # (D, H) bf16, (1, H) f32
    ln0_g_ref, ln0_b_ref,     # (1, H) f32
    ffw1_ref, ffb1_ref,       # (NB, H, H) bf16, (NB, 1, H) f32
    ffw2_ref, ffb2_ref,       # (NB, H, H) bf16, (NB, 1, H) f32
    ln1_g_ref, ln1_b_ref,     # (NB, 1, H) f32
    w2_ref, b2_ref,           # (H, 128) bf16 (col 0 real), (1, 1) f32
    out_ref,                  # (TILE_B, 128) f32  (col 0 real)
):
    H = w1_ref.shape[1]
    inv_h = jnp.float32(1.0 / H)

    # fc1 -> LeakyReLU -> LayerNorm0 (bf16 MXU operands, f32 accumulation).
    x = x_ref[...].astype(jnp.bfloat16)
    h = jnp.dot(x, w1_ref[...], preferred_element_type=jnp.float32) + b1_ref[...]
    out = _layernorm(_lrelu(h), ln0_g_ref[...], ln0_b_ref[...], inv_h)

    num_blocks = ffw1_ref.shape[0]
    # num_blocks is a small static constant -> unrolled python loop.
    for i in range(num_blocks):
        res = out
        h1 = _lrelu(
            jnp.dot(out.astype(jnp.bfloat16), ffw1_ref[i],
                    preferred_element_type=jnp.float32)
            + ffb1_ref[i]
        )
        h2 = _lrelu(
            jnp.dot(h1.astype(jnp.bfloat16), ffw2_ref[i],
                    preferred_element_type=jnp.float32)
            + ffb2_ref[i]
        )
        out = _layernorm(h2 + res, ln1_g_ref[i], ln1_b_ref[i], inv_h)

    # fc2 (out_features == 1) as a bf16 MXU matmul into a 128-wide padded
    # output: column 0 carries the real logit; full-width, unmasked stores.
    out_ref[...] = (
        jnp.dot(out.astype(jnp.bfloat16), w2_ref[...],
                preferred_element_type=jnp.float32)
        + b2_ref[...]
    )


def _vmem_capacity_bytes():
    try:
        return int(pltpu.get_tpu_info().vmem_capacity_bytes)
    except Exception:
        return 64 << 20   # conservative fallback (v7x per-TC physical VMEM)


def discriminator_forward(x, params, *, tile_b=None):
    """x: (B, data_dim) float32.  params: dict of weights (see init_params)."""
    B, D = x.shape
    H = params["w1"].shape[1]
    NB = params["ffw1"].shape[0]

    if tile_b is None:
        # Large tiles amortize the ~0.35 us per-grid-step overhead and give
        # >=32 KB x-tile DMAs, while keeping >= 2 grid steps so the "parallel"
        # axis shards across both TensorCores on v7x (harmless on v5e/v6e).
        tile_b = int(min(512, max(128, ((B + 1) // 2 + 127) // 128 * 128)))

    n_tiles = pl.cdiv(B, tile_b)
    Bp = n_tiles * tile_b
    if Bp != B:
        # Padded rows are computed (LayerNorm on zeros is finite) and sliced off.
        x = jnp.pad(x, ((0, Bp - B), (0, 0)))

    weight_args = (
        params["w1"], params["b1"],
        params["ln0_g"], params["ln0_b"],
        params["ffw1"], params["ffb1"],
        params["ffw2"], params["ffb2"],
        params["ln1_g"], params["ln1_b"],
        params["w2_pad"], params["b2"],
    )

    def resident_spec(arr):
        nd = arr.ndim
        # Full-array block, constant index_map -> VMEM-resident across the grid.
        # Buffered(1): constant blocks don't need double-buffering (halves the
        # resident-weight VMEM footprint; matters for large H on v7x's 64 MiB).
        return pl.BlockSpec(arr.shape, lambda i, _nd=nd: (0,) * _nd,
                            pipeline_mode=pl.Buffered(1))

    in_specs = [pl.BlockSpec((tile_b, D), lambda i: (i, 0))]
    in_specs += [resident_spec(a) for a in weight_args]
    out_spec = pl.BlockSpec((tile_b, HEAD_PAD), lambda i: (i, 0))

    # Cost estimate (helps XLA schedule the custom call among surrounding ops).
    flops = 2 * Bp * (D * H + NB * 2 * H * H + H * HEAD_PAD)
    param_bytes = sum(int(a.size) * a.dtype.itemsize for a in weight_args)
    bytes_accessed = int(x.size) * 4 + param_bytes + Bp * HEAD_PAD * 4
    cost = pl.CostEstimate(
        flops=flops,
        transcendentals=Bp * (NB + 1),          # one rsqrt per LayerNorm row
        bytes_accessed=bytes_accessed,
    )

    # VMEM budget: single-buffered resident weights + double-buffered x/out
    # tiles + activation working set + headroom, capped at ~85% of physical
    # VMEM (64 MiB/TC on v7x, 128 MiB on v5e/v6e).
    x_tile_bytes = tile_b * D * x.dtype.itemsize
    out_tile_bytes = tile_b * HEAD_PAD * 4
    act_bytes = 8 * tile_b * H * 4
    need = param_bytes + 2 * (x_tile_bytes + out_tile_bytes) + act_bytes + (4 << 20)
    vmem_limit = int(min(max(need, 16 << 20),
                         (_vmem_capacity_bytes() * 17) // 20))

    out = pl.pallas_call(
        discriminator_kernel,
        out_shape=jax.ShapeDtypeStruct((Bp, HEAD_PAD), jnp.float32),
        grid=(n_tiles,),
        in_specs=in_specs,
        out_specs=out_spec,
        compiler_params=pltpu.CompilerParams(
            dimension_semantics=("parallel",),
            vmem_limit_bytes=vmem_limit,
        ),
        cost_estimate=cost,
    )(x, *weight_args)

    return out[:B, :1]


def init_params(key, data_dim, h_dim, num_blocks):
    """Deterministic synthetic parameters, PyTorch-Linear-style uniform init.

    MXU weight matrices are stored in bf16 once at init time (no per-call
    convert pass); biases and LayerNorm parameters stay f32.
    """
    ks = jax.random.split(key, 4)

    def lin(k, fan_in, fan_out):
        bound = 1.0 / (fan_in ** 0.5)
        kw, kb = jax.random.split(k)
        w = jax.random.uniform(kw, (fan_in, fan_out), jnp.float32, -bound, bound)
        b = jax.random.uniform(kb, (1, fan_out), jnp.float32, -bound, bound)
        return w, b

    w1, b1 = lin(ks[0], data_dim, h_dim)
    w2, b2 = lin(ks[1], h_dim, 1)

    def block_lin(k):
        sub = jax.random.split(k, num_blocks)
        ws, bs = zip(*[lin(s, h_dim, h_dim) for s in sub])
        return jnp.stack(ws), jnp.stack(bs)

    ffw1, ffb1 = block_lin(ks[2])
    ffw2, ffb2 = block_lin(ks[3])

    # Head weight padded to a 128-wide block (lane-dense MXU output); column 0
    # holds the real fc2 weight, the rest are zeros and sliced off in wrapper.
    w2_pad = jnp.pad(w2, ((0, 0), (0, HEAD_PAD - 1)))

    return dict(
        w1=w1.astype(jnp.bfloat16), b1=b1,
        ln0_g=jnp.ones((1, h_dim), jnp.float32),
        ln0_b=jnp.zeros((1, h_dim), jnp.float32),
        ffw1=ffw1.astype(jnp.bfloat16), ffb1=ffb1,
        ffw2=ffw2.astype(jnp.bfloat16), ffb2=ffb2,
        ln1_g=jnp.ones((num_blocks, 1, h_dim), jnp.float32),
        ln1_b=jnp.zeros((num_blocks, 1, h_dim), jnp.float32),
        w2_pad=w2_pad.astype(jnp.bfloat16),
        b2=b2.reshape(1, 1),
    )


# ---- Pure-JAX reference (classic two-pass LayerNorm / where-based LeakyReLU,
# ---- same bf16 matmul operands as the kernel). -------------------------------

def _lrelu_ref(v):
    return jnp.where(v > 0, v, NEG_SLOPE * v)


def _layernorm_ref(v, gamma, beta):
    mu = jnp.mean(v, axis=-1, keepdims=True)
    var = jnp.mean((v - mu) * (v - mu), axis=-1, keepdims=True)
    return (v - mu) * lax.rsqrt(var + EPS) * gamma + beta


def reference_forward(x, params):
    xb = x.astype(jnp.bfloat16)
    h = jnp.dot(xb, params["w1"], preferred_element_type=jnp.float32) + params["b1"]
    out = _layernorm_ref(_lrelu_ref(h), params["ln0_g"], params["ln0_b"])
    nb = params["ffw1"].shape[0]
    for i in range(nb):
        res = out
        h1 = _lrelu_ref(
            jnp.dot(out.astype(jnp.bfloat16), params["ffw1"][i],
                    preferred_element_type=jnp.float32) + params["ffb1"][i])
        h2 = _lrelu_ref(
            jnp.dot(h1.astype(jnp.bfloat16), params["ffw2"][i],
                    preferred_element_type=jnp.float32) + params["ffb2"][i])
        out = _layernorm_ref(h2 + res, params["ln1_g"][i], params["ln1_b"][i])
    w2 = params["w2_pad"][:, :1]
    return jnp.dot(out.astype(jnp.bfloat16), w2,
                   preferred_element_type=jnp.float32) + params["b2"]


if __name__ == "__main__":
    # Small shapes consistent with the module; lane-dense hidden dim (128).
    # Batch chosen so the auto-derived tile_b=256 gives a 2-step parallel grid.
    BATCH, DATA_DIM, H_DIM, NUM_BLOCKS = 512, 32, 128, 2

    key = jax.random.PRNGKey(0)
    k_x, k_p = jax.random.split(key)
    x = jax.random.normal(k_x, (BATCH, DATA_DIM), jnp.float32)
    params = init_params(k_p, DATA_DIM, H_DIM, NUM_BLOCKS)

    out = jax.block_until_ready(discriminator_forward(x, params))
    ref = jax.block_until_ready(reference_forward(x, params))

    assert out.shape == (BATCH, 1)
    assert jnp.allclose(out, ref, atol=2e-3, rtol=2e-3), \
        float(jnp.max(jnp.abs(out - ref)))

    print("KERNEL_OK")
</pallas_src>

<mosaic_0001>
module attributes {stable_mosaic.version = 11 : i64} {
  func.func @discriminator_kernel(%arg0: i32, %arg1: memref<256x32xf32, #tpu.memory_space<vmem>>, %arg2: memref<32x128xbf16, #tpu.memory_space<vmem>>, %arg3: memref<1x128xf32, #tpu.memory_space<vmem>>, %arg4: memref<1x128xf32, #tpu.memory_space<vmem>>, %arg5: memref<1x128xf32, #tpu.memory_space<vmem>>, %arg6: memref<2x128x128xbf16, #tpu.memory_space<vmem>>, %arg7: memref<2x1x128xf32, #tpu.memory_space<vmem>>, %arg8: memref<2x128x128xbf16, #tpu.memory_space<vmem>>, %arg9: memref<2x1x128xf32, #tpu.memory_space<vmem>>, %arg10: memref<2x1x128xf32, #tpu.memory_space<vmem>>, %arg11: memref<2x1x128xf32, #tpu.memory_space<vmem>>, %arg12: memref<128x128xbf16, #tpu.memory_space<vmem>>, %arg13: memref<1x1xf32, #tpu.memory_space<vmem>>, %arg14: memref<256x128xf32, #tpu.memory_space<vmem>>) attributes {dimension_semantics = [#tpu.dimension_semantics<parallel>], iteration_bounds = array<i64: 2>, scalar_prefetch = 0 : i64, scratch_operands = 0 : i64, tpu.core_type = #tpu.core_type<tc>, window_params = [{transform_indices = @transform_0, window_bounds = array<i64: 256, 32>}, {pipeline_mode = #tpu.pipeline_mode<synchronous>, transform_indices = @transform_1, window_bounds = array<i64: 32, 128>}, {pipeline_mode = #tpu.pipeline_mode<synchronous>, transform_indices = @transform_2, window_bounds = array<i64: 1, 128>}, {pipeline_mode = #tpu.pipeline_mode<synchronous>, transform_indices = @transform_3, window_bounds = array<i64: 1, 128>}, {pipeline_mode = #tpu.pipeline_mode<synchronous>, transform_indices = @transform_4, window_bounds = array<i64: 1, 128>}, {pipeline_mode = #tpu.pipeline_mode<synchronous>, transform_indices = @transform_5, window_bounds = array<i64: 2, 128, 128>}, {pipeline_mode = #tpu.pipeline_mode<synchronous>, transform_indices = @transform_6, window_bounds = array<i64: 2, 1, 128>}, {pipeline_mode = #tpu.pipeline_mode<synchronous>, transform_indices = @transform_7, window_bounds = array<i64: 2, 128, 128>}, {pipeline_mode = #tpu.pipeline_mode<synchronous>, transform_indices = @transform_8, window_bounds = array<i64: 2, 1, 128>}, {pipeline_mode = #tpu.pipeline_mode<synchronous>, transform_indices = @transform_9, window_bounds = array<i64: 2, 1, 128>}, {pipeline_mode = #tpu.pipeline_mode<synchronous>, transform_indices = @transform_10, window_bounds = array<i64: 2, 1, 128>}, {pipeline_mode = #tpu.pipeline_mode<synchronous>, transform_indices = @transform_11, window_bounds = array<i64: 128, 128>}, {pipeline_mode = #tpu.pipeline_mode<synchronous>, transform_indices = @transform_12, window_bounds = array<i64: 1, 1>}, {transform_indices = @transform_13, window_bounds = array<i64: 256, 128>}]} {
    %c0 = arith.constant 0 : index
    %c0_0 = arith.constant 0 : index
    %0 = vector.load %arg1[%c0, %c0_0] : memref<256x32xf32, #tpu.memory_space<vmem>>, vector<256x32xf32>
    %1 = arith.truncf %0 : vector<256x32xf32> to vector<256x32xbf16>
    %c0_1 = arith.constant 0 : index
    %c0_2 = arith.constant 0 : index
    %2 = vector.load %arg2[%c0_1, %c0_2] : memref<32x128xbf16, #tpu.memory_space<vmem>>, vector<32x128xbf16>
    %cst = arith.constant dense<0.000000e+00> : vector<256x128xf32>
    %3 = tpu.matmul %1, %2, %cst {dimension_numbers = #tpu.dot_dimension_numbers<[1], [0], [0], [1], [0, 0, 1, 1], [], []>} : vector<256x32xbf16>, vector<32x128xbf16>, vector<256x128xf32> -> vector<256x128xf32>
    %c0_3 = arith.constant 0 : index
    %c0_4 = arith.constant 0 : index
    %4 = vector.load %arg3[%c0_3, %c0_4] : memref<1x128xf32, #tpu.memory_space<vmem>>, vector<1x128xf32>
    %5 = vector.broadcast %4 : vector<1x128xf32> to vector<256x128xf32>
    %6 = arith.addf %3, %5 : vector<256x128xf32>
    %cst_5 = arith.constant 1.000000e-01 : f32
    %7 = vector.broadcast %cst_5 : f32 to vector<256x128xf32>
    %8 = arith.mulf %7, %6 : vector<256x128xf32>
    %9 = arith.maximumf %6, %8 : vector<256x128xf32>
    %c0_6 = arith.constant 0 : index
    %c0_7 = arith.constant 0 : index
    %10 = vector.load %arg4[%c0_6, %c0_7] : memref<1x128xf32, #tpu.memory_space<vmem>>, vector<1x128xf32>
    %c0_8 = arith.constant 0 : index
    %c0_9 = arith.constant 0 : index
    %11 = vector.load %arg5[%c0_8, %c0_9] : memref<1x128xf32, #tpu.memory_space<vmem>>, vector<1x128xf32>
    %cst_10 = arith.constant dense<0.000000e+00> : vector<256xf32>
    %12 = vector.multi_reduction <add>, %9, %cst_10 [1] : vector<256x128xf32> to vector<256xf32>
    %13 = vector.shape_cast %12 : vector<256xf32> to vector<256x1xf32>
    %14 = arith.mulf %9, %9 : vector<256x128xf32>
    %cst_11 = arith.constant dense<0.000000e+00> : vector<256xf32>
    %15 = vector.multi_reduction <add>, %14, %cst_11 [1] : vector<256x128xf32> to vector<256xf32>
    %16 = vector.shape_cast %15 : vector<256xf32> to vector<256x1xf32>
    %cst_12 = arith.constant 7.812500e-03 : f32
    %17 = vector.broadcast %cst_12 : f32 to vector<256x1xf32>
    %18 = arith.mulf %13, %17 : vector<256x1xf32>
    %cst_13 = arith.constant 7.812500e-03 : f32
    %19 = vector.broadcast %cst_13 : f32 to vector<256x1xf32>
    %20 = arith.mulf %16, %19 : vector<256x1xf32>
    %21 = arith.mulf %18, %18 : vector<256x1xf32>
    %22 = arith.subf %20, %21 : vector<256x1xf32>
    %23 = vector.broadcast %18 : vector<256x1xf32> to vector<256x128xf32>
    %24 = arith.subf %9, %23 : vector<256x128xf32>
    %cst_14 = arith.constant 9.99999974E-6 : f32
    %25 = vector.broadcast %cst_14 : f32 to vector<256x1xf32>
    %26 = arith.addf %22, %25 : vector<256x1xf32>
    %27 = math.rsqrt %26 : vector<256x1xf32>
    %28 = vector.broadcast %27 : vector<256x1xf32> to vector<256x128xf32>
    %29 = arith.mulf %24, %28 : vector<256x128xf32>
    %30 = vector.broadcast %10 : vector<1x128xf32> to vector<256x128xf32>
    %31 = arith.mulf %29, %30 : vector<256x128xf32>
    %32 = vector.broadcast %11 : vector<1x128xf32> to vector<256x128xf32>
    %33 = arith.addf %31, %32 : vector<256x128xf32>
    %34 = arith.truncf %33 : vector<256x128xf32> to vector<256x128xbf16>
    %c0_15 = arith.constant 0 : index
    %c0_16 = arith.constant 0 : index
    %c0_17 = arith.constant 0 : index
    %35 = vector.load %arg6[%c0_15, %c0_16, %c0_17] : memref<2x128x128xbf16, #tpu.memory_space<vmem>>, vector<1x128x128xbf16>
    %36 = vector.shape_cast %35 : vector<1x128x128xbf16> to vector<128x128xbf16>
    %cst_18 = arith.constant dense<0.000000e+00> : vector<256x128xf32>
    %37 = tpu.matmul %34, %36, %cst_18 {dimension_numbers = #tpu.dot_dimension_numbers<[1], [0], [0], [1], [0, 0, 1, 1], [], []>} : vector<256x128xbf16>, vector<128x128xbf16>, vector<256x128xf32> -> vector<256x128xf32>
    %c0_19 = arith.constant 0 : index
    %c0_20 = arith.constant 0 : index
    %c0_21 = arith.constant 0 : index
    %38 = vector.load %arg7[%c0_19, %c0_20, %c0_21] : memref<2x1x128xf32, #tpu.memory_space<vmem>>, vector<1x1x128xf32>
    %39 = vector.shape_cast %38 : vector<1x1x128xf32> to vector<1x128xf32>
    %40 = vector.broadcast %39 : vector<1x128xf32> to vector<256x128xf32>
    %41 = arith.addf %37, %40 : vector<256x128xf32>
    %cst_22 = arith.constant 1.000000e-01 : f32
    %42 = vector.broadcast %cst_22 : f32 to vector<256x128xf32>
    %43 = arith.mulf %42, %41 : vector<256x128xf32>
    %44 = arith.maximumf %41, %43 : vector<256x128xf32>
    %45 = arith.truncf %44 : vector<256x128xf32> to vector<256x128xbf16>
    %c0_23 = arith.constant 0 : index
    %c0_24 = arith.constant 0 : index
    %c0_25 = arith.constant 0 : index
    %46 = vector.load %arg8[%c0_23, %c0_24, %c0_25] : memref<2x128x128xbf16, #tpu.memory_space<vmem>>, vector<1x128x128xbf16>
    %47 = vector.shape_cast %46 : vector<1x128x128xbf16> to vector<128x128xbf16>
    %cst_26 = arith.constant dense<0.000000e+00> : vector<256x128xf32>
    %48 = tpu.matmul %45, %47, %cst_26 {dimension_numbers = #tpu.dot_dimension_numbers<[1], [0], [0], [1], [0, 0, 1, 1], [], []>} : vector<256x128xbf16>, vector<128x128xbf16>, vector<256x128xf32> -> vector<256x128xf32>
    %c0_27 = arith.constant 0 : index
    %c0_28 = arith.constant 0 : index
    %c0_29 = arith.constant 0 : index
    %49 = vector.load %arg9[%c0_27, %c0_28, %c0_29] : memref<2x1x128xf32, #tpu.memory_space<vmem>>, vector<1x1x128xf32>
    %50 = vector.shape_cast %49 : vector<1x1x128xf32> to vector<1x128xf32>
    %51 = vector.broadcast %50 : vector<1x128xf32> to vector<256x128xf32>
    %52 = arith.addf %48, %51 : vector<256x128xf32>
    %cst_30 = arith.constant 1.000000e-01 : f32
    %53 = vector.broadcast %cst_30 : f32 to vector<256x128xf32>
    %54 = arith.mulf %53, %52 : vector<256x128xf32>
    %55 = arith.maximumf %52, %54 : vector<256x128xf32>
    %56 = arith.addf %55, %33 : vector<256x128xf32>
    %c0_31 = arith.constant 0 : index
    %c0_32 = arith.constant 0 : index
    %c0_33 = arith.constant 0 : index
    %57 = vector.load %arg10[%c0_31, %c0_32, %c0_33] : memref<2x1x128xf32, #tpu.memory_space<vmem>>, vector<1x1x128xf32>
    %58 = vector.shape_cast %57 : vector<1x1x128xf32> to vector<1x128xf32>
    %c0_34 = arith.constant 0 : index
    %c0_35 = arith.constant 0 : index
    %c0_36 = arith.constant 0 : index
    %59 = vector.load %arg11[%c0_34, %c0_35, %c0_36] : memref<2x1x128xf32, #tpu.memory_space<vmem>>, vector<1x1x128xf32>
    %60 = vector.shape_cast %59 : vector<1x1x128xf32> to vector<1x128xf32>
    %cst_37 = arith.constant dense<0.000000e+00> : vector<256xf32>
    %61 = vector.multi_reduction <add>, %56, %cst_37 [1] : vector<256x128xf32> to vector<256xf32>
    %62 = vector.shape_cast %61 : vector<256xf32> to vector<256x1xf32>
    %63 = arith.mulf %56, %56 : vector<256x128xf32>
    %cst_38 = arith.constant dense<0.000000e+00> : vector<256xf32>
    %64 = vector.multi_reduction <add>, %63, %cst_38 [1] : vector<256x128xf32> to vector<256xf32>
    %65 = vector.shape_cast %64 : vector<256xf32> to vector<256x1xf32>
    %cst_39 = arith.constant 7.812500e-03 : f32
    %66 = vector.broadcast %cst_39 : f32 to vector<256x1xf32>
    %67 = arith.mulf %62, %66 : vector<256x1xf32>
    %cst_40 = arith.constant 7.812500e-03 : f32
    %68 = vector.broadcast %cst_40 : f32 to vector<256x1xf32>
    %69 = arith.mulf %65, %68 : vector<256x1xf32>
    %70 = arith.mulf %67, %67 : vector<256x1xf32>
    %71 = arith.subf %69, %70 : vector<256x1xf32>
    %72 = vector.broadcast %67 : vector<256x1xf32> to vector<256x128xf32>
    %73 = arith.subf %56, %72 : vector<256x128xf32>
    %cst_41 = arith.constant 9.99999974E-6 : f32
    %74 = vector.broadcast %cst_41 : f32 to vector<256x1xf32>
    %75 = arith.addf %71, %74 : vector<256x1xf32>
    %76 = math.rsqrt %75 : vector<256x1xf32>
    %77 = vector.broadcast %76 : vector<256x1xf32> to vector<256x128xf32>
    %78 = arith.mulf %73, %77 : vector<256x128xf32>
    %79 = vector.broadcast %58 : vector<1x128xf32> to vector<256x128xf32>
    %80 = arith.mulf %78, %79 : vector<256x128xf32>
    %81 = vector.broadcast %60 : vector<1x128xf32> to vector<256x128xf32>
    %82 = arith.addf %80, %81 : vector<256x128xf32>
    %83 = arith.truncf %82 : vector<256x128xf32> to vector<256x128xbf16>
    %c1 = arith.constant 1 : index
    %c0_42 = arith.constant 0 : index
    %c0_43 = arith.constant 0 : index
    %84 = vector.load %arg6[%c1, %c0_42, %c0_43] : memref<2x128x128xbf16, #tpu.memory_space<vmem>>, vector<1x128x128xbf16>
    %85 = vector.shape_cast %84 : vector<1x128x128xbf16> to vector<128x128xbf16>
    %cst_44 = arith.constant dense<0.000000e+00> : vector<256x128xf32>
    %86 = tpu.matmul %83, %85, %cst_44 {dimension_numbers = #tpu.dot_dimension_numbers<[1], [0], [0], [1], [0, 0, 1, 1], [], []>} : vector<256x128xbf16>, vector<128x128xbf16>, vector<256x128xf32> -> vector<256x128xf32>
    %c1_45 = arith.constant 1 : index
    %c0_46 = arith.constant 0 : index
    %c0_47 = arith.constant 0 : index
    %87 = vector.load %arg7[%c1_45, %c0_46, %c0_47] : memref<2x1x128xf32, #tpu.memory_space<vmem>>, vector<1x1x128xf32>
    %88 = vector.shape_cast %87 : vector<1x1x128xf32> to vector<1x128xf32>
    %89 = vector.broadcast %88 : vector<1x128xf32> to vector<256x128xf32>
    %90 = arith.addf %86, %89 : vector<256x128xf32>
    %cst_48 = arith.constant 1.000000e-01 : f32
    %91 = vector.broadcast %cst_48 : f32 to vector<256x128xf32>
    %92 = arith.mulf %91, %90 : vector<256x128xf32>
    %93 = arith.maximumf %90, %92 : vector<256x128xf32>
    %94 = arith.truncf %93 : vector<256x128xf32> to vector<256x128xbf16>
    %c1_49 = arith.constant 1 : index
    %c0_50 = arith.constant 0 : index
    %c0_51 = arith.constant 0 : index
    %95 = vector.load %arg8[%c1_49, %c0_50, %c0_51] : memref<2x128x128xbf16, #tpu.memory_space<vmem>>, vector<1x128x128xbf16>
    %96 = vector.shape_cast %95 : vector<1x128x128xbf16> to vector<128x128xbf16>
    %cst_52 = arith.constant dense<0.000000e+00> : vector<256x128xf32>
    %97 = tpu.matmul %94, %96, %cst_52 {dimension_numbers = #tpu.dot_dimension_numbers<[1], [0], [0], [1], [0, 0, 1, 1], [], []>} : vector<256x128xbf16>, vector<128x128xbf16>, vector<256x128xf32> -> vector<256x128xf32>
    %c1_53 = arith.constant 1 : index
    %c0_54 = arith.constant 0 : index
    %c0_55 = arith.constant 0 : index
    %98 = vector.load %arg9[%c1_53, %c0_54, %c0_55] : memref<2x1x128xf32, #tpu.memory_space<vmem>>, vector<1x1x128xf32>
    %99 = vector.shape_cast %98 : vector<1x1x128xf32> to vector<1x128xf32>
    %100 = vector.broadcast %99 : vector<1x128xf32> to vector<256x128xf32>
    %101 = arith.addf %97, %100 : vector<256x128xf32>
    %cst_56 = arith.constant 1.000000e-01 : f32
    %102 = vector.broadcast %cst_56 : f32 to vector<256x128xf32>
    %103 = arith.mulf %102, %101 : vector<256x128xf32>
    %104 = arith.maximumf %101, %103 : vector<256x128xf32>
    %105 = arith.addf %104, %82 : vector<256x128xf32>
    %c1_57 = arith.constant 1 : index
    %c0_58 = arith.constant 0 : index
    %c0_59 = arith.constant 0 : index
    %106 = vector.load %arg10[%c1_57, %c0_58, %c0_59] : memref<2x1x128xf32, #tpu.memory_space<vmem>>, vector<1x1x128xf32>
    %107 = vector.shape_cast %106 : vector<1x1x128xf32> to vector<1x128xf32>
    %c1_60 = arith.constant 1 : index
    %c0_61 = arith.constant 0 : index
    %c0_62 = arith.constant 0 : index
    %108 = vector.load %arg11[%c1_60, %c0_61, %c0_62] : memref<2x1x128xf32, #tpu.memory_space<vmem>>, vector<1x1x128xf32>
    %109 = vector.shape_cast %108 : vector<1x1x128xf32> to vector<1x128xf32>
    %cst_63 = arith.constant dense<0.000000e+00> : vector<256xf32>
    %110 = vector.multi_reduction <add>, %105, %cst_63 [1] : vector<256x128xf32> to vector<256xf32>
    %111 = vector.shape_cast %110 : vector<256xf32> to vector<256x1xf32>
    %112 = arith.mulf %105, %105 : vector<256x128xf32>
    %cst_64 = arith.constant dense<0.000000e+00> : vector<256xf32>
    %113 = vector.multi_reduction <add>, %112, %cst_64 [1] : vector<256x128xf32> to vector<256xf32>
    %114 = vector.shape_cast %113 : vector<256xf32> to vector<256x1xf32>
    %cst_65 = arith.constant 7.812500e-03 : f32
    %115 = vector.broadcast %cst_65 : f32 to vector<256x1xf32>
    %116 = arith.mulf %111, %115 : vector<256x1xf32>
    %cst_66 = arith.constant 7.812500e-03 : f32
    %117 = vector.broadcast %cst_66 : f32 to vector<256x1xf32>
    %118 = arith.mulf %114, %117 : vector<256x1xf32>
    %119 = arith.mulf %116, %116 : vector<256x1xf32>
    %120 = arith.subf %118, %119 : vector<256x1xf32>
    %121 = vector.broadcast %116 : vector<256x1xf32> to vector<256x128xf32>
    %122 = arith.subf %105, %121 : vector<256x128xf32>
    %cst_67 = arith.constant 9.99999974E-6 : f32
    %123 = vector.broadcast %cst_67 : f32 to vector<256x1xf32>
    %124 = arith.addf %120, %123 : vector<256x1xf32>
    %125 = math.rsqrt %124 : vector<256x1xf32>
    %126 = vector.broadcast %125 : vector<256x1xf32> to vector<256x128xf32>
    %127 = arith.mulf %122, %126 : vector<256x128xf32>
    %128 = vector.broadcast %107 : vector<1x128xf32> to vector<256x128xf32>
    %129 = arith.mulf %127, %128 : vector<256x128xf32>
    %130 = vector.broadcast %109 : vector<1x128xf32> to vector<256x128xf32>
    %131 = arith.addf %129, %130 : vector<256x128xf32>
    %132 = arith.truncf %131 : vector<256x128xf32> to vector<256x128xbf16>
    %c0_68 = arith.constant 0 : index
    %c0_69 = arith.constant 0 : index
    %133 = vector.load %arg12[%c0_68, %c0_69] : memref<128x128xbf16, #tpu.memory_space<vmem>>, vector<128x128xbf16>
    %cst_70 = arith.constant dense<0.000000e+00> : vector<256x128xf32>
    %134 = tpu.matmul %132, %133, %cst_70 {dimension_numbers = #tpu.dot_dimension_numbers<[1], [0], [0], [1], [0, 0, 1, 1], [], []>} : vector<256x128xbf16>, vector<128x128xbf16>, vector<256x128xf32> -> vector<256x128xf32>
    %c0_71 = arith.constant 0 : index
    %c0_72 = arith.constant 0 : index
    %135 = vector.load %arg13[%c0_71, %c0_72] : memref<1x1xf32, #tpu.memory_space<vmem>>, vector<1x1xf32>
    %136 = vector.broadcast %135 : vector<1x1xf32> to vector<256x128xf32>
    %137 = arith.addf %134, %136 : vector<256x128xf32>
    %c0_73 = arith.constant 0 : index
    %c0_74 = arith.constant 0 : index
    %138 = vector.load %arg14[%c0_73, %c0_74] : memref<256x128xf32, #tpu.memory_space<vmem>>, vector<256x128xf32>
    tpu.vector_store %arg14[%c0_73, %c0_74], %137 {strides = array<i32>} : memref<256x128xf32, #tpu.memory_space<vmem>>, vector<256x128xf32>,
    return
  }
  func.func @transform_0(%arg0: i32) -> (i32, i32) {
    %c0_i32 = arith.constant 0 : i32
    %c0_i32_0 = arith.constant 0 : i32
    return %arg0, %c0_i32 : i32, i32
  }
  func.func @transform_1(%arg0: i32) -> (i32, i32) {
    %c0_i32 = arith.constant 0 : i32
    %c0_i32_0 = arith.constant 0 : i32
    %c0_i32_1 = arith.constant 0 : i32
    return %c0_i32, %c0_i32_0 : i32, i32
  }
  func.func @transform_2(%arg0: i32) -> (i32, i32) {
    %c0_i32 = arith.constant 0 : i32
    %c0_i32_0 = arith.constant 0 : i32
    %c0_i32_1 = arith.constant 0 : i32
    return %c0_i32, %c0_i32_0 : i32, i32
  }
  func.func @transform_3(%arg0: i32) -> (i32, i32) {
    %c0_i32 = arith.constant 0 : i32
    %c0_i32_0 = arith.constant 0 : i32
    %c0_i32_1 = arith.constant 0 : i32
    return %c0_i32, %c0_i32_0 : i32, i32
  }
  func.func @transform_4(%arg0: i32) -> (i32, i32) {
    %c0_i32 = arith.constant 0 : i32
    %c0_i32_0 = arith.constant 0 : i32
    %c0_i32_1 = arith.constant 0 : i32
    return %c0_i32, %c0_i32_0 : i32, i32
  }
  func.func @transform_5(%arg0: i32) -> (i32, i32, i32) {
    %c0_i32 = arith.constant 0 : i32
    %c0_i32_0 = arith.constant 0 : i32
    %c0_i32_1 = arith.constant 0 : i32
    %c0_i32_2 = arith.constant 0 : i32
    return %c0_i32, %c0_i32_0, %c0_i32_1 : i32, i32, i32
  }
  func.func @transform_6(%arg0: i32) -> (i32, i32, i32) {
    %c0_i32 = arith.constant 0 : i32
    %c0_i32_0 = arith.constant 0 : i32
    %c0_i32_1 = arith.constant 0 : i32
    %c0_i32_2 = arith.constant 0 : i32
    return %c0_i32, %c0_i32_0, %c0_i32_1 : i32, i32, i32
  }
  func.func @transform_7(%arg0: i32) -> (i32, i32, i32) {
    %c0_i32 = arith.constant 0 : i32
    %c0_i32_0 = arith.constant 0 : i32
    %c0_i32_1 = arith.constant 0 : i32
    %c0_i32_2 = arith.constant 0 : i32
    return %c0_i32, %c0_i32_0, %c0_i32_1 : i32, i32, i32
  }
  func.func @transform_8(%arg0: i32) -> (i32, i32, i32) {
    %c0_i32 = arith.constant 0 : i32
    %c0_i32_0 = arith.constant 0 : i32
    %c0_i32_1 = arith.constant 0 : i32
    %c0_i32_2 = arith.constant 0 : i32
    return %c0_i32, %c0_i32_0, %c0_i32_1 : i32, i32, i32
  }
  func.func @transform_9(%arg0: i32) -> (i32, i32, i32) {
    %c0_i32 = arith.constant 0 : i32
    %c0_i32_0 = arith.constant 0 : i32
    %c0_i32_1 = arith.constant 0 : i32
    %c0_i32_2 = arith.constant 0 : i32
    return %c0_i32, %c0_i32_0, %c0_i32_1 : i32, i32, i32
  }
  func.func @transform_10(%arg0: i32) -> (i32, i32, i32) {
    %c0_i32 = arith.constant 0 : i32
    %c0_i32_0 = arith.constant 0 : i32
    %c0_i32_1 = arith.constant 0 : i32
    %c0_i32_2 = arith.constant 0 : i32
    return %c0_i32, %c0_i32_0, %c0_i32_1 : i32, i32, i32
  }
  func.func @transform_11(%arg0: i32) -> (i32, i32) {
    %c0_i32 = arith.constant 0 : i32
    %c0_i32_0 = arith.constant 0 : i32
    %c0_i32_1 = arith.constant 0 : i32
    return %c0_i32, %c0_i32_0 : i32, i32
  }
  func.func @transform_12(%arg0: i32) -> (i32, i32) {
    %c0_i32 = arith.constant 0 : i32
    %c0_i32_0 = arith.constant 0 : i32
    %c0_i32_1 = arith.constant 0 : i32
    return %c0_i32, %c0_i32_0 : i32, i32
  }
  func.func @transform_13(%arg0: i32) -> (i32, i32) {
    %c0_i32 = arith.constant 0 : i32
    %c0_i32_0 = arith.constant 0 : i32
    return %arg0, %c0_i32 : i32, i32
  }
}

</mosaic_0001>

<bundles_post_ra>
// kernel: tpu_custom_call.1
= control target key start
LH: loop header
LB: loop body
LE: loop exit
PB: predicated region body
PF: predicated region fallthrough
CT: control target
= control target key end

     0   :  { %s6973_s0 = inlined_call_operand.vmem [shape: f32[512,32], index: 0, kind: input, shape index: {}]   ;;  %s6974_s1 = inlined_call_operand.vmem [shape: bf16[32,128], index: 1, kind: input, shape index: {}]   ;;  %s6975_s2 = inlined_call_operand.vmem [shape: f32[1,128], index: 2, kind: input, shape index: {}]   ;;  %s6976_s3 = inlined_call_operand.vmem [shape: f32[1,128], index: 3, kind: input, shape index: {}]   ;;  %s6977_s4 = inlined_call_operand.vmem [shape: f32[1,128], index: 4, kind: input, shape index: {}]   ;;  %s6978_s5 = inlined_call_operand.vmem [shape: bf16[2,128,128], index: 5, kind: input, shape index: {}]   ;;  %s6979_s6 = inlined_call_operand.vmem [shape: f32[2,1,128], index: 6, kind: input, shape index: {}]   ;;  %s6980_s7 = inlined_call_operand.vmem [shape: bf16[2,128,128], index: 7, kind: input, shape index: {}]   ;;  %s6981_s8 = inlined_call_operand.vmem [shape: f32[2,1,128], index: 8, kind: input, shape index: {}]   ;;  %s6982_s9 = inlined_call_operand.vmem [shape: f32[2,1,128], index: 9, kind: input, shape index: {}]   ;;  %s6983_s10 = inlined_call_operand.vmem [shape: f32[2,1,128], index: 10, kind: input, shape index: {}]   ;;  %s6984_s11 = inlined_call_operand.vmem [shape: bf16[128,128], index: 11, kind: input, shape index: {}]   ;;  %s6985_s12 = inlined_call_operand.<no memory space> [shape: f32[1,1], index: 12, kind: input, shape index: {}]   ;;  %s6986_s13 = inlined_call_operand.hbm [shape: f32[512,128], index: 13, kind: output, shape index: {}]  }
   0x1   :  { %6987 = sst [smem:[#allocation6_spill]] %s6973_s0  ;;  %v18_v0 = vstv %s6985_s12 }
   0x2   :  { %6988 = sst [smem:[#allocation7_spill]] %s6974_s1  ;;  %19 = vst [vmem:[#allocation2] sm:$0x1] %v18_v0 }
   0x3   :  { %20 = vsyncpa [#allocation4], 0 }
   0x4   :  { %22 = vsyncpa [#allocation4 + $0x1], 0  ;;  %s4914_s27 = smov 0   ;;  %s4916_s28 = smov 0  }
   0x5   :  { %s4918_s29 = smov 0   ;;  %s4920_s30 = smov 0  }
   0x6 LB: > { %s4935_s12 = sadd.s32 4294967295, %s4835_s30   ;;  %s3949_s14 = sadd.s32 4294967294, %s4835_s30   ;;  %s4835_s30 = sphi %s4920_s30, %s6996_s30   ;;  %s4831_s29 = sphi %s4918_s29, %s6995_s29   ;;  %s4827_s28 = sphi %s4916_s28, %s6994_s28   ;;  %s4823_s27 = sphi %s4914_s27, %s6993_s27  }
   0x7   : > { %s4939_s15 = sadd.s32 1, %s4835_s30   ;;  %s313_s16 = sadd.s32 1, %s4831_s29 }
   0x8   : > { %s310_s17 = ssub.s32 %s4835_s30, %s4939_s15  ;;  %p323_p0 = scmp.ne.s32.totalorder %s4831_s29, %s4827_s28 }
   0x9   : > { %p311_p1 = scmp.eq.s32.totalorder %s310_s17, 0  ;;  %p324_p2 = scmp.eq.s32.totalorder %s4935_s12, 1 }
   0xa   : > { %p329_p3 = scmp.ne.s32.totalorder %s4827_s28, %s4823_s27  ;;  %p330_p4 = scmp.eq.s32.totalorder %s3949_s14, 1 }
   0xb   : > { %s4950_s18 = scalar_select %p311_p1, %s4831_s29, %s313_s16  }
   0xc   : > { %p4952_p5 = por %p324_p2, %p323_p0  ;;  %p4956_p6 = por %p330_p4, %p329_p3 }
   0xd   : > { %p3952_p7 = scmp.ge.s32.totalorder %s4835_s30, 1  ;;  %p393_p8 = scmp.lt.s32.totalorder %s4835_s30, 3 }
   0xf   : > { %p394_p9 = pnand %p3952_p7, %p393_p8 }
  0x10   : > { %s6991_s1 = sld [smem:[#allocation7_spill]] (!%p394_p9)  ;;  %s3954_s23 = sshll.u32 (!%p394_p9), %s4935_s12, 5 }
  0x11   : > { %397 = sbr.rel (%p394_p9) target bundleno = 1923 (0x783), region = 72  ;;  %p438_p10 = scmp.lt.s32.totalorder (!%p394_p9), %s3954_s23, 63 }
  0x12   : > { %s6992_s0 = sld [smem:[#allocation6_spill]] (!%p394_p9)  ;;  %s434_s24 = sand.u32 (!%p394_p9), 1, %s4827_s28  }
  0x13   : > { %s3953_s25 = sshll.u32 (!%p394_p9), %s434_s24, 8  ;;  %s4067_s14 = sshll.u32 (!%p394_p9), %s4935_s12, 12 }
  0x14   : > { %s6924_s22 = scalar_lea.hbm (!%p394_p9), %s6986_s13, %s4067_s14  ;;  %s6933_s12 = scalar_lea.sflag (!%p394_p9), [#allocation4], %s434_s24 }
  0x16   : > { %v4541_v1 = vld [vmem:[%s6991_s1 + $0x8] sm:$0xff]   ;;  %v4542_v2 = vld [vmem:[%s6991_s1] sm:$0xff]   ;;  %s6998_s23 = smov (!%p438_p10, %s3954_s23), 63  ;;  %vm516_vm0 = vcmask 261120  }
  0x17   : > { %4206 = vmatprep.subr.bf16.mxu0 %v4541_v1  ;;  %s3955_s26 = sshll.u32 %s6998_s23, 3  ;;  %v5025_v51 = vld [vmem:[%s6975_s2] ss:$0 sm:$0xff] }
  0x18   : > { %4207 = vmatpush3.bf16.msra.mxu0 %v4541_v1  ;;  %s4972_s17 = scalar_lea.vmem %s6992_s0, %s3955_s26  ;;  %s6857_s26 = scalar_lea.vmem [#allocation3], %s3953_s25 }
  0x19   : > { %4208 = vmatprep.subr.bf16.mxu0 %v4542_v2  ;;  %v445_v3 = vld [vmem:[%s4972_s17] sm:$0xff]  ;;  %v446_v4 = vld [vmem:[%s4972_s17 + $0x8] sm:$0xff]  ;;  %v447_v5 = vld [vmem:[%s4972_s17 + $0x10] sm:$0xff]  ;;  %s3887_s16 = sshll.u32 %s6857_s26, 4  ;;  %s4838_s25 = smov [#allocation3]   ;;  %s6926_s16 = int_to_ptr.vmem [resolvable:$true] %s3887_s16 }
  0x1a   : > { %v477_v6 = vpack.c.bf16 %v446_v4, %v445_v3  ;;  %v448_v7 = vld [vmem:[%s4972_s17 + $0x18] sm:$0xff]  ;;  %v449_v8 = vld [vmem:[%s4972_s17 + $0x20] sm:$0xff]  ;;  %v450_v9 = vld [vmem:[%s4972_s17 + $0x28] sm:$0xff]  ;;  %s4775_s23 = scalar_lea.vmem %s6926_s16, 4096  ;;  %s4779_s14 = sshll.u32 %s4838_s25, 4  ;;  %s4780_s14 = int_to_ptr.vmem [resolvable:$false] %s4779_s14 }
  0x1b   : > { %v478_v10 = vpack.c.bf16 %v448_v7, %v447_v5  ;;  %v479_v11 = vpack.c.bf16 %v450_v9, %v449_v8  ;;  %v451_v12 = vld [vmem:[%s4972_s17 + $0x30] sm:$0xff]  ;;  %v452_v13 = vld [vmem:[%s4972_s17 + $0x38] sm:$0xff]  ;;  %v453_v14 = vld [vmem:[%s4972_s17 + $0x40] sm:$0xff]  ;;  %p4776_p11 = scmp.ne.s32.totalorder %s6926_s16, %s4775_s23  ;;  %p4782_p0 = scmp.lt.s32.totalorder %s6926_s16, %s4780_s14 }
  0x1c   : > { %4209 = vmatpush3.bf16.msra.mxu0 %v4542_v2  ;;  %4210 = vmatprep.mubr.msk.bf16.mxu0 %vm516_vm0, %v477_v6  ;;  %v454_v15 = vld [vmem:[%s4972_s17 + $0x48] sm:$0xff]  ;;  %v480_v16 = vpack.c.bf16 %v452_v13, %v451_v12  ;;  %v455_v18 = vld [vmem:[%s4972_s17 + $0x50] sm:$0xff]  ;;  %v456_v19 = vld [vmem:[%s4972_s17 + $0x58] sm:$0xff] }
  0x1d   : > { %v481_v17 = vpack.c.bf16 %v454_v15, %v453_v14  ;;  %v457_v20 = vld [vmem:[%s4972_s17 + $0x60] sm:$0xff]  ;;  %v458_v21 = vld [vmem:[%s4972_s17 + $0x68] sm:$0xff]  ;;  %v482_v22 = vpack.c.bf16 %v456_v19, %v455_v18  ;;  %v459_v24 = vld [vmem:[%s4972_s17 + $0x70] sm:$0xff]  ;;  %p4777_p12 = pnand %p4776_p11, %p4952_p5 }
  0x1e   : > { %v483_v23 = vpack.c.bf16 %v458_v21, %v457_v20  ;;  %v460_v25 = vld [vmem:[%s4972_s17 + $0x78] sm:$0xff]  ;;  %v461_v26 = vld [vmem:[%s4972_s17 + $0x80] sm:$0xff]  ;;  %v462_v27 = vld [vmem:[%s4972_s17 + $0x88] sm:$0xff] }
  0x1f   : > { %4211 = vmatmul.mubr.msk.bf16.vlgmr.msra.gmra.mxu0 %vm516_vm0, %v478_v10  ;;  %v484_v28 = vpack.c.bf16 %v460_v25, %v459_v24  ;;  %v485_v29 = vpack.c.bf16 %v462_v27, %v461_v26  ;;  %v463_v30 = vld [vmem:[%s4972_s17 + $0x90] sm:$0xff]  ;;  %v464_v31 = vld [vmem:[%s4972_s17 + $0x98] sm:$0xff]  ;;  %v465_v32 = vld [vmem:[%s4972_s17 + $0xa0] sm:$0xff]  ;;  %p4778_p13 = pneg %p4777_p12 }
  0x20   : > { %4214 = vmatprep.mubr.msk.bf16.mxu0 %vm516_vm0, %v479_v11  ;;  %v466_v33 = vld [vmem:[%s4972_s17 + $0xa8] sm:$0xff]  ;;  %v486_v34 = vpack.c.bf16 %v464_v31, %v463_v30  ;;  %v467_v36 = vld [vmem:[%s4972_s17 + $0xb0] sm:$0xff]  ;;  %v468_v37 = vld [vmem:[%s4972_s17 + $0xb8] sm:$0xff] }
  0x21   : > { %v487_v35 = vpack.c.bf16 %v466_v33, %v465_v32  ;;  %v469_v38 = vld [vmem:[%s4972_s17 + $0xc0] sm:$0xff]  ;;  %v470_v39 = vld [vmem:[%s4972_s17 + $0xc8] sm:$0xff]  ;;  %v488_v40 = vpack.c.bf16 %v468_v37, %v467_v36  ;;  %v471_v42 = vld [vmem:[%s4972_s17 + $0xd0] sm:$0xff] }
  0x22   : > { %v489_v41 = vpack.c.bf16 %v470_v39, %v469_v38  ;;  %v472_v43 = vld [vmem:[%s4972_s17 + $0xd8] sm:$0xff]  ;;  %v473_v44 = vld [vmem:[%s4972_s17 + $0xe0] sm:$0xff]  ;;  %v474_v45 = vld [vmem:[%s4972_s17 + $0xe8] sm:$0xff] }
  0x23   : > { %v490_v46 = vpack.c.bf16 %v472_v43, %v471_v42  ;;  %v491_v47 = vpack.c.bf16 %v474_v45, %v473_v44  ;;  %v475_v48 = vld [vmem:[%s4972_s17 + $0xf0] sm:$0xff]  ;;  %v476_v49 = vld [vmem:[%s4972_s17 + $0xf8] sm:$0xff]  ;;  %s4781_s17 = scalar_lea.vmem %s4780_s14, 8192 }
  0x24   : > { %v492_v50 = vpack.c.bf16 %v476_v49, %v475_v48  ;;  %v4543_v27 = vld [vmem:[%s6978_s5 + $0x38] sm:$0xff]   ;;  %v4544_v33 = vld [vmem:[%s6978_s5 + $0x30] sm:$0xff]   ;;  %p4783_p1 = scmp.lt.s32.totalorder %s4781_s17, %s4775_s23 }
  0x25   : > { %4242 = vmatprep.subr.bf16.mxu1 %v4543_v27 }
  0x26   : > { %4243 = vmatpush3.bf16.msra.mxu1 %v4543_v27  ;;  %p4784_p2 = por %p4783_p1, %p4782_p0 }
  0x27   : > { %4215 = vmatmul.mubr.msk.bf16.gmra.mxu0 %vm516_vm0, %v480_v16  ;;  %4244 = vmatprep.subr.bf16.mxu1 %v4544_v33 }
  0x28   : > { %4218 = vmatprep.mubr.msk.bf16.mxu0 %vm516_vm0, %v481_v17  ;;  %p4785_p3 = pnand %p4784_p2, %p4778_p13 }
  0x2a   : > { %4245 = vmatpush3.bf16.msra.mxu1 %v4544_v33 }
  0x2f   : > { %4219 = vmatmul.mubr.msk.bf16.gmra.mxu0 %vm516_vm0, %v482_v22 }
  0x30   : > { %4222 = vmatprep.mubr.msk.bf16.mxu0 %vm516_vm0, %v483_v23 }
  0x37   : > { %4223 = vmatmul.mubr.msk.bf16.gmra.mxu0 %vm516_vm0, %v484_v28 }
  0x38   : > { %4226 = vmatprep.mubr.msk.bf16.mxu0 %vm516_vm0, %v485_v29 }
  0x3f   : > { %4227 = vmatmul.mubr.msk.bf16.gmra.mxu0 %vm516_vm0, %v486_v34 }
  0x40   : > { %4230 = vmatprep.mubr.msk.bf16.mxu0 %vm516_vm0, %v487_v35 }
  0x47   : > { %4231 = vmatmul.mubr.msk.bf16.gmra.mxu0 %vm516_vm0, %v488_v40 }
  0x48   : > { %4234 = vmatprep.mubr.msk.bf16.mxu0 %vm516_vm0, %v489_v41  ;;  %v4545_v41 = vld [vmem:[%s6978_s5 + $0x28] sm:$0xff]  }
  0x49   : > { %4246 = vmatprep.subr.bf16.mxu1 %v4545_v41 }
  0x4a   : > { %4247 = vmatpush3.bf16.msra.mxu1 %v4545_v41 }
  0x4f   : > { %4235 = vmatmul.mubr.msk.bf16.gmra.mxu0 %vm516_vm0, %v490_v46 }
  0x50   : > { %4238 = vmatprep.mubr.msk.bf16.mxu0 %vm516_vm0, %v491_v47  ;;  %v4546_v47 = vld [vmem:[%s6978_s5 + $0x20] sm:$0xff]  }
  0x51   : > { %4248 = vmatprep.subr.bf16.mxu1 %v4546_v47 }
  0x52   : > { %4249 = vmatpush3.bf16.msra.mxu1 %v4546_v47 }
  0x57   : > { %4239 = vmatmul.mubr.msk.bf16.gmra.mxu0 %vm516_vm0, %v492_v50 }
  0xdf   : > { %v4212_v52 = vpop.f32.mrf.mxu0 }
  0xe0   : > { %v608_v53 = vadd.f32 %v4212_v52, %v5025_v51  ;;  %v4547_v52 = vld [vmem:[%s6978_s5 + $0x18] sm:$0xff]  }
  0xe1   : > { %v599_v54 = vpop.f32.mrf.mxu0  ;;  %4250 = vmatprep.subr.bf16.mxu1 %v4547_v52 }
  0xe2   : > { %v728_v55 = vmul.f32 0.1, %v608_v53  ;;  %v600_v56 = vadd.f32 %v5025_v51, %v599_v54  ;;  %4251 = vmatpush3.bf16.msra.mxu1 %v4547_v52 }
  0xe3   : > { %v4213_v57 = vpop.f32.mrf.mxu0 }
  0xe4   : > { %v5029_v58 = vmax.f32 %v608_v53, %v728_v55  ;;  %v726_v59 = vmul.f32 0.1, %v600_v56  ;;  %v611_v60 = vadd.f32 %v4213_v57, %v5025_v51 }
  0xe5   : > { %v602_v61 = vpop.f32.mrf.mxu0 }
  0xe6   : > { %v5032_v62 = vmax.f32 %v600_v56, %v726_v59  ;;  %v729_v63 = vmul.f32 0.1, %v611_v60  ;;  %v603_v0 = vadd.f32 %v5025_v51, %v602_v61  ;;  %796 = vadd.xlane.f32.xlu1 %v5029_v58  ;;  %v858_v5 = vmul.f32 %v5029_v58, %v5029_v58  ;;  %v4548_v59 = vld [vmem:[%s6978_s5 + $0x10] sm:$0xff]  }
  0xe7   : > { %v4216_v1 = vpop.f32.mrf.mxu0  ;;  %4252 = vmatprep.subr.bf16.mxu1 %v4548_v59 }
  0xe8   : > { %v5036_v2 = vmax.f32 %v611_v60, %v729_v63  ;;  %v727_v3 = vmul.f32 0.1, %v603_v0  ;;  %792 = vadd.xlane.f32.xlu0 %v5032_v62  ;;  %v624_v11 = vadd.f32 %v4216_v1, %v5025_v51  ;;  %v856_v12 = vmul.f32 %v5032_v62, %v5032_v62  ;;  %4253 = vmatpush3.bf16.msra.mxu1 %v4548_v59 }
  0xe9   : > { %v615_v4 = vpop.f32.mrf.mxu0 }
  0xea   : > { %798 = vadd.xlane.f32.xlu1 %v5036_v2  ;;  %v5042_v7 = vmax.f32 %v603_v0, %v727_v3  ;;  %v859_v9 = vmul.f32 %v5036_v2, %v5036_v2  ;;  %v732_v17 = vmul.f32 0.1, %v624_v11  ;;  %v616_v18 = vadd.f32 %v5025_v51, %v615_v4 }
  0xeb   : > { %v4217_v6 = vpop.f32.mrf.mxu0 }
  0xec   : > { %v627_v8 = vadd.f32 %v4217_v6, %v5025_v51  ;;  %892 = vadd.xlane.f32.xlu0 %v858_v5  ;;  %v857_v15 = vmul.f32 %v5042_v7, %v5042_v7  ;;  %v5057_v22 = vmax.f32 %v624_v11, %v732_v17  ;;  %v730_v23 = vmul.f32 0.1, %v616_v18 }
  0xed   : > { %v618_v10 = vpop.f32.mrf.mxu0 }
  0xee   : > { %894 = vadd.xlane.f32.xlu1 %v859_v9  ;;  %v733_v13 = vmul.f32 0.1, %v627_v8  ;;  %v619_v14 = vadd.f32 %v5025_v51, %v618_v10  ;;  %v5063_v26 = vmax.f32 %v616_v18, %v730_v23  ;;  %v862_v32 = vmul.f32 %v5057_v22, %v5057_v22 }
  0xef   : > { %v4220_v16 = vpop.f32.mrf.mxu0 }
  0xf0   : > { %888 = vadd.xlane.f32.xlu0 %v856_v12  ;;  %v5054_v19 = vmax.f32 %v627_v8, %v733_v13  ;;  %v731_v20 = vmul.f32 0.1, %v619_v14  ;;  %v640_v31 = vadd.f32 %v4220_v16, %v5025_v51  ;;  %v860_v40 = vmul.f32 %v5063_v26, %v5063_v26  ;;  %v4549_v8 = vld [vmem:[%s6978_s5 + $0x8] sm:$0xff]   ;;  %v4550_v13 = vld [vmem:[%s6978_s5] sm:$0xff]  }
  0xf1   : > { %v631_v21 = vpop.f32.mrf.mxu0  ;;  %4254 = vmatprep.subr.bf16.mxu1 %v4549_v8 }
  0xf2   : > { %890 = vadd.xlane.f32.xlu1 %v857_v15  ;;  %v5060_v24 = vmax.f32 %v619_v14, %v731_v20  ;;  %v863_v29 = vmul.f32 %v5054_v19, %v5054_v19  ;;  %v736_v38 = vmul.f32 0.1, %v640_v31  ;;  %v632_v39 = vadd.f32 %v5025_v51, %v631_v21  ;;  %4255 = vmatpush3.bf16.msra.mxu1 %v4549_v8 }
  0xf3   : > { %v4221_v25 = vpop.f32.mrf.mxu0  ;;  %4256 = vmatprep.subr.bf16.mxu1 %v4550_v13 }
  0xf4   : > { %794 = vadd.xlane.f32.xlu0 %v5042_v7  ;;  %v643_v28 = vadd.f32 %v4221_v25, %v5025_v51  ;;  %v861_v36 = vmul.f32 %v5060_v24, %v5060_v24  ;;  %v5090_v45 = vmax.f32 %v640_v31, %v736_v38  ;;  %v734_v46 = vmul.f32 0.1, %v632_v39 }
  0xf5   : > { %v634_v30 = vpop.f32.mrf.mxu0 }
  0xf6   : > { %806 = vadd.xlane.f32.xlu1 %v5054_v19  ;;  %v737_v34 = vmul.f32 0.1, %v643_v28  ;;  %v635_v35 = vadd.f32 %v5025_v51, %v634_v30  ;;  %v5099_v50 = vmax.f32 %v632_v39, %v734_v46  ;;  %v866_v57 = vmul.f32 %v5090_v45, %v5090_v45  ;;  %4257 = vmatpush3.bf16.msra.mxu1 %v4550_v13 }
  0xf7   : > { %v4224_v37 = vpop.f32.mrf.mxu0 }
  0xf8   : > { %804 = vadd.xlane.f32.xlu0 %v5057_v22  ;;  %v5088_v42 = vmax.f32 %v643_v28, %v737_v34  ;;  %v735_v43 = vmul.f32 0.1, %v635_v35  ;;  %v656_v56 = vadd.f32 %v4224_v37, %v5025_v51  ;;  %v864_v4 = vmul.f32 %v5099_v50, %v5099_v50 }
  0xf9   : > { %v647_v44 = vpop.f32.mrf.mxu0 }
  0xfa   : > { %802 = vadd.xlane.f32.xlu1 %v5060_v24  ;;  %v5096_v48 = vmax.f32 %v635_v35, %v735_v43  ;;  %v867_v54 = vmul.f32 %v5088_v42, %v5088_v42  ;;  %v740_v1 = vmul.f32 0.1, %v656_v56  ;;  %v648_v3 = vadd.f32 %v5025_v51, %v647_v44 }
  0xfb   : > { %v4225_v49 = vpop.f32.mrf.mxu0 }
  0xfc   : > { %800 = vadd.xlane.f32.xlu0 %v5063_v26  ;;  %v659_v53 = vadd.f32 %v4225_v49, %v5025_v51  ;;  %v865_v63 = vmul.f32 %v5096_v48, %v5096_v48  ;;  %v5126_v10 = vmax.f32 %v656_v56, %v740_v1  ;;  %v738_v11 = vmul.f32 0.1, %v648_v3 }
  0xfd   : > { %v650_v55 = vpop.f32.mrf.mxu0 }
  0xfe   : > { %902 = vadd.xlane.f32.xlu1 %v863_v29  ;;  %v741_v60 = vmul.f32 0.1, %v659_v53  ;;  %v651_v61 = vadd.f32 %v5025_v51, %v650_v55  ;;  %v5135_v15 = vmax.f32 %v648_v3, %v738_v11  ;;  %v870_v21 = vmul.f32 %v5126_v10, %v5126_v10 }
  0xff   : > { %v4228_v0 = vpop.f32.mrf.mxu0 }
 0x100   : > { %900 = vadd.xlane.f32.xlu0 %v862_v32  ;;  %v5121_v5 = vmax.f32 %v659_v53, %v741_v60  ;;  %v739_v6 = vmul.f32 0.1, %v651_v61  ;;  %v672_v20 = vadd.f32 %v4228_v0, %v5025_v51  ;;  %v868_v31 = vmul.f32 %v5135_v15, %v5135_v15 }
 0x101   : > { %v663_v9 = vpop.f32.mrf.mxu0 }
 0x102   : > { %898 = vadd.xlane.f32.xlu1 %v861_v36  ;;  %v5129_v12 = vmax.f32 %v651_v61, %v739_v6  ;;  %v871_v17 = vmul.f32 %v5121_v5, %v5121_v5  ;;  %v744_v29 = vmul.f32 0.1, %v672_v20  ;;  %v664_v30 = vadd.f32 %v5025_v51, %v663_v9 }
 0x103   : > { %v4229_v14 = vpop.f32.mrf.mxu0 }
 0x104   : > { %896 = vadd.xlane.f32.xlu0 %v860_v40  ;;  %v675_v16 = vadd.f32 %v4229_v14, %v5025_v51  ;;  %v869_v27 = vmul.f32 %v5129_v12, %v5129_v12  ;;  %v5153_v35 = vmax.f32 %v672_v20, %v744_v29  ;;  %v742_v36 = vmul.f32 0.1, %v664_v30 }
 0x105   : > { %v666_v18 = vpop.f32.mrf.mxu0 }
 0x106   : > { %814 = vadd.xlane.f32.xlu1 %v5088_v42  ;;  %v745_v23 = vmul.f32 0.1, %v675_v16  ;;  %v667_v25 = vadd.f32 %v5025_v51, %v666_v18  ;;  %v5159_v39 = vmax.f32 %v664_v30, %v742_v36  ;;  %v874_v46 = vmul.f32 %v5153_v35, %v5153_v35 }
 0x107   : > { %v4232_v28 = vpop.f32.mrf.mxu0 }
 0x108   : > { %812 = vadd.xlane.f32.xlu0 %v5090_v45  ;;  %v5151_v32 = vmax.f32 %v675_v16, %v745_v23  ;;  %v743_v33 = vmul.f32 0.1, %v667_v25  ;;  %v688_v44 = vadd.f32 %v4232_v28, %v5025_v51  ;;  %v872_v56 = vmul.f32 %v5159_v39, %v5159_v39 }
 0x109   : > { %v679_v34 = vpop.f32.mrf.mxu0 }
 0x10a   : > { %810 = vadd.xlane.f32.xlu1 %v5096_v48  ;;  %v5156_v37 = vmax.f32 %v667_v25, %v743_v33  ;;  %v875_v41 = vmul.f32 %v5151_v32, %v5151_v32  ;;  %v680_v55 = vadd.f32 %v5025_v51, %v679_v34 }
 0x10b   : > { %v4233_v38 = vpop.f32.mrf.mxu0 }
 0x10c   : > { %808 = vadd.xlane.f32.xlu0 %v5099_v50  ;;  %v691_v40 = vadd.f32 %v4233_v38, %v5025_v51  ;;  %v873_v52 = vmul.f32 %v5156_v37, %v5156_v37 }
 0x10d   : > { %v682_v43 = vpop.f32.mrf.mxu0 }
 0x10e   : > { %910 = vadd.xlane.f32.xlu1 %v867_v54  ;;  %v749_v47 = vmul.f32 0.1, %v691_v40  ;;  %v683_v49 = vadd.f32 %v5025_v51, %v682_v43  ;;  %v748_v54 = vmul.f32 0.1, %v688_v44 }
 0x10f   : > { %v4236_v53 = vpop.f32.mrf.mxu0 }
 0x110   : > { %908 = vadd.xlane.f32.xlu0 %v866_v57  ;;  %v5175_v57 = vmax.f32 %v691_v40, %v749_v47  ;;  %v747_v59 = vmul.f32 0.1, %v683_v49  ;;  %v5177_v61 = vmax.f32 %v688_v44, %v748_v54  ;;  %v704_v9 = vadd.f32 %v4236_v53, %v5025_v51 }
 0x111   : > { %v695_v60 = vpop.f32.mrf.mxu0 }
 0x112   : > { %906 = vadd.xlane.f32.xlu1 %v865_v63  ;;  %v746_v63 = vmul.f32 0.1, %v680_v55  ;;  %v5180_v0 = vmax.f32 %v683_v49, %v747_v59  ;;  %v879_v6 = vmul.f32 %v5175_v57, %v5175_v57  ;;  %v878_v11 = vmul.f32 %v5177_v61, %v5177_v61 }
 0x113   : > { %v4237_v1 = vpop.f32.mrf.mxu0  ;;  %v752_v18 = vmul.f32 0.1, %v704_v9  ;;  %v696_v20 = vadd.f32 %v5025_v51, %v695_v60 }
 0x114   : > { %904 = vadd.xlane.f32.xlu0 %v864_v4  ;;  %v5183_v3 = vmax.f32 %v680_v55, %v746_v63  ;;  %v707_v4 = vadd.f32 %v4237_v1, %v5025_v51  ;;  %v877_v16 = vmul.f32 %v5180_v0, %v5180_v0 }
 0x115   : > { %v698_v8 = vpop.f32.mrf.mxu0  ;;  %v5201_v28 = vmax.f32 %v704_v9, %v752_v18  ;;  %v750_v29 = vmul.f32 0.1, %v696_v20 }
 0x116   : > { %822 = vadd.xlane.f32.xlu1 %v5121_v5  ;;  %v753_v13 = vmul.f32 0.1, %v707_v4  ;;  %v699_v14 = vadd.f32 %v5025_v51, %v698_v8 }
 0x117   : > { %v5207_v33 = vmax.f32 %v696_v20, %v750_v29  ;;  %v882_v43 = vmul.f32 %v5201_v28, %v5201_v28 }
 0x118   : > { %820 = vadd.xlane.f32.xlu0 %v5126_v10  ;;  %v5199_v23 = vmax.f32 %v707_v4, %v753_v13  ;;  %v751_v25 = vmul.f32 0.1, %v699_v14 }
 0x119   : > { %v880_v53 = vmul.f32 %v5207_v33, %v5207_v33 }
 0x11a   : > { %818 = vadd.xlane.f32.xlu1 %v5129_v12  ;;  %v5204_v30 = vmax.f32 %v699_v14, %v751_v25  ;;  %v883_v36 = vmul.f32 %v5199_v23, %v5199_v23 }
 0x11c   : > { %816 = vadd.xlane.f32.xlu0 %v5135_v15 }
 0x11e   : > { %918 = vadd.xlane.f32.xlu1 %v871_v17  ;;  %v4240_v17 = vpop.f32.mrf.mxu0 }
 0x11f   : > { %v720_v40 = vadd.f32 %v4240_v17, %v5025_v51 }
 0x120   : > { %916 = vadd.xlane.f32.xlu0 %v870_v21  ;;  %v876_v21 = vmul.f32 %v5183_v3, %v5183_v3 }
 0x121   : > { %v756_v47 = vmul.f32 0.1, %v720_v40 }
 0x122   : > { %914 = vadd.xlane.f32.xlu1 %v869_v27  ;;  %v711_v27 = vpop.f32.mrf.mxu0 }
 0x123   : > { %v712_v49 = vadd.f32 %v5025_v51, %v711_v27  ;;  %v5225_v55 = vmax.f32 %v720_v40, %v756_v47 }
 0x124   : > { %912 = vadd.xlane.f32.xlu0 %v868_v31  ;;  %v4241_v31 = vpop.f32.mrf.mxu0 }
 0x125   : > { %v723_v34 = vadd.f32 %v4241_v31, %v5025_v51  ;;  %v886_v4 = vmul.f32 %v5225_v55, %v5225_v55 }
 0x126   : > { %830 = vadd.xlane.f32.xlu1 %v5151_v32  ;;  %v714_v38 = vpop.f32.mrf.mxu0 }
 0x127   : > { %v715_v44 = vadd.f32 %v5025_v51, %v714_v38 }
 0x128   : > { %828 = vadd.xlane.f32.xlu0 %v5153_v35 }
 0x129   : > { %v755_v54 = vmul.f32 0.1, %v715_v44 }
 0x12a   : > { %826 = vadd.xlane.f32.xlu1 %v5156_v37 }
 0x12b   : > { %v5228_v59 = vmax.f32 %v715_v44, %v755_v54 }
 0x12c   : > { %824 = vadd.xlane.f32.xlu0 %v5159_v39 }
 0x12d   : > { %v885_v51 = vmul.f32 %v5228_v59, %v5228_v59 }
 0x12e   : > { %926 = vadd.xlane.f32.xlu1 %v875_v41  ;;  %v757_v41 = vmul.f32 0.1, %v723_v34 }
 0x130   : > { %924 = vadd.xlane.f32.xlu0 %v874_v46  ;;  %v881_v46 = vmul.f32 %v5204_v30, %v5204_v30 }
 0x132   : > { %922 = vadd.xlane.f32.xlu1 %v873_v52  ;;  %v5221_v52 = vmax.f32 %v723_v34, %v757_v41 }
 0x134   : > { %920 = vadd.xlane.f32.xlu0 %v872_v56  ;;  %v754_v56 = vmul.f32 0.1, %v712_v49  ;;  %v887_v1 = vmul.f32 %v5221_v52, %v5221_v52 }
 0x136   : > { %838 = vadd.xlane.f32.xlu1 %v5175_v57  ;;  %v5231_v60 = vmax.f32 %v712_v49, %v754_v56 }
 0x138   : > { %836 = vadd.xlane.f32.xlu0 %v5177_v61  ;;  %v884_v63 = vmul.f32 %v5231_v60, %v5231_v60 }
 0x13a   : > { %834 = vadd.xlane.f32.xlu1 %v5180_v0 }
 0x13c   : > { %832 = vadd.xlane.f32.xlu0 %v5183_v3 }
 0x13e   : > { %934 = vadd.xlane.f32.xlu1 %v879_v6 }
 0x140   : > { %932 = vadd.xlane.f32.xlu0 %v878_v11 }
 0x142   : > { %930 = vadd.xlane.f32.xlu1 %v877_v16 }
 0x144   : > { %928 = vadd.xlane.f32.xlu0 %v876_v21 }
 0x146   : > { %846 = vadd.xlane.f32.xlu1 %v5199_v23 }
 0x148   : > { %844 = vadd.xlane.f32.xlu0 %v5201_v28 }
 0x14a   : > { %842 = vadd.xlane.f32.xlu1 %v5204_v30 }
 0x14c   : > { %840 = vadd.xlane.f32.xlu0 %v5207_v33 }
 0x14e   : > { %942 = vadd.xlane.f32.xlu1 %v883_v36 }
 0x150   : > { %940 = vadd.xlane.f32.xlu0 %v882_v43 }
 0x152   : > { %938 = vadd.xlane.f32.xlu1 %v881_v46 }
 0x154   : > { %936 = vadd.xlane.f32.xlu0 %v880_v53 }
 0x156   : > { %854 = vadd.xlane.f32.xlu1 %v5221_v52 }
 0x158   : > { %852 = vadd.xlane.f32.xlu0 %v5225_v55 }
 0x15a   : > { %850 = vadd.xlane.f32.xlu1 %v5228_v59 }
 0x15c   : > { %848 = vadd.xlane.f32.xlu0 %v5231_v60 }
 0x15e   : > { %946 = vadd.xlane.f32.xlu1 %v885_v51 }
 0x160   : > { %944 = vadd.xlane.f32.xlu0 %v884_v63 }
 0x162   : > { %950 = vadd.xlane.f32.xlu1 %v887_v1 }
 0x164   : > { %948 = vadd.xlane.f32.xlu0 %v886_v4 }
 0x16f   : > { %v797_v6 = vpop.xlane.xlu1 %796 }
 0x170   : > { %v5243_v9 = vmul.f32 0.0078125, %v797_v6 }
 0x171   : > { %v793_v8 = vpop.xlane.xlu0 %792 }
 0x172   : > { %v5247_v16 = vmul.f32 0.0078125, %v793_v8  ;;  %v1018_v18 = vmul.f32 %v5243_v9, %v5243_v9 }
 0x173   : > { %v799_v11 = vpop.xlane.xlu1 %798 }
 0x174   : > { %v5245_v13 = vmul.f32 0.0078125, %v799_v11  ;;  %v1016_v31 = vmul.f32 %v5247_v16, %v5247_v16 }
 0x175   : > { %v893_v14 = vpop.xlane.xlu0 %892 }
 0x176   : > { %v986_v17 = vmul.f32 0.0078125, %v893_v14  ;;  %v1019_v21 = vmul.f32 %v5245_v13, %v5245_v13 }
 0x177   : > { %v895_v20 = vpop.xlane.xlu1 %894 }
 0x178   : > { %v987_v25 = vmul.f32 0.0078125, %v895_v20  ;;  %v1050_v27 = vsub.f32 %v986_v17, %v1018_v18 }
 0x179   : > { %v889_v29 = vpop.xlane.xlu0 %888 }
 0x17a   : > { %v1051_v34 = vsub.f32 %v987_v25, %v1019_v21  ;;  %v984_v36 = vmul.f32 0.0078125, %v889_v29  ;;  %v1114_v43 = vadd.f32 1e-05, %v1050_v27 }
 0x17b   : > { %v891_v38 = vpop.xlane.xlu1 %890 }
 0x17c   : > { %v1115_v40 = vadd.f32 1e-05, %v1051_v34  ;;  %v1048_v41 = vsub.f32 %v984_v36, %v1016_v31  ;;  %v985_v53 = vmul.f32 0.0078125, %v891_v38  ;;  %v4551_v31 = vld [vmem:[%s6980_s7 + $0x38] sm:$0xff]   ;;  %v4552_v34 = vld [vmem:[%s6980_s7 + $0x30] sm:$0xff]  }
 0x17d   : > { %v795_v44 = vpop.xlane.xlu0 %794  ;;  %4290 = vmatprep.subr.bf16.mxu0 %v4551_v31 }
 0x17e   : > { %v1112_v46 = vadd.f32 1e-05, %v1048_v41  ;;  %v5255_v47 = vmul.f32 0.0078125, %v795_v44  ;;  %4583 = vrsqrt.f32 %v1115_v40  ;;  %4291 = vmatpush3.bf16.msra.mxu0 %v4551_v31  ;;  %v5295_v31 = vld [vmem:[%s6976_s3] ss:$0 sm:$0xff] }
 0x17f   : > { %v807_v49 = vpop.xlane.xlu1 %806  ;;  %4292 = vmatprep.subr.bf16.mxu0 %v4552_v34 }
 0x180   : > { %4585 = vrsqrt.f32 %v1112_v46  ;;  %v1017_v54 = vmul.f32 %v5255_v47, %v5255_v47  ;;  %v5259_v4 = vmul.f32 0.0078125, %v807_v49  ;;  %v1080_v49 = vsub.f32 %v5032_v62, %v5247_v16 }
 0x181   : > { %4587 = vrsqrt.f32 %v1114_v43  ;;  %v805_v56 = vpop.xlane.xlu0 %804  ;;  %v1082_v62 = vsub.f32 %v5029_v58, %v5243_v9  ;;  %v4554_v58 = vld [vmem:[%s6980_s7 + $0x20] sm:$0xff]  }
 0x182   : > { %v1049_v51 = vsub.f32 %v985_v53, %v1017_v54  ;;  %v5261_v8 = vmul.f32 0.0078125, %v805_v56  ;;  %v1023_v14 = vmul.f32 %v5259_v4, %v5259_v4  ;;  %v1083_v53 = vsub.f32 %v5036_v2, %v5245_v13  ;;  %4293 = vmatpush3.bf16.msra.mxu0 %v4552_v34 }
 0x183   : > { %v803_v63 = vpop.xlane.xlu1 %802 }
 0x184   : > { %v1113_v1 = vadd.f32 1e-05, %v1049_v51  ;;  %v5265_v17 = vmul.f32 0.0078125, %v803_v63  ;;  %v1022_v21 = vmul.f32 %v5261_v8, %v5261_v8 }
 0x185   : > { %v801_v6 = vpop.xlane.xlu0 %800 }
 0x186   : > { %4589 = vrsqrt.f32 %v1113_v1  ;;  %v5269_v25 = vmul.f32 0.0078125, %v801_v6  ;;  %v1021_v40 = vmul.f32 %v5265_v17, %v5265_v17 }
 0x187   : > { %v903_v11 = vpop.xlane.xlu1 %902 }
 0x188   : > { %v991_v18 = vmul.f32 0.0078125, %v903_v11  ;;  %v1020_v51 = vmul.f32 %v5269_v25, %v5269_v25  ;;  %v4553_v11 = vld [vmem:[%s6980_s7 + $0x28] sm:$0xff]  }
 0x189   : > { %v901_v20 = vpop.xlane.xlu0 %900  ;;  %4294 = vmatprep.subr.bf16.mxu0 %v4553_v11 }
 0x18a   : > { %v1055_v27 = vsub.f32 %v991_v18, %v1023_v14  ;;  %v990_v29 = vmul.f32 0.0078125, %v901_v20  ;;  %4295 = vmatpush3.bf16.msra.mxu0 %v4553_v11 }
 0x18b   : > { %v899_v36 = vpop.xlane.xlu1 %898  ;;  %v4584_v38 = vpop.eup %4583  ;;  %4296 = vmatprep.subr.bf16.mxu0 %v4554_v58 }
 0x18c   : > { %v1119_v41 = vadd.f32 1e-05, %v1055_v27  ;;  %v1054_v43 = vsub.f32 %v990_v29, %v1022_v21  ;;  %v989_v44 = vmul.f32 0.0078125, %v899_v36  ;;  %v1179_v2 = vmul.f32 %v4584_v38, %v1083_v53 }
 0x18d   : > { %v4586_v46 = vpop.eup %4585  ;;  %v897_v54 = vpop.xlane.xlu0 %896  ;;  %v1081_v27 = vsub.f32 %v5042_v7, %v5255_v47 }
 0x18e   : > { %v4588_v56 = vpop.eup %4587  ;;  %v1118_v63 = vadd.f32 1e-05, %v1054_v43  ;;  %v1053_v1 = vsub.f32 %v989_v44, %v1021_v40  ;;  %v988_v6 = vmul.f32 0.0078125, %v897_v54  ;;  %4591 = vrsqrt.f32 %v1119_v41  ;;  %v5310_v44 = vld [vmem:[%s6977_s4] ss:$0 sm:$0xff]  ;;  %4297 = vmatpush3.bf16.msra.mxu0 %v4554_v58 }
 0x18f   : > { %v815_v16 = vpop.xlane.xlu1 %814  ;;  %v1176_v18 = vmul.f32 %v4586_v46, %v1080_v49  ;;  %v1178_v21 = vmul.f32 %v4588_v56, %v1082_v62  ;;  %v1217_v34 = vmul.f32 %v5295_v31, %v1179_v2  ;;  %v4555_v49 = vld [vmem:[%s6980_s7 + $0x18] sm:$0xff]  }
 0x190   : > { %4593 = vrsqrt.f32 %v1118_v63  ;;  %v1117_v13 = vadd.f32 1e-05, %v1053_v1  ;;  %v1052_v14 = vsub.f32 %v988_v6, %v1020_v51  ;;  %v5300_v36 = vmul.f32 0.0078125, %v815_v16  ;;  %4298 = vmatprep.subr.bf16.mxu0 %v4555_v49 }
 0x191   : > { %v813_v20 = vpop.xlane.xlu0 %812  ;;  %v1214_v7 = vmul.f32 %v5295_v31, %v1176_v18  ;;  %v1216_v43 = vmul.f32 %v5295_v31, %v1178_v21  ;;  %v5319_v56 = vadd.f32 %v5310_v44, %v1217_v34 }
 0x192   : > { %4595 = vrsqrt.f32 %v1117_v13  ;;  %v1116_v29 = vadd.f32 1e-05, %v1052_v14  ;;  %v5304_v47 = vmul.f32 0.0078125, %v813_v20  ;;  %v1027_v53 = vmul.f32 %v5300_v36, %v5300_v36  ;;  %v4556_v20 = vld [vmem:[%s6980_s7 + $0x10] sm:$0xff]   ;;  %4299 = vmatpush3.bf16.msra.mxu0 %v4555_v49 }
 0x193   : > { %v4590_v9 = vpop.eup %4589  ;;  %v811_v38 = vpop.xlane.xlu1 %810  ;;  %v5324_v1 = vadd.f32 %v5310_v44, %v1214_v7  ;;  %v5332_v16 = vadd.f32 %v5310_v44, %v1216_v43  ;;  %v1087_v7 = vsub.f32 %v5054_v19, %v5259_v4  ;;  %4300 = vmatprep.subr.bf16.mxu0 %v4556_v20  ;;  %v1085_v19 = vsub.f32 %v5060_v24, %v5265_v17 }
 0x194   : > { %v1177_v40 = vmul.f32 %v4590_v9, %v1081_v27  ;;  %4597 = vrsqrt.f32 %v1116_v29  ;;  %v5321_v51 = vmul.f32 0.0078125, %v811_v38  ;;  %v1026_v11 = vmul.f32 %v5304_v47, %v5304_v47 }
 0x195   : > { %v809_v41 = vpop.xlane.xlu0 %808  ;;  %v1285_v27 = vpack.c.bf16 %v5319_v56, %v5332_v16 }
 0x196   : > { %v1215_v46 = vmul.f32 %v5295_v31, %v1177_v40  ;;  %v5334_v2 = vmul.f32 0.0078125, %v809_v41  ;;  %v1025_v58 = vmul.f32 %v5321_v51, %v5321_v51  ;;  %v1086_v41 = vsub.f32 %v5057_v22, %v5261_v8  ;;  %4301 = vmatpush3.bf16.msra.mxu0 %v4556_v20 }
 0x197   : > { %v911_v54 = vpop.xlane.xlu1 %910 }
 0x198   : > { %v995_v63 = vmul.f32 0.0078125, %v911_v54  ;;  %v5327_v6 = vadd.f32 %v5310_v44, %v1215_v46  ;;  %v1024_v46 = vmul.f32 %v5334_v2, %v5334_v2 }
 0x199   : > { %v909_v62 = vpop.xlane.xlu0 %908 }
 0x19a   : > { %v1059_v13 = vsub.f32 %v995_v63, %v1027_v53  ;;  %v994_v14 = vmul.f32 0.0078125, %v909_v62  ;;  %v1284_v18 = vpack.c.bf16 %v5327_v6, %v5324_v1 }
 0x19b   : > { %v907_v21 = vpop.xlane.xlu1 %906  ;;  %v4592_v29 = vpop.eup %4591 }
 0x19c   : > { %v1123_v9 = vadd.f32 1e-05, %v1059_v13  ;;  %v1058_v38 = vsub.f32 %v994_v14, %v1026_v11  ;;  %v993_v34 = vmul.f32 0.0078125, %v907_v21  ;;  %4258 = vmatprep.mubr.bf16.mxu1 %v1284_v18  ;;  %v4557_v11 = vld [vmem:[%s6980_s7 + $0x8] sm:$0xff]   ;;  %v1183_v13 = vmul.f32 %v4592_v29, %v1087_v7 }
 0x19d   : > { %v4594_v40 = vpop.eup %4593  ;;  %4259 = vmatmul.mubr.bf16.vlgmr.msra.gmra.mxu1 %v1285_v27  ;;  %v905_v43 = vpop.xlane.xlu0 %904  ;;  %v1084_v18 = vsub.f32 %v5063_v26, %v5269_v25  ;;  %4302 = vmatprep.subr.bf16.mxu0 %v4557_v11 }
 0x19e   : > { %v1122_v53 = vadd.f32 1e-05, %v1058_v38  ;;  %v1057_v54 = vsub.f32 %v993_v34, %v1025_v58  ;;  %v992_v63 = vmul.f32 0.0078125, %v905_v43  ;;  %4599 = vrsqrt.f32 %v1123_v9  ;;  %4303 = vmatpush3.bf16.msra.mxu0 %v4557_v11 }
 0x19f   : > { %v4596_v62 = vpop.eup %4595  ;;  %v823_v22 = vpop.xlane.xlu1 %822  ;;  %v1182_v4 = vmul.f32 %v4594_v40, %v1086_v41  ;;  %v1221_v29 = vmul.f32 %v5295_v31, %v1183_v13 }
 0x1a0   : > { %4601 = vrsqrt.f32 %v1122_v53  ;;  %v1121_v8 = vadd.f32 1e-05, %v1057_v54  ;;  %v1056_v49 = vsub.f32 %v992_v63, %v1024_v46  ;;  %v1181_v27 = vmul.f32 %v4596_v62, %v1085_v19 }
 0x1a1   : > { %v4598_v14 = vpop.eup %4597  ;;  %v821_v21 = vpop.xlane.xlu0 %820  ;;  %v1220_v38 = vmul.f32 %v5295_v31, %v1182_v4  ;;  %v5360_v34 = vmul.f32 0.0078125, %v823_v22  ;;  %v5380_v63 = vadd.f32 %v5310_v44, %v1221_v29 }
 0x1a2   : > { %4603 = vrsqrt.f32 %v1121_v8  ;;  %v1120_v58 = vadd.f32 1e-05, %v1056_v49  ;;  %v1180_v17 = vmul.f32 %v4598_v14, %v1084_v18  ;;  %v1219_v9 = vmul.f32 %v5295_v31, %v1181_v27 }
 0x1a3   : > { %v819_v24 = vpop.xlane.xlu1 %818  ;;  %v5363_v40 = vmul.f32 0.0078125, %v821_v21  ;;  %v5367_v20 = vadd.f32 %v5310_v44, %v1220_v38  ;;  %v1031_v46 = vmul.f32 %v5360_v34, %v5360_v34 }
 0x1a4   : > { %4605 = vrsqrt.f32 %v1120_v58  ;;  %v1218_v25 = vmul.f32 %v5295_v31, %v1180_v17  ;;  %v5373_v43 = vadd.f32 %v5310_v44, %v1219_v9  ;;  %v5377_v53 = vmul.f32 0.0078125, %v819_v24 }
 0x1a5   : > { %v817_v26 = vpop.xlane.xlu0 %816  ;;  %v1030_v11 = vmul.f32 %v5363_v40, %v5363_v40  ;;  %v1287_v49 = vpack.c.bf16 %v5380_v63, %v5367_v20  ;;  %v1091_v24 = vsub.f32 %v5088_v42, %v5300_v36  ;;  %v1090_v17 = vsub.f32 %v5090_v45, %v5304_v47 }
 0x1a6   : > { %v5370_v41 = vadd.f32 %v5310_v44, %v1218_v25  ;;  %v5386_v22 = vmul.f32 0.0078125, %v817_v26  ;;  %v1029_v18 = vmul.f32 %v5377_v53, %v5377_v53  ;;  %v1088_v45 = vsub.f32 %v5099_v50, %v5334_v2 }
 0x1a7   : > { %v919_v7 = vpop.xlane.xlu1 %918 }
 0x1a8   : > { %v999_v54 = vmul.f32 0.0078125, %v919_v7  ;;  %v1286_v19 = vpack.c.bf16 %v5373_v43, %v5370_v41  ;;  %v1028_v29 = vmul.f32 %v5386_v22, %v5386_v22 }
 0x1a9   : > { %v917_v62 = vpop.xlane.xlu0 %916 }
 0x1aa   : > { %v1063_v4 = vsub.f32 %v999_v54, %v1031_v46  ;;  %v998_v8 = vmul.f32 0.0078125, %v917_v62  ;;  %4262 = vmatprep.mubr.bf16.mxu1 %v1286_v19  ;;  %v1089_v54 = vsub.f32 %v5096_v48, %v5321_v51 }
 0x1ab   : > { %v915_v13 = vpop.xlane.xlu1 %914  ;;  %v4600_v14 = vpop.eup %4599  ;;  %4263 = vmatmul.mubr.bf16.gmra.mxu1 %v1287_v49 }
 0x1ac   : > { %v1127_v21 = vadd.f32 1e-05, %v1063_v4  ;;  %v1062_v27 = vsub.f32 %v998_v8, %v1030_v11  ;;  %v997_v58 = vmul.f32 0.0078125, %v915_v13  ;;  %v1187_v36 = vmul.f32 %v4600_v14, %v1091_v24 }
 0x1ad   : > { %v4602_v38 = vpop.eup %4601  ;;  %v913_v9 = vpop.xlane.xlu0 %912 }
 0x1ae   : > { %v1126_v26 = vadd.f32 1e-05, %v1062_v27  ;;  %v1061_v25 = vsub.f32 %v997_v58, %v1029_v18  ;;  %v996_v7 = vmul.f32 0.0078125, %v913_v9  ;;  %4607 = vrsqrt.f32 %v1127_v21 }
 0x1af   : > { %v4604_v46 = vpop.eup %4603  ;;  %v831_v11 = vpop.xlane.xlu1 %830  ;;  %v1186_v62 = vmul.f32 %v4602_v38, %v1090_v17  ;;  %v1225_v21 = vmul.f32 %v5295_v31, %v1187_v36 }
 0x1b0   : > { %4609 = vrsqrt.f32 %v1126_v26  ;;  %v1125_v19 = vadd.f32 1e-05, %v1061_v25  ;;  %v1060_v42 = vsub.f32 %v996_v7, %v1028_v29  ;;  %v1185_v8 = vmul.f32 %v4604_v46, %v1089_v54 }
 0x1b1   : > { %v4606_v4 = vpop.eup %4605  ;;  %v829_v47 = vpop.xlane.xlu0 %828  ;;  %v1224_v13 = vmul.f32 %v5295_v31, %v1186_v62  ;;  %v5404_v51 = vmul.f32 0.0078125, %v831_v11  ;;  %v5424_v25 = vadd.f32 %v5310_v44, %v1225_v21 }
 0x1b2   : > { %4611 = vrsqrt.f32 %v1125_v19  ;;  %v1124_v49 = vadd.f32 1e-05, %v1060_v42  ;;  %v1184_v27 = vmul.f32 %v4606_v4, %v1088_v45  ;;  %v1223_v48 = vmul.f32 %v5295_v31, %v1185_v8 }
 0x1b3   : > { %v827_v18 = vpop.xlane.xlu1 %826  ;;  %v5407_v14 = vmul.f32 0.0078125, %v829_v47  ;;  %v5411_v2 = vadd.f32 %v5310_v44, %v1224_v13  ;;  %v1035_v9 = vmul.f32 %v5404_v51, %v5404_v51 }
 0x1b4   : > { %4613 = vrsqrt.f32 %v1124_v49  ;;  %v1222_v50 = vmul.f32 %v5295_v31, %v1184_v27  ;;  %v5417_v17 = vadd.f32 %v5310_v44, %v1223_v48  ;;  %v5421_v29 = vmul.f32 0.0078125, %v827_v18 }
 0x1b5   : > { %v825_v58 = vpop.xlane.xlu0 %824  ;;  %v1034_v7 = vmul.f32 %v5407_v14, %v5407_v14  ;;  %v1289_v42 = vpack.c.bf16 %v5424_v25, %v5411_v2  ;;  %v1095_v18 = vsub.f32 %v5121_v5, %v5360_v34  ;;  %v1094_v27 = vsub.f32 %v5126_v10, %v5363_v40 }
 0x1b6   : > { %v5414_v24 = vadd.f32 %v5310_v44, %v1222_v50  ;;  %v5430_v11 = vmul.f32 0.0078125, %v825_v58  ;;  %v1033_v45 = vmul.f32 %v5421_v29, %v5421_v29  ;;  %v1092_v10 = vsub.f32 %v5135_v15, %v5386_v22 }
 0x1b7   : > { %v927_v38 = vpop.xlane.xlu1 %926 }
 0x1b8   : > { %v1003_v26 = vmul.f32 0.0078125, %v927_v38  ;;  %v1288_v54 = vpack.c.bf16 %v5417_v17, %v5414_v24  ;;  %v1032_v21 = vmul.f32 %v5430_v11, %v5430_v11 }
 0x1b9   : > { %v925_v46 = vpop.xlane.xlu0 %924 }
 0x1ba   : > { %v1067_v62 = vsub.f32 %v1003_v26, %v1035_v9  ;;  %v1002_v19 = vmul.f32 0.0078125, %v925_v46  ;;  %4266 = vmatprep.mubr.bf16.mxu1 %v1288_v54  ;;  %v1093_v26 = vsub.f32 %v5129_v12, %v5377_v53 }
 0x1bb   : > { %v923_v36 = vpop.xlane.xlu1 %922  ;;  %v4608_v4 = vpop.eup %4607  ;;  %4267 = vmatmul.mubr.bf16.gmra.mxu1 %v1289_v42 }
 0x1bc   : > { %v1131_v47 = vadd.f32 1e-05, %v1067_v62  ;;  %v1066_v8 = vsub.f32 %v1002_v19, %v1034_v7  ;;  %v1001_v49 = vmul.f32 0.0078125, %v923_v36  ;;  %v1191_v34 = vmul.f32 %v4608_v4, %v1095_v18 }
 0x1bd   : > { %v4610_v13 = vpop.eup %4609  ;;  %v921_v48 = vpop.xlane.xlu0 %920 }
 0x1be   : > { %v1130_v58 = vadd.f32 1e-05, %v1066_v8  ;;  %v1065_v50 = vsub.f32 %v1001_v49, %v1033_v45  ;;  %v1000_v38 = vmul.f32 0.0078125, %v921_v48  ;;  %4615 = vrsqrt.f32 %v1131_v47 }
 0x1bf   : > { %v4612_v9 = vpop.eup %4611  ;;  %v839_v7 = vpop.xlane.xlu1 %838  ;;  %v1190_v46 = vmul.f32 %v4610_v13, %v1094_v27  ;;  %v1229_v47 = vmul.f32 %v5295_v31, %v1191_v34 }
 0x1c0   : > { %4617 = vrsqrt.f32 %v1130_v58  ;;  %v1129_v54 = vadd.f32 1e-05, %v1065_v50  ;;  %v1064_v5 = vsub.f32 %v1000_v38, %v1032_v21  ;;  %v1189_v19 = vmul.f32 %v4612_v9, %v1093_v26 }
 0x1c1   : > { %v4614_v62 = vpop.eup %4613  ;;  %v837_v40 = vpop.xlane.xlu0 %836  ;;  %v1228_v36 = vmul.f32 %v5295_v31, %v1190_v46  ;;  %v5448_v53 = vmul.f32 0.0078125, %v839_v7  ;;  %v5468_v50 = vadd.f32 %v5310_v44, %v1229_v47 }
 0x1c2   : > { %4619 = vrsqrt.f32 %v1129_v54  ;;  %v1128_v42 = vadd.f32 1e-05, %v1064_v5  ;;  %v1188_v8 = vmul.f32 %v4614_v62, %v1092_v10  ;;  %v1227_v12 = vmul.f32 %v5295_v31, %v1189_v19 }
 0x1c3   : > { %v835_v45 = vpop.xlane.xlu1 %834  ;;  %v5451_v4 = vmul.f32 0.0078125, %v837_v40  ;;  %v5455_v22 = vadd.f32 %v5310_v44, %v1228_v36  ;;  %v1039_v48 = vmul.f32 %v5448_v53, %v5448_v53 }
 0x1c4   : > { %4621 = vrsqrt.f32 %v1128_v42  ;;  %v1226_v15 = vmul.f32 %v5295_v31, %v1188_v8  ;;  %v5461_v27 = vadd.f32 %v5310_v44, %v1227_v12  ;;  %v5465_v21 = vmul.f32 0.0078125, %v835_v45 }
 0x1c5   : > { %v833_v49 = vpop.xlane.xlu0 %832  ;;  %v1038_v38 = vmul.f32 %v5451_v4, %v5451_v4  ;;  %v1291_v5 = vpack.c.bf16 %v5468_v50, %v5455_v22  ;;  %v1099_v45 = vsub.f32 %v5151_v32, %v5404_v51  ;;  %v1098_v8 = vsub.f32 %v5153_v35, %v5407_v14 }
 0x1c6   : > { %v5458_v18 = vadd.f32 %v5310_v44, %v1226_v15  ;;  %v5474_v7 = vmul.f32 0.0078125, %v833_v49  ;;  %v1037_v10 = vmul.f32 %v5465_v21, %v5465_v21  ;;  %v1096_v35 = vsub.f32 %v5159_v39, %v5430_v11 }
 0x1c7   : > { %v935_v13 = vpop.xlane.xlu1 %934 }
 0x1c8   : > { %v1007_v58 = vmul.f32 0.0078125, %v935_v13  ;;  %v1290_v26 = vpack.c.bf16 %v5461_v27, %v5458_v18  ;;  %v1036_v47 = vmul.f32 %v5474_v7, %v5474_v7 }
 0x1c9   : > { %v933_v9 = vpop.xlane.xlu0 %932 }
 0x1ca   : > { %v1071_v46 = vsub.f32 %v1007_v58, %v1039_v48  ;;  %v1006_v54 = vmul.f32 0.0078125, %v933_v9  ;;  %4270 = vmatprep.mubr.bf16.mxu1 %v1290_v26  ;;  %v1097_v58 = vsub.f32 %v5156_v37, %v5421_v29 }
 0x1cb   : > { %v931_v34 = vpop.xlane.xlu1 %930  ;;  %v4616_v62 = vpop.eup %4615  ;;  %4271 = vmatmul.mubr.bf16.gmra.mxu1 %v1291_v5 }
 0x1cc   : > { %v1135_v40 = vadd.f32 1e-05, %v1071_v46  ;;  %v1070_v19 = vsub.f32 %v1006_v54, %v1038_v38  ;;  %v1005_v42 = vmul.f32 0.0078125, %v931_v34  ;;  %v1195_v51 = vmul.f32 %v4616_v62, %v1099_v45 }
 0x1cd   : > { %v4618_v36 = vpop.eup %4617  ;;  %v929_v12 = vpop.xlane.xlu0 %928 }
 0x1ce   : > { %v1134_v49 = vadd.f32 1e-05, %v1070_v19  ;;  %v1069_v15 = vsub.f32 %v1005_v42, %v1037_v10  ;;  %v1004_v13 = vmul.f32 0.0078125, %v929_v12  ;;  %4623 = vrsqrt.f32 %v1135_v40 }
 0x1cf   : > { %v4620_v48 = vpop.eup %4619  ;;  %v847_v38 = vpop.xlane.xlu1 %846  ;;  %v1194_v9 = vmul.f32 %v4618_v36, %v1098_v8  ;;  %v1233_v40 = vmul.f32 %v5295_v31, %v1195_v51 }
 0x1d0   : > { %4625 = vrsqrt.f32 %v1134_v49  ;;  %v1133_v26 = vadd.f32 1e-05, %v1069_v15  ;;  %v1068_v32 = vsub.f32 %v1004_v13, %v1036_v47  ;;  %v1193_v54 = vmul.f32 %v4620_v48, %v1097_v58 }
 0x1d1   : > { %v4622_v46 = vpop.eup %4621  ;;  %v845_v14 = vpop.xlane.xlu0 %844  ;;  %v1232_v34 = vmul.f32 %v5295_v31, %v1194_v9  ;;  %v5492_v29 = vmul.f32 0.0078125, %v847_v38  ;;  %v5512_v15 = vadd.f32 %v5310_v44, %v1233_v40 }
 0x1d2   : > { %4627 = vrsqrt.f32 %v1133_v26  ;;  %v1132_v5 = vadd.f32 1e-05, %v1068_v32  ;;  %v1192_v19 = vmul.f32 %v4622_v46, %v1096_v35  ;;  %v1231_v37 = vmul.f32 %v5295_v31, %v1193_v54 }
 0x1d3   : > { %v843_v10 = vpop.xlane.xlu1 %842  ;;  %v5495_v62 = vmul.f32 0.0078125, %v845_v14  ;;  %v5499_v11 = vadd.f32 %v5310_v44, %v1232_v34  ;;  %v1043_v12 = vmul.f32 %v5492_v29, %v5492_v29 }
 0x1d4   : > { %4629 = vrsqrt.f32 %v1132_v5  ;;  %v1230_v39 = vmul.f32 %v5295_v31, %v1192_v19  ;;  %v5505_v8 = vadd.f32 %v5310_v44, %v1231_v37  ;;  %v5509_v47 = vmul.f32 0.0078125, %v843_v10 }
 0x1d5   : > { %v841_v42 = vpop.xlane.xlu0 %840  ;;  %v1042_v13 = vmul.f32 %v5495_v62, %v5495_v62  ;;  %v1293_v32 = vpack.c.bf16 %v5512_v15, %v5499_v11  ;;  %v1103_v10 = vsub.f32 %v5175_v57, %v5448_v53  ;;  %v1102_v19 = vsub.f32 %v5177_v61, %v5451_v4 }
 0x1d6   : > { %v5502_v45 = vadd.f32 %v5310_v44, %v1230_v39  ;;  %v5518_v38 = vmul.f32 0.0078125, %v841_v42  ;;  %v1041_v35 = vmul.f32 %v5509_v47, %v5509_v47  ;;  %v1100_v61 = vsub.f32 %v5183_v3, %v5474_v7 }
 0x1d7   : > { %v943_v36 = vpop.xlane.xlu1 %942 }
 0x1d8   : > { %v1011_v49 = vmul.f32 0.0078125, %v943_v36  ;;  %v1292_v58 = vpack.c.bf16 %v5505_v8, %v5502_v45  ;;  %v1040_v40 = vmul.f32 %v5518_v38, %v5518_v38 }
 0x1d9   : > { %v941_v48 = vpop.xlane.xlu0 %940 }
 0x1da   : > { %v1075_v9 = vsub.f32 %v1011_v49, %v1043_v12  ;;  %v1010_v26 = vmul.f32 0.0078125, %v941_v48  ;;  %4274 = vmatprep.mubr.bf16.mxu1 %v1292_v58  ;;  %v1101_v49 = vsub.f32 %v5180_v0, %v5465_v21 }
 0x1db   : > { %v939_v51 = vpop.xlane.xlu1 %938  ;;  %v4624_v46 = vpop.eup %4623  ;;  %4275 = vmatmul.mubr.bf16.gmra.mxu1 %v1293_v32 }
 0x1dc   : > { %v1139_v14 = vadd.f32 1e-05, %v1075_v9  ;;  %v1074_v54 = vsub.f32 %v1010_v26, %v1042_v13  ;;  %v1009_v5 = vmul.f32 0.0078125, %v939_v51  ;;  %v1199_v53 = vmul.f32 %v4624_v46, %v1103_v10 }
 0x1dd   : > { %v4626_v34 = vpop.eup %4625  ;;  %v937_v37 = vpop.xlane.xlu0 %936 }
 0x1de   : > { %v1138_v42 = vadd.f32 1e-05, %v1074_v54  ;;  %v1073_v39 = vsub.f32 %v1009_v5, %v1041_v35  ;;  %v1008_v36 = vmul.f32 0.0078125, %v937_v37  ;;  %4631 = vrsqrt.f32 %v1139_v14 }
 0x1df   : > { %v4628_v12 = vpop.eup %4627  ;;  %v855_v13 = vpop.xlane.xlu1 %854  ;;  %v1198_v48 = vmul.f32 %v4626_v34, %v1102_v19  ;;  %v1237_v14 = vmul.f32 %v5295_v31, %v1199_v53 }
 0x1e0   : > { %4633 = vrsqrt.f32 %v1138_v42  ;;  %v1137_v58 = vadd.f32 1e-05, %v1073_v39  ;;  %v1072_v57 = vsub.f32 %v1008_v36, %v1040_v40  ;;  %v1197_v26 = vmul.f32 %v4628_v12, %v1101_v49  ;;  %v4558_v36 = vld [vmem:[%s6980_s7] sm:$0xff]  }
 0x1e1   : > { %v4630_v9 = vpop.eup %4629  ;;  %v853_v4 = vpop.xlane.xlu0 %852  ;;  %v1236_v51 = vmul.f32 %v5295_v31, %v1198_v48  ;;  %v5551_v37 = vmul.f32 0.0078125, %v855_v13  ;;  %v5556_v39 = vadd.f32 %v5310_v44, %v1237_v14  ;;  %4304 = vmatprep.subr.bf16.mxu0 %v4558_v36  ;;  %v1105_v14 = vsub.f32 %v5204_v30, %v5509_v47 }
 0x1e2   : > { %4635 = vrsqrt.f32 %v1137_v58  ;;  %v1136_v32 = vadd.f32 1e-05, %v1072_v57  ;;  %v1196_v54 = vmul.f32 %v4630_v9, %v1100_v61  ;;  %v1235_v0 = vmul.f32 %v5295_v31, %v1197_v26  ;;  %4305 = vmatpush3.bf16.msra.mxu0 %v4558_v36 }
 0x1e3   : > { %v851_v35 = vpop.xlane.xlu1 %850  ;;  %v5543_v3 = vadd.f32 %v5310_v44, %v1236_v51  ;;  %v5561_v12 = vmul.f32 0.0078125, %v853_v4  ;;  %v1047_v4 = vmul.f32 %v5551_v37, %v5551_v37 }
 0x1e4   : > { %4637 = vrsqrt.f32 %v1136_v32  ;;  %v5536_v21 = vmul.f32 0.0078125, %v851_v35  ;;  %v1234_v5 = vmul.f32 %v5295_v31, %v1196_v54  ;;  %v5549_v19 = vadd.f32 %v5310_v44, %v1235_v0 }
 0x1e5   : > { %v849_v46 = vpop.xlane.xlu0 %848  ;;  %v1295_v53 = vpack.c.bf16 %v5556_v39, %v5543_v3  ;;  %v1107_v54 = vsub.f32 %v5199_v23, %v5492_v29  ;;  %v1106_v0 = vsub.f32 %v5201_v28, %v5495_v62 }
 0x1e6   : > { %v5540_v34 = vmul.f32 0.0078125, %v849_v46  ;;  %v5546_v10 = vadd.f32 %v5310_v44, %v1234_v5  ;;  %v1045_v40 = vmul.f32 %v5536_v21, %v5536_v21  ;;  %v1046_v46 = vmul.f32 %v5561_v12, %v5561_v12 }
 0x1e7   : > { %v947_v7 = vpop.xlane.xlu1 %946 }
 0x1e8   : > { %v1013_v42 = vmul.f32 0.0078125, %v947_v7  ;;  %v1294_v48 = vpack.c.bf16 %v5549_v19, %v5546_v10  ;;  %v1044_v13 = vmul.f32 %v5540_v34, %v5540_v34 }
 0x1e9   : > { %v945_v49 = vpop.xlane.xlu0 %944 }
 0x1ea   : > { %v1077_v58 = vsub.f32 %v1013_v42, %v1045_v40  ;;  %v1012_v57 = vmul.f32 0.0078125, %v945_v49  ;;  %4278 = vmatprep.mubr.bf16.mxu1 %v1294_v48  ;;  %v1104_v49 = vsub.f32 %v5207_v33, %v5518_v38 }
 0x1eb   : > { %v951_v9 = vpop.xlane.xlu1 %950  ;;  %v4632_v61 = vpop.eup %4631  ;;  %4279 = vmatmul.mubr.bf16.gmra.mxu1 %v1295_v53 }
 0x1ec   : > { %v1141_v26 = vadd.f32 1e-05, %v1077_v58  ;;  %v1076_v32 = vsub.f32 %v1012_v57, %v1044_v13  ;;  %v1015_v51 = vmul.f32 0.0078125, %v951_v9  ;;  %v1203_v23 = vmul.f32 %v4632_v61, %v1107_v54 }
 0x1ed   : > { %v4634_v35 = vpop.eup %4633  ;;  %v949_v5 = vpop.xlane.xlu0 %948  ;;  %v1108_v54 = vsub.f32 %v5231_v60, %v5540_v34 }
 0x1ee   : > { %4639 = vrsqrt.f32 %v1141_v26  ;;  %v1140_v7 = vadd.f32 1e-05, %v1076_v32  ;;  %v1079_v40 = vsub.f32 %v1015_v51, %v1047_v4  ;;  %v1014_v42 = vmul.f32 0.0078125, %v949_v5 }
 0x1ef   : > { %v4636_v36 = vpop.eup %4635  ;;  %v1202_v48 = vmul.f32 %v4634_v35, %v1106_v0  ;;  %v1241_v53 = vmul.f32 %v5295_v31, %v1203_v23  ;;  %v1109_v51 = vsub.f32 %v5228_v59, %v5536_v21 }
 0x1f0   : > { %4641 = vrsqrt.f32 %v1140_v7  ;;  %v1143_v29 = vadd.f32 1e-05, %v1079_v40  ;;  %v1078_v28 = vsub.f32 %v1014_v42, %v1046_v46  ;;  %v1201_v62 = vmul.f32 %v4636_v36, %v1105_v14 }
 0x1f1   : > { %v4638_v13 = vpop.eup %4637  ;;  %v1240_v30 = vmul.f32 %v5295_v31, %v1202_v48  ;;  %v5595_v4 = vadd.f32 %v5310_v44, %v1241_v53  ;;  %v1111_v46 = vsub.f32 %v5221_v52, %v5551_v37  ;;  %v1110_v42 = vsub.f32 %v5225_v55, %v5561_v12 }
 0x1f2   : > { %4643 = vrsqrt.f32 %v1143_v29  ;;  %v1142_v47 = vadd.f32 1e-05, %v1078_v28  ;;  %v1200_v58 = vmul.f32 %v4638_v13, %v1104_v49  ;;  %v1239_v57 = vmul.f32 %v5295_v31, %v1201_v62  ;;  %v5632_v28 = vld [vmem:[%s6979_s6] ss:$0 sm:$0xff] }
 0x1f3   : > { %v5586_v33 = vadd.f32 %v5310_v44, %v1240_v30 }
 0x1f4   : > { %4645 = vrsqrt.f32 %v1142_v47  ;;  %v1238_v9 = vmul.f32 %v5295_v31, %v1200_v58  ;;  %v5592_v61 = vadd.f32 %v5310_v44, %v1239_v57 }
 0x1f5   : > { %v1297_v32 = vpack.c.bf16 %v5595_v4, %v5586_v33 }
 0x1f6   : > { %v5589_v38 = vadd.f32 %v5310_v44, %v1238_v9 }
 0x1f8   : > { %v1296_v26 = vpack.c.bf16 %v5592_v61, %v5589_v38 }
 0x1fa   : > { %4282 = vmatprep.mubr.bf16.mxu1 %v1296_v26 }
 0x1fb   : > { %v4640_v35 = vpop.eup %4639  ;;  %4283 = vmatmul.mubr.bf16.gmra.mxu1 %v1297_v32 }
 0x1fc   : > { %v1205_v0 = vmul.f32 %v4640_v35, %v1109_v51 }
 0x1fd   : > { %v4642_v14 = vpop.eup %4641 }
 0x1fe   : > { %v1204_v5 = vmul.f32 %v4642_v14, %v1108_v54  ;;  %v1243_v7 = vmul.f32 %v5295_v31, %v1205_v0 }
 0x1ff   : > { %v4644_v40 = vpop.eup %4643 }
 0x200   : > { %v1242_v59 = vmul.f32 %v5295_v31, %v1204_v5  ;;  %v1207_v21 = vmul.f32 %v4644_v40, %v1111_v46  ;;  %v5615_v60 = vadd.f32 %v5310_v44, %v1243_v7 }
 0x201   : > { %v4646_v36 = vpop.eup %4645 }
 0x202   : > { %v5612_v49 = vadd.f32 %v5310_v44, %v1242_v59  ;;  %v1206_v34 = vmul.f32 %v4646_v36, %v1110_v42  ;;  %v1245_v52 = vmul.f32 %v5295_v31, %v1207_v21 }
 0x204   : > { %v1298_v37 = vpack.c.bf16 %v5615_v60, %v5612_v49  ;;  %v1244_v48 = vmul.f32 %v5295_v31, %v1206_v34  ;;  %v5625_v12 = vadd.f32 %v5310_v44, %v1245_v52 }
 0x206   : > { %4286 = vmatprep.mubr.bf16.mxu1 %v1298_v37  ;;  %v5622_v55 = vadd.f32 %v5310_v44, %v1244_v48 }
 0x208   : > { %v1299_v23 = vpack.c.bf16 %v5625_v12, %v5622_v55 }
 0x20a   : > { %4287 = vmatmul.mubr.bf16.gmra.mxu1 %v1299_v23 }
 0x25d   : > { %v4260_v29 = vpop.f32.mrf.mxu1 }
 0x25e   : > { %v1414_v13 = vadd.f32 %v4260_v29, %v5632_v28 }
 0x25f   : > { %v1405_v62 = vpop.f32.mrf.mxu1 }
 0x260   : > { %v1406_v31 = vadd.f32 %v5632_v28, %v1405_v62  ;;  %v1534_v9 = vmul.f32 0.1, %v1414_v13 }
 0x261   : > { %v4261_v30 = vpop.f32.mrf.mxu1 }
 0x262   : > { %v1417_v47 = vadd.f32 %v4261_v30, %v5632_v28  ;;  %v1532_v58 = vmul.f32 0.1, %v1406_v31  ;;  %v1566_v54 = vmax.f32 %v1414_v13, %v1534_v9 }
 0x263   : > { %v1408_v44 = vpop.f32.mrf.mxu1 }
 0x264   : > { %v1535_v57 = vmul.f32 0.1, %v1417_v47  ;;  %v1409_v53 = vadd.f32 %v5632_v28, %v1408_v44  ;;  %v1564_v51 = vmax.f32 %v1406_v31, %v1532_v58 }
 0x266   : > { %v1533_v26 = vmul.f32 0.1, %v1409_v53  ;;  %v1567_v32 = vmax.f32 %v1417_v47, %v1535_v57 }
 0x268   : > { %v1565_v35 = vmax.f32 %v1409_v53, %v1533_v26  ;;  %v1597_v14 = vpack.c.bf16 %v1567_v32, %v1566_v54 }
 0x26a   : > { %v1596_v0 = vpack.c.bf16 %v1565_v35, %v1564_v51 }
 0x26b   : > { %v4264_v46 = vpop.f32.mrf.mxu1 }
 0x26c   : > { %4306 = vmatprep.mubr.bf16.mxu0 %v1596_v0  ;;  %v1430_v40 = vadd.f32 %v4264_v46, %v5632_v28 }
 0x26d   : > { %4307 = vmatmul.mubr.bf16.vlgmr.msra.gmra.mxu0 %v1597_v14  ;;  %v1421_v5 = vpop.f32.mrf.mxu1 }
 0x26e   : > { %v1422_v7 = vadd.f32 %v5632_v28, %v1421_v5  ;;  %v1538_v37 = vmul.f32 0.1, %v1430_v40 }
 0x26f   : > { %v4265_v42 = vpop.f32.mrf.mxu1 }
 0x270   : > { %v1433_v59 = vadd.f32 %v4265_v42, %v5632_v28  ;;  %v1536_v36 = vmul.f32 0.1, %v1422_v7  ;;  %v1570_v31 = vmax.f32 %v1430_v40, %v1538_v37 }
 0x271   : > { %v1424_v21 = vpop.f32.mrf.mxu1 }
 0x272   : > { %v1539_v34 = vmul.f32 0.1, %v1433_v59  ;;  %v1425_v52 = vadd.f32 %v5632_v28, %v1424_v21  ;;  %v1568_v29 = vmax.f32 %v1422_v7, %v1536_v36 }
 0x274   : > { %v1537_v48 = vmul.f32 0.1, %v1425_v52  ;;  %v1571_v23 = vmax.f32 %v1433_v59, %v1539_v34 }
 0x276   : > { %v1569_v62 = vmax.f32 %v1425_v52, %v1537_v48  ;;  %v1599_v30 = vpack.c.bf16 %v1571_v23, %v1570_v31 }
 0x278   : > { %v1598_v13 = vpack.c.bf16 %v1569_v62, %v1568_v29 }
 0x27a   : > { %4310 = vmatprep.mubr.bf16.mxu0 %v1598_v13 }
 0x27b   : > { %v4268_v47 = vpop.f32.mrf.mxu1  ;;  %4311 = vmatmul.mubr.bf16.gmra.mxu0 %v1599_v30 }
 0x27c   : > { %v1446_v57 = vadd.f32 %v4268_v47, %v5632_v28 }
 0x27d   : > { %v1437_v44 = vpop.f32.mrf.mxu1 }
 0x27e   : > { %v1438_v58 = vadd.f32 %v5632_v28, %v1437_v44  ;;  %v1542_v54 = vmul.f32 0.1, %v1446_v57 }
 0x27f   : > { %v4269_v53 = vpop.f32.mrf.mxu1 }
 0x280   : > { %v1449_v9 = vadd.f32 %v4269_v53, %v5632_v28  ;;  %v1540_v32 = vmul.f32 0.1, %v1438_v58  ;;  %v1574_v7 = vmax.f32 %v1446_v57, %v1542_v54 }
 0x281   : > { %v1440_v26 = vpop.f32.mrf.mxu1 }
 0x282   : > { %v1543_v51 = vmul.f32 0.1, %v1449_v9  ;;  %v1441_v35 = vadd.f32 %v5632_v28, %v1440_v26  ;;  %v1572_v46 = vmax.f32 %v1438_v58, %v1540_v32 }
 0x284   : > { %v1541_v0 = vmul.f32 0.1, %v1441_v35  ;;  %v1575_v14 = vmax.f32 %v1449_v9, %v1543_v51 }
 0x286   : > { %v1573_v5 = vmax.f32 %v1441_v35, %v1541_v0  ;;  %v1601_v42 = vpack.c.bf16 %v1575_v14, %v1574_v7 }
 0x288   : > { %v1600_v40 = vpack.c.bf16 %v1573_v5, %v1572_v46 }
 0x28a   : > { %4314 = vmatprep.mubr.bf16.mxu0 %v1600_v40 }
 0x28b   : > { %v4272_v59 = vpop.f32.mrf.mxu1  ;;  %4315 = vmatmul.mubr.bf16.gmra.mxu0 %v1601_v42 }
 0x28c   : > { %v1462_v34 = vadd.f32 %v4272_v59, %v5632_v28 }
 0x28d   : > { %v1453_v21 = vpop.f32.mrf.mxu1 }
 0x28e   : > { %v1454_v36 = vadd.f32 %v5632_v28, %v1453_v21  ;;  %v1546_v31 = vmul.f32 0.1, %v1462_v34 }
 0x28f   : > { %v4273_v52 = vpop.f32.mrf.mxu1 }
 0x290   : > { %v1465_v37 = vadd.f32 %v4273_v52, %v5632_v28  ;;  %v1544_v23 = vmul.f32 0.1, %v1454_v36  ;;  %v1578_v58 = vmax.f32 %v1462_v34, %v1546_v31 }
 0x291   : > { %v1456_v48 = vpop.f32.mrf.mxu1 }
 0x292   : > { %v1547_v29 = vmul.f32 0.1, %v1465_v37  ;;  %v1457_v62 = vadd.f32 %v5632_v28, %v1456_v48  ;;  %v1576_v47 = vmax.f32 %v1454_v36, %v1544_v23 }
 0x294   : > { %v1545_v13 = vmul.f32 0.1, %v1457_v62  ;;  %v1579_v30 = vmax.f32 %v1465_v37, %v1547_v29 }
 0x296   : > { %v1577_v44 = vmax.f32 %v1457_v62, %v1545_v13  ;;  %v1603_v53 = vpack.c.bf16 %v1579_v30, %v1578_v58 }
 0x298   : > { %v1602_v57 = vpack.c.bf16 %v1577_v44, %v1576_v47 }
 0x29a   : > { %4318 = vmatprep.mubr.bf16.mxu0 %v1602_v57 }
 0x29b   : > { %v4276_v9 = vpop.f32.mrf.mxu1  ;;  %4319 = vmatmul.mubr.bf16.gmra.mxu0 %v1603_v53 }
 0x29c   : > { %v1478_v51 = vadd.f32 %v4276_v9, %v5632_v28 }
 0x29d   : > { %v1469_v26 = vpop.f32.mrf.mxu1 }
 0x29e   : > { %v1470_v32 = vadd.f32 %v5632_v28, %v1469_v26  ;;  %v1550_v7 = vmul.f32 0.1, %v1478_v51 }
 0x29f   : > { %v4277_v35 = vpop.f32.mrf.mxu1 }
 0x2a0   : > { %v1481_v54 = vadd.f32 %v4277_v35, %v5632_v28  ;;  %v1548_v14 = vmul.f32 0.1, %v1470_v32  ;;  %v1582_v36 = vmax.f32 %v1478_v51, %v1550_v7 }
 0x2a1   : > { %v1472_v0 = vpop.f32.mrf.mxu1 }
 0x2a2   : > { %v1551_v46 = vmul.f32 0.1, %v1481_v54  ;;  %v1473_v5 = vadd.f32 %v5632_v28, %v1472_v0  ;;  %v1580_v59 = vmax.f32 %v1470_v32, %v1548_v14 }
 0x2a4   : > { %v1549_v40 = vmul.f32 0.1, %v1473_v5  ;;  %v1583_v42 = vmax.f32 %v1481_v54, %v1551_v46 }
 0x2a6   : > { %v1581_v21 = vmax.f32 %v1473_v5, %v1549_v40  ;;  %v1605_v52 = vpack.c.bf16 %v1583_v42, %v1582_v36 }
 0x2a8   : > { %v1604_v34 = vpack.c.bf16 %v1581_v21, %v1580_v59 }
 0x2aa   : > { %4322 = vmatprep.mubr.bf16.mxu0 %v1604_v34 }
 0x2ab   : > { %v4280_v37 = vpop.f32.mrf.mxu1  ;;  %4323 = vmatmul.mubr.bf16.gmra.mxu0 %v1605_v52 }
 0x2ac   : > { %v1494_v29 = vadd.f32 %v4280_v37, %v5632_v28 }
 0x2ad   : > { %v1485_v48 = vpop.f32.mrf.mxu1 }
 0x2ae   : > { %v1486_v23 = vadd.f32 %v5632_v28, %v1485_v48  ;;  %v1554_v58 = vmul.f32 0.1, %v1494_v29 }
 0x2af   : > { %v4281_v62 = vpop.f32.mrf.mxu1 }
 0x2b0   : > { %v1497_v31 = vadd.f32 %v4281_v62, %v5632_v28  ;;  %v1552_v30 = vmul.f32 0.1, %v1486_v23  ;;  %v1586_v32 = vmax.f32 %v1494_v29, %v1554_v58 }
 0x2b1   : > { %v1488_v13 = vpop.f32.mrf.mxu1 }
 0x2b2   : > { %v1555_v47 = vmul.f32 0.1, %v1497_v31  ;;  %v1489_v44 = vadd.f32 %v5632_v28, %v1488_v13  ;;  %v1584_v9 = vmax.f32 %v1486_v23, %v1552_v30 }
 0x2b4   : > { %v1553_v57 = vmul.f32 0.1, %v1489_v44  ;;  %v1587_v53 = vmax.f32 %v1497_v31, %v1555_v47 }
 0x2b6   : > { %v1585_v26 = vmax.f32 %v1489_v44, %v1553_v57  ;;  %v1607_v35 = vpack.c.bf16 %v1587_v53, %v1586_v32 }
 0x2b8   : > { %v1606_v51 = vpack.c.bf16 %v1585_v26, %v1584_v9 }
 0x2ba   : > { %4326 = vmatprep.mubr.bf16.mxu0 %v1606_v51 }
 0x2bb   : > { %v4284_v54 = vpop.f32.mrf.mxu1  ;;  %4327 = vmatmul.mubr.bf16.gmra.mxu0 %v1607_v35 }
 0x2bc   : > { %v1510_v46 = vadd.f32 %v4284_v54, %v5632_v28 }
 0x2bd   : > { %v1501_v0 = vpop.f32.mrf.mxu1 }
 0x2be   : > { %v1502_v14 = vadd.f32 %v5632_v28, %v1501_v0  ;;  %v1558_v36 = vmul.f32 0.1, %v1510_v46 }
 0x2bf   : > { %v4285_v5 = vpop.f32.mrf.mxu1 }
 0x2c0   : > { %v1513_v7 = vadd.f32 %v4285_v5, %v5632_v28  ;;  %v1556_v42 = vmul.f32 0.1, %v1502_v14  ;;  %v1590_v23 = vmax.f32 %v1510_v46, %v1558_v36 }
 0x2c1   : > { %v1504_v40 = vpop.f32.mrf.mxu1 }
 0x2c2   : > { %v1559_v59 = vmul.f32 0.1, %v1513_v7  ;;  %v1505_v21 = vadd.f32 %v5632_v28, %v1504_v40  ;;  %v1588_v37 = vmax.f32 %v1502_v14, %v1556_v42  ;;  %v5672_v40 = vld [vmem:[%s6981_s8] ss:$0 sm:$0xff] }
 0x2c4   : > { %v1557_v34 = vmul.f32 0.1, %v1505_v21  ;;  %v1591_v52 = vmax.f32 %v1513_v7, %v1559_v59  ;;  %v4559_v7 = vld [vmem:[%s6978_s5 + $0x78] sm:$0xff]  }
 0x2c5   : > { %4338 = vmatprep.subr.bf16.mxu1 %v4559_v7 }
 0x2c6   : > { %v1589_v48 = vmax.f32 %v1505_v21, %v1557_v34  ;;  %v1609_v62 = vpack.c.bf16 %v1591_v52, %v1590_v23  ;;  %4339 = vmatpush3.bf16.msra.mxu1 %v4559_v7  ;;  %v4560_v23 = vld [vmem:[%s6978_s5 + $0x70] sm:$0xff]  }
 0x2c7   : > { %4340 = vmatprep.subr.bf16.mxu1 %v4560_v23 }
 0x2c8   : > { %v1608_v29 = vpack.c.bf16 %v1589_v48, %v1588_v37 }
 0x2ca   : > { %v4288_v31 = vpop.f32.mrf.mxu1  ;;  %4330 = vmatprep.mubr.bf16.mxu0 %v1608_v29  ;;  %4341 = vmatpush3.bf16.msra.mxu1 %v4560_v23 }
 0x2cb   : > { %4331 = vmatmul.mubr.bf16.gmra.mxu0 %v1609_v62  ;;  %v1526_v47 = vadd.f32 %v4288_v31, %v5632_v28 }
 0x2cc   : > { %v1517_v13 = vpop.f32.mrf.mxu1 }
 0x2cd   : > { %v1518_v30 = vadd.f32 %v5632_v28, %v1517_v13  ;;  %v1562_v32 = vmul.f32 0.1, %v1526_v47 }
 0x2ce   : > { %v4289_v44 = vpop.f32.mrf.mxu1 }
 0x2cf   : > { %v1529_v58 = vadd.f32 %v4289_v44, %v5632_v28  ;;  %v1560_v53 = vmul.f32 0.1, %v1518_v30  ;;  %v1594_v14 = vmax.f32 %v1526_v47, %v1562_v32 }
 0x2d0   : > { %v1520_v57 = vpop.f32.mrf.mxu1 }
 0x2d1   : > { %v1563_v9 = vmul.f32 0.1, %v1529_v58  ;;  %v1521_v26 = vadd.f32 %v5632_v28, %v1520_v57  ;;  %v1592_v54 = vmax.f32 %v1518_v30, %v1560_v53 }
 0x2d3   : > { %v1561_v51 = vmul.f32 0.1, %v1521_v26  ;;  %v1595_v35 = vmax.f32 %v1529_v58, %v1563_v9  ;;  %v4561_v58 = vld [vmem:[%s6978_s5 + $0x68] sm:$0xff]  }
 0x2d4   : > { %4342 = vmatprep.subr.bf16.mxu1 %v4561_v58 }
 0x2d5   : > { %v1593_v0 = vmax.f32 %v1521_v26, %v1561_v51  ;;  %v1611_v5 = vpack.c.bf16 %v1595_v35, %v1594_v14  ;;  %4343 = vmatpush3.bf16.msra.mxu1 %v4561_v58 }
 0x2d7   : > { %v1610_v46 = vpack.c.bf16 %v1593_v0, %v1592_v54 }
 0x2d9   : > { %4334 = vmatprep.mubr.bf16.mxu0 %v1610_v46 }
 0x2da   : > { %4335 = vmatmul.mubr.bf16.gmra.mxu0 %v1611_v5 }
 0x32d   : > { %v4308_v28 = vpop.f32.mrf.mxu0 }
 0x32e   : > { %v1726_v42 = vadd.f32 %v4308_v28, %v5672_v40 }
 0x32f   : > { %v1717_v59 = vpop.f32.mrf.mxu0 }
 0x330   : > { %v1846_v21 = vmul.f32 0.1, %v1726_v42  ;;  %v1718_v36 = vadd.f32 %v5672_v40, %v1717_v59 }
 0x331   : > { %v4309_v34 = vpop.f32.mrf.mxu0 }
 0x332   : > { %v1878_v52 = vmax.f32 %v1726_v42, %v1846_v21  ;;  %v1844_v37 = vmul.f32 0.1, %v1718_v36  ;;  %v1729_v48 = vadd.f32 %v4309_v34, %v5672_v40 }
 0x333   : > { %v1720_v29 = vpop.f32.mrf.mxu0 }
 0x334   : > { %v1876_v62 = vmax.f32 %v1718_v36, %v1844_v37  ;;  %v1847_v31 = vmul.f32 0.1, %v1729_v48  ;;  %v1721_v13 = vadd.f32 %v5672_v40, %v1720_v29  ;;  %v5682_v30 = vadd.f32 %v1878_v52, %v5332_v16  ;;  %v4562_v37 = vld [vmem:[%s6978_s5 + $0x60] sm:$0xff]  }
 0x335   : > { %4344 = vmatprep.subr.bf16.mxu1 %v4562_v37 }
 0x336   : > { %v1879_v47 = vmax.f32 %v1729_v48, %v1847_v31  ;;  %v1845_v44 = vmul.f32 0.1, %v1721_v13  ;;  %1946 = vadd.xlane.f32.xlu0 %v5682_v30  ;;  %v5692_v9 = vadd.f32 %v1876_v62, %v5324_v1  ;;  %v2008_v32 = vmul.f32 %v5682_v30, %v5682_v30  ;;  %4345 = vmatpush3.bf16.msra.mxu1 %v4562_v37 }
 0x338   : > { %v1877_v57 = vmax.f32 %v1721_v13, %v1845_v44  ;;  %v5689_v53 = vadd.f32 %v1879_v47, %v5319_v56 }
 0x33a   : > { %1948 = vadd.xlane.f32.xlu1 %v5689_v53  ;;  %1942 = vadd.xlane.f32.xlu0 %v5692_v9  ;;  %v5697_v26 = vadd.f32 %v1877_v57, %v5327_v6  ;;  %v2009_v0 = vmul.f32 %v5689_v53, %v5689_v53  ;;  %v2006_v6 = vmul.f32 %v5692_v9, %v5692_v9 }
 0x33b   : > { %v4312_v16 = vpop.f32.mrf.mxu0 }
 0x33c   : > { %v1742_v51 = vadd.f32 %v4312_v16, %v5672_v40  ;;  %v2007_v21 = vmul.f32 %v5697_v26, %v5697_v26 }
 0x33d   : > { %v1733_v56 = vpop.f32.mrf.mxu0 }
 0x33e   : > { %1944 = vadd.xlane.f32.xlu1 %v5697_v26  ;;  %2042 = vadd.xlane.f32.xlu0 %v2008_v32  ;;  %v1850_v1 = vmul.f32 0.1, %v1742_v51  ;;  %v1734_v35 = vadd.f32 %v5672_v40, %v1733_v56 }
 0x33f   : > { %v4313_v54 = vpop.f32.mrf.mxu0 }
 0x340   : > { %v1882_v14 = vmax.f32 %v1742_v51, %v1850_v1  ;;  %v1848_v46 = vmul.f32 0.1, %v1734_v35  ;;  %v1745_v5 = vadd.f32 %v4313_v54, %v5672_v40 }
 0x341   : > { %v1736_v7 = vpop.f32.mrf.mxu0 }
 0x342   : > { %2044 = vadd.xlane.f32.xlu1 %v2009_v0  ;;  %2038 = vadd.xlane.f32.xlu0 %v2006_v6  ;;  %v1851_v28 = vmul.f32 0.1, %v1745_v5  ;;  %v1737_v42 = vadd.f32 %v5672_v40, %v1736_v7  ;;  %v1880_v59 = vmax.f32 %v1734_v35, %v1848_v46  ;;  %v5713_v36 = vadd.f32 %v1882_v14, %v5367_v20  ;;  %v4563_v35 = vld [vmem:[%s6978_s5 + $0x58] sm:$0xff]  }
 0x343   : > { %4346 = vmatprep.subr.bf16.mxu1 %v4563_v35 }
 0x344   : > { %v1883_v34 = vmax.f32 %v1745_v5, %v1851_v28  ;;  %v1849_v52 = vmul.f32 0.1, %v1737_v42  ;;  %v5723_v29 = vadd.f32 %v1880_v59, %v5370_v41  ;;  %v2012_v31 = vmul.f32 %v5713_v36, %v5713_v36  ;;  %4347 = vmatpush3.bf16.msra.mxu1 %v4563_v35  ;;  %v4564_v5 = vld [vmem:[%s6978_s5 + $0x50] sm:$0xff]  }
 0x345   : > { %4348 = vmatprep.subr.bf16.mxu1 %v4564_v5 }
 0x346   : > { %2040 = vadd.xlane.f32.xlu1 %v2007_v21  ;;  %1954 = vadd.xlane.f32.xlu0 %v5713_v36  ;;  %v1881_v48 = vmax.f32 %v1737_v42, %v1849_v52  ;;  %v5720_v23 = vadd.f32 %v1883_v34, %v5380_v63 }
 0x348   : > { %v5728_v62 = vadd.f32 %v1881_v48, %v5373_v43  ;;  %v2013_v58 = vmul.f32 %v5720_v23, %v5720_v23  ;;  %v2010_v43 = vmul.f32 %v5723_v29, %v5723_v29  ;;  %4349 = vmatpush3.bf16.msra.mxu1 %v4564_v5 }
 0x34a   : > { %1956 = vadd.xlane.f32.xlu1 %v5720_v23  ;;  %1950 = vadd.xlane.f32.xlu0 %v5723_v29  ;;  %v2011_v0 = vmul.f32 %v5728_v62, %v5728_v62 }
 0x34b   : > { %v4316_v20 = vpop.f32.mrf.mxu0 }
 0x34c   : > { %v1758_v13 = vadd.f32 %v4316_v20, %v5672_v40 }
 0x34d   : > { %v1749_v63 = vpop.f32.mrf.mxu0 }
 0x34e   : > { %1952 = vadd.xlane.f32.xlu1 %v5728_v62  ;;  %2050 = vadd.xlane.f32.xlu0 %v2012_v31  ;;  %v1854_v41 = vmul.f32 0.1, %v1758_v13  ;;  %v1750_v47 = vadd.f32 %v5672_v40, %v1749_v63 }
 0x34f   : > { %v4317_v44 = vpop.f32.mrf.mxu0 }
 0x350   : > { %v1886_v57 = vmax.f32 %v1758_v13, %v1854_v41  ;;  %v1852_v16 = vmul.f32 0.1, %v1750_v47  ;;  %v1761_v32 = vadd.f32 %v4317_v44, %v5672_v40  ;;  %v4565_v44 = vld [vmem:[%s6978_s5 + $0x48] sm:$0xff]  }
 0x351   : > { %v1752_v51 = vpop.f32.mrf.mxu0  ;;  %4350 = vmatprep.subr.bf16.mxu1 %v4565_v44 }
 0x352   : > { %2052 = vadd.xlane.f32.xlu1 %v2013_v58  ;;  %2046 = vadd.xlane.f32.xlu0 %v2010_v43  ;;  %v1855_v56 = vmul.f32 0.1, %v1761_v32  ;;  %v1753_v1 = vadd.f32 %v5672_v40, %v1752_v51  ;;  %v1884_v54 = vmax.f32 %v1750_v47, %v1852_v16  ;;  %v5747_v6 = vadd.f32 %v1886_v57, %v5411_v2  ;;  %v4566_v51 = vld [vmem:[%s6978_s5 + $0x40] sm:$0xff]  }
 0x353   : > { %4351 = vmatpush3.bf16.msra.mxu1 %v4565_v44 }
 0x354   : > { %v1887_v14 = vmax.f32 %v1761_v32, %v1855_v56  ;;  %v1853_v46 = vmul.f32 0.1, %v1753_v1  ;;  %v5757_v42 = vadd.f32 %v1884_v54, %v5414_v24  ;;  %v2016_v21 = vmul.f32 %v5747_v6, %v5747_v6  ;;  %4352 = vmatprep.subr.bf16.mxu1 %v4566_v51 }
 0x356   : > { %2048 = vadd.xlane.f32.xlu1 %v2011_v0  ;;  %1962 = vadd.xlane.f32.xlu0 %v5747_v6  ;;  %v1885_v7 = vmax.f32 %v1753_v1, %v1853_v46  ;;  %v5754_v28 = vadd.f32 %v1887_v14, %v5424_v25 }
 0x357   : > { %4353 = vmatpush3.bf16.msra.mxu1 %v4566_v51 }
 0x358   : > { %v5762_v59 = vadd.f32 %v1885_v7, %v5417_v17  ;;  %v2017_v48 = vmul.f32 %v5754_v28, %v5754_v28  ;;  %v2014_v17 = vmul.f32 %v5757_v42, %v5757_v42 }
 0x35a   : > { %1964 = vadd.xlane.f32.xlu1 %v5754_v28  ;;  %1958 = vadd.xlane.f32.xlu0 %v5757_v42  ;;  %v2015_v43 = vmul.f32 %v5762_v59, %v5762_v59 }
 0x35b   : > { %v4320_v2 = vpop.f32.mrf.mxu0 }
 0x35c   : > { %v1774_v34 = vadd.f32 %v4320_v2, %v5672_v40 }
 0x35d   : > { %v1765_v25 = vpop.f32.mrf.mxu0 }
 0x35e   : > { %1960 = vadd.xlane.f32.xlu1 %v5762_v59  ;;  %2058 = vadd.xlane.f32.xlu0 %v2016_v21  ;;  %v1858_v24 = vmul.f32 0.1, %v1774_v34  ;;  %v1766_v52 = vadd.f32 %v5672_v40, %v1765_v25 }
 0x35f   : > { %v4321_v37 = vpop.f32.mrf.mxu0 }
 0x360   : > { %v1890_v20 = vmax.f32 %v1774_v34, %v1858_v24  ;;  %v1856_v31 = vmul.f32 0.1, %v1766_v52  ;;  %v1777_v13 = vadd.f32 %v4321_v37, %v5672_v40 }
 0x361   : > { %v1768_v63 = vpop.f32.mrf.mxu0 }
 0x362   : > { %2060 = vadd.xlane.f32.xlu1 %v2017_v48  ;;  %2054 = vadd.xlane.f32.xlu0 %v2014_v17  ;;  %v1859_v41 = vmul.f32 0.1, %v1777_v13  ;;  %v1769_v47 = vadd.f32 %v5672_v40, %v1768_v63  ;;  %v1888_v58 = vmax.f32 %v1766_v52, %v1856_v31  ;;  %v5781_v57 = vadd.f32 %v1890_v20, %v5455_v22 }
 0x364   : > { %v1891_v16 = vmax.f32 %v1777_v13, %v1859_v41  ;;  %v1857_v32 = vmul.f32 0.1, %v1769_v47  ;;  %v5791_v35 = vadd.f32 %v1888_v58, %v5458_v18  ;;  %v2020_v0 = vmul.f32 %v5781_v57, %v5781_v57 }
 0x366   : > { %2056 = vadd.xlane.f32.xlu1 %v2015_v43  ;;  %1970 = vadd.xlane.f32.xlu0 %v5781_v57  ;;  %v1889_v56 = vmax.f32 %v1769_v47, %v1857_v32  ;;  %v5788_v1 = vadd.f32 %v1891_v16, %v5468_v50 }
 0x368   : > { %v5796_v54 = vadd.f32 %v1889_v56, %v5461_v27  ;;  %v2021_v7 = vmul.f32 %v5788_v1, %v5788_v1  ;;  %v2018_v27 = vmul.f32 %v5791_v35, %v5791_v35 }
 0x36a   : > { %1972 = vadd.xlane.f32.xlu1 %v5788_v1  ;;  %1966 = vadd.xlane.f32.xlu0 %v5791_v35  ;;  %v2019_v48 = vmul.f32 %v5796_v54, %v5796_v54 }
 0x36b   : > { %v4324_v22 = vpop.f32.mrf.mxu0 }
 0x36c   : > { %v1790_v14 = vadd.f32 %v4324_v22, %v5672_v40 }
 0x36d   : > { %v1781_v50 = vpop.f32.mrf.mxu0 }
 0x36e   : > { %1968 = vadd.xlane.f32.xlu1 %v5796_v54  ;;  %2066 = vadd.xlane.f32.xlu0 %v2020_v0  ;;  %v1862_v18 = vmul.f32 0.1, %v1790_v14  ;;  %v1782_v46 = vadd.f32 %v5672_v40, %v1781_v50 }
 0x36f   : > { %v4325_v5 = vpop.f32.mrf.mxu0 }
 0x370   : > { %v1894_v2 = vmax.f32 %v1790_v14, %v1862_v18  ;;  %v1860_v21 = vmul.f32 0.1, %v1782_v46  ;;  %v1793_v34 = vadd.f32 %v4325_v5, %v5672_v40 }
 0x371   : > { %v1784_v25 = vpop.f32.mrf.mxu0 }
 0x372   : > { %2068 = vadd.xlane.f32.xlu1 %v2021_v7  ;;  %2062 = vadd.xlane.f32.xlu0 %v2018_v27  ;;  %v1863_v24 = vmul.f32 0.1, %v1793_v34  ;;  %v1785_v52 = vadd.f32 %v5672_v40, %v1784_v25  ;;  %v1892_v37 = vmax.f32 %v1782_v46, %v1860_v21  ;;  %v5812_v17 = vadd.f32 %v1894_v2, %v5499_v11 }
 0x374   : > { %v1895_v20 = vmax.f32 %v1793_v34, %v1863_v24  ;;  %v1861_v31 = vmul.f32 0.1, %v1785_v52  ;;  %v5819_v41 = vadd.f32 %v1892_v37, %v5502_v45  ;;  %v2024_v44 = vmul.f32 %v5812_v17, %v5812_v17 }
 0x376   : > { %2064 = vadd.xlane.f32.xlu1 %v2019_v48  ;;  %1978 = vadd.xlane.f32.xlu0 %v5812_v17  ;;  %v1893_v13 = vmax.f32 %v1785_v52, %v1861_v31  ;;  %v5816_v63 = vadd.f32 %v1895_v20, %v5512_v15 }
 0x378   : > { %v5824_v11 = vadd.f32 %v1893_v13, %v5505_v8  ;;  %v2025_v32 = vmul.f32 %v5816_v63, %v5816_v63  ;;  %v2022_v8 = vmul.f32 %v5819_v41, %v5819_v41 }
 0x37a   : > { %1980 = vadd.xlane.f32.xlu1 %v5816_v63  ;;  %1974 = vadd.xlane.f32.xlu0 %v5819_v41  ;;  %v2023_v46 = vmul.f32 %v5824_v11, %v5824_v11 }
 0x37b   : > { %v4328_v47 = vpop.f32.mrf.mxu0 }
 0x37c   : > { %v1806_v58 = vadd.f32 %v4328_v47, %v5672_v40 }
 0x37d   : > { %v1797_v43 = vpop.f32.mrf.mxu0 }
 0x37e   : > { %1976 = vadd.xlane.f32.xlu1 %v5824_v11  ;;  %2074 = vadd.xlane.f32.xlu0 %v2024_v44  ;;  %v1866_v15 = vmul.f32 0.1, %v1806_v58  ;;  %v1798_v45 = vadd.f32 %v5672_v40, %v1797_v43 }
 0x37f   : > { %v4329_v16 = vpop.f32.mrf.mxu0 }
 0x380   : > { %v1898_v51 = vmax.f32 %v1806_v58, %v1866_v15  ;;  %v1864_v56 = vmul.f32 0.1, %v1798_v45  ;;  %v1809_v22 = vadd.f32 %v4329_v16, %v5672_v40 }
 0x381   : > { %v1800_v0 = vpop.f32.mrf.mxu0 }
 0x382   : > { %2076 = vadd.xlane.f32.xlu1 %v2025_v32  ;;  %2070 = vadd.xlane.f32.xlu0 %v2022_v8  ;;  %v1867_v14 = vmul.f32 0.1, %v1809_v22  ;;  %v1801_v50 = vadd.f32 %v5672_v40, %v1800_v0  ;;  %v1896_v18 = vmax.f32 %v1798_v45, %v1864_v56  ;;  %v5840_v5 = vadd.f32 %v1898_v51, %v5543_v3 }
 0x384   : > { %v1899_v7 = vmax.f32 %v1809_v22, %v1867_v14  ;;  %v1865_v27 = vmul.f32 0.1, %v1801_v50  ;;  %v5847_v34 = vadd.f32 %v1896_v18, %v5546_v10  ;;  %v2028_v52 = vmul.f32 %v5840_v5, %v5840_v5 }
 0x386   : > { %2072 = vadd.xlane.f32.xlu1 %v2023_v46  ;;  %1986 = vadd.xlane.f32.xlu0 %v5840_v5  ;;  %v1897_v2 = vmax.f32 %v1801_v50, %v1865_v27  ;;  %v5844_v21 = vadd.f32 %v1899_v7, %v5556_v39  ;;  %v2026_v20 = vmul.f32 %v5847_v34, %v5847_v34 }
 0x388   : > { %v5853_v24 = vadd.f32 %v1897_v2, %v5549_v19  ;;  %v2029_v19 = vmul.f32 %v5844_v21, %v5844_v21 }
 0x38a   : > { %1988 = vadd.xlane.f32.xlu1 %v5844_v21  ;;  %1982 = vadd.xlane.f32.xlu0 %v5847_v34  ;;  %v2027_v15 = vmul.f32 %v5853_v24, %v5853_v24 }
 0x38b   : > { %v4332_v25 = vpop.f32.mrf.mxu0 }
 0x38c   : > { %v1822_v3 = vadd.f32 %v4332_v25, %v5672_v40 }
 0x38d   : > { %v1813_v37 = vpop.f32.mrf.mxu0 }
 0x38e   : > { %v1870_v48 = vmul.f32 0.1, %v1822_v3  ;;  %v1814_v39 = vadd.f32 %v5672_v40, %v1813_v37  ;;  %1984 = vadd.xlane.f32.xlu1 %v5853_v24  ;;  %2082 = vadd.xlane.f32.xlu0 %v2028_v52 }
 0x38f   : > { %v4333_v10 = vpop.f32.mrf.mxu0 }
 0x390   : > { %v1902_v31 = vmax.f32 %v1822_v3, %v1870_v48  ;;  %v1868_v13 = vmul.f32 0.1, %v1814_v39  ;;  %v1825_v47 = vadd.f32 %v4333_v10, %v5672_v40 }
 0x391   : > { %v1816_v44 = vpop.f32.mrf.mxu0 }
 0x392   : > { %v1871_v58 = vmul.f32 0.1, %v1825_v47  ;;  %v1817_v43 = vadd.f32 %v5672_v40, %v1816_v44  ;;  %2084 = vadd.xlane.f32.xlu1 %v2029_v19  ;;  %2078 = vadd.xlane.f32.xlu0 %v2026_v20  ;;  %v1900_v45 = vmax.f32 %v1814_v39, %v1868_v13  ;;  %v5868_v8 = vadd.f32 %v1902_v31, %v5586_v33 }
 0x394   : > { %v1903_v16 = vmax.f32 %v1825_v47, %v1871_v58  ;;  %v1869_v32 = vmul.f32 0.1, %v1817_v43  ;;  %v5875_v22 = vadd.f32 %v1900_v45, %v5589_v38  ;;  %v2032_v18 = vmul.f32 %v5868_v8, %v5868_v8 }
 0x396   : > { %2080 = vadd.xlane.f32.xlu1 %v2027_v15  ;;  %1994 = vadd.xlane.f32.xlu0 %v5868_v8  ;;  %v1901_v51 = vmax.f32 %v1817_v43, %v1869_v32  ;;  %v5872_v56 = vadd.f32 %v1903_v16, %v5595_v4 }
 0x398   : > { %v5881_v33 = vadd.f32 %v1901_v51, %v5592_v61  ;;  %v2033_v3 = vmul.f32 %v5872_v56, %v5872_v56  ;;  %v2030_v61 = vmul.f32 %v5875_v22, %v5875_v22 }
 0x39a   : > { %1996 = vadd.xlane.f32.xlu1 %v5872_v56  ;;  %1990 = vadd.xlane.f32.xlu0 %v5875_v22  ;;  %v4336_v0 = vpop.f32.mrf.mxu0  ;;  %v2031_v48 = vmul.f32 %v5881_v33, %v5881_v33 }
 0x39b   : > { %v1838_v14 = vadd.f32 %v4336_v0, %v5672_v40 }
 0x39c   : > { %v1829_v50 = vpop.f32.mrf.mxu0 }
 0x39d   : > { %v1874_v46 = vmul.f32 0.1, %v1838_v14  ;;  %v1830_v4 = vadd.f32 %v5672_v40, %v1829_v50 }
 0x39e   : > { %1992 = vadd.xlane.f32.xlu1 %v5881_v33  ;;  %2090 = vadd.xlane.f32.xlu0 %v2032_v18  ;;  %v4337_v38 = vpop.f32.mrf.mxu0 }
 0x39f   : > { %v1841_v7 = vadd.f32 %v4337_v38, %v5672_v40  ;;  %v1906_v27 = vmax.f32 %v1838_v14, %v1874_v46  ;;  %v1872_v2 = vmul.f32 0.1, %v1830_v4 }
 0x3a0   : > { %v1832_v25 = vpop.f32.mrf.mxu0 }
 0x3a1   : > { %v1875_v52 = vmul.f32 0.1, %v1841_v7  ;;  %v1833_v37 = vadd.f32 %v5672_v40, %v1832_v25  ;;  %v1904_v39 = vmax.f32 %v1830_v4, %v1872_v2  ;;  %v5896_v31 = vadd.f32 %v1906_v27, %v5622_v55 }
 0x3a2   : > { %2092 = vadd.xlane.f32.xlu1 %v2033_v3  ;;  %2086 = vadd.xlane.f32.xlu0 %v2030_v61 }
 0x3a3   : > { %v1907_v10 = vmax.f32 %v1841_v7, %v1875_v52  ;;  %v1873_v20 = vmul.f32 0.1, %v1833_v37  ;;  %v5903_v40 = vadd.f32 %v1904_v39, %v5612_v49  ;;  %v2036_v49 = vmul.f32 %v5896_v31, %v5896_v31 }
 0x3a5   : > { %v1905_v13 = vmax.f32 %v1833_v37, %v1873_v20  ;;  %v5900_v47 = vadd.f32 %v1907_v10, %v5625_v12  ;;  %v2034_v55 = vmul.f32 %v5903_v40, %v5903_v40 }
 0x3a6   : > { %2088 = vadd.xlane.f32.xlu1 %v2031_v48  ;;  %2002 = vadd.xlane.f32.xlu0 %v5896_v31 }
 0x3a7   : > { %v5908_v19 = vadd.f32 %v1905_v13, %v5615_v60  ;;  %v2037_v44 = vmul.f32 %v5900_v47, %v5900_v47 }
 0x3a9   : > { %v2035_v12 = vmul.f32 %v5908_v19, %v5908_v19 }
 0x3aa   : > { %2004 = vadd.xlane.f32.xlu1 %v5900_v47  ;;  %1998 = vadd.xlane.f32.xlu0 %v5903_v40 }
 0x3ae   : > { %2000 = vadd.xlane.f32.xlu1 %v5908_v19  ;;  %2094 = vadd.xlane.f32.xlu0 %v2034_v55 }
 0x3b2   : > { %2096 = vadd.xlane.f32.xlu1 %v2035_v12  ;;  %2098 = vadd.xlane.f32.xlu0 %v2036_v49 }
 0x3b6   : > { %2100 = vadd.xlane.f32.xlu1 %v2037_v44 }
 0x3bf   : > { %v1947_v60 = vpop.xlane.xlu0 %1946 }
 0x3c0   : > { %v5919_v15 = vmul.f32 0.0078125, %v1947_v60 }
 0x3c2   : > { %v2168_v51 = vmul.f32 %v5919_v15, %v5919_v15 }
 0x3c3   : > { %v1949_v58 = vpop.xlane.xlu1 %1948  ;;  %v1943_v43 = vpop.xlane.xlu0 %1942 }
 0x3c4   : > { %v5921_v45 = vmul.f32 0.0078125, %v1949_v58  ;;  %v5925_v0 = vmul.f32 0.0078125, %v1943_v43 }
 0x3c6   : > { %v2169_v18 = vmul.f32 %v5921_v45, %v5921_v45  ;;  %v2166_v38 = vmul.f32 %v5925_v0, %v5925_v0 }
 0x3c7   : > { %v1945_v16 = vpop.xlane.xlu1 %1944  ;;  %v2043_v32 = vpop.xlane.xlu0 %2042 }
 0x3c8   : > { %v2136_v14 = vmul.f32 0.0078125, %v2043_v32  ;;  %v5931_v7 = vmul.f32 0.0078125, %v1945_v16 }
 0x3ca   : > { %v2200_v50 = vsub.f32 %v2136_v14, %v2168_v51  ;;  %v2167_v48 = vmul.f32 %v5931_v7, %v5931_v7 }
 0x3cb   : > { %v2045_v46 = vpop.xlane.xlu1 %2044  ;;  %v2039_v4 = vpop.xlane.xlu0 %2038 }
 0x3cc   : > { %v2137_v27 = vmul.f32 0.0078125, %v2045_v46  ;;  %v2134_v2 = vmul.f32 0.0078125, %v2039_v4  ;;  %v2264_v25 = vadd.f32 1e-05, %v2200_v50 }
 0x3ce   : > { %v2201_v3 = vsub.f32 %v2137_v27, %v2169_v18  ;;  %v2198_v61 = vsub.f32 %v2134_v2, %v2166_v38  ;;  %4647 = vrsqrt.f32 %v2264_v25  ;;  %v4567_v25 = vld [vmem:[%s6980_s7 + $0x78] sm:$0xff]  }
 0x3cf   : > { %v2041_v52 = vpop.xlane.xlu1 %2040  ;;  %v1955_v37 = vpop.xlane.xlu0 %1954  ;;  %4386 = vmatprep.subr.bf16.mxu0 %v4567_v25 }
 0x3d0   : > { %v2265_v39 = vadd.f32 1e-05, %v2201_v3  ;;  %v2262_v10 = vadd.f32 1e-05, %v2198_v61  ;;  %v2135_v20 = vmul.f32 0.0078125, %v2041_v52  ;;  %v5935_v44 = vmul.f32 0.0078125, %v1955_v37  ;;  %4387 = vmatpush3.bf16.msra.mxu0 %v4567_v25 }
 0x3d1   : > { %v4568_v3 = vld [vmem:[%s6980_s7 + $0x70] sm:$0xff]  }
 0x3d2   : > { %4649 = vrsqrt.f32 %v2265_v39  ;;  %v2199_v13 = vsub.f32 %v2135_v20, %v2167_v48  ;;  %v2172_v16 = vmul.f32 %v5935_v44, %v5935_v44  ;;  %v2233_v20 = vsub.f32 %v5689_v53, %v5921_v45  ;;  %4388 = vmatprep.subr.bf16.mxu0 %v4568_v3 }
 0x3d3   : > { %4651 = vrsqrt.f32 %v2262_v10  ;;  %v1957_v55 = vpop.xlane.xlu1 %1956  ;;  %v1951_v12 = vpop.xlane.xlu0 %1950  ;;  %v2232_v10 = vsub.f32 %v5682_v30, %v5919_v15  ;;  %v4569_v30 = vld [vmem:[%s6980_s7 + $0x68] sm:$0xff]  }
 0x3d4   : > { %v2263_v49 = vadd.f32 1e-05, %v2199_v13  ;;  %v5937_v60 = vmul.f32 0.0078125, %v1957_v55  ;;  %v5941_v32 = vmul.f32 0.0078125, %v1951_v12  ;;  %v2230_v13 = vsub.f32 %v5692_v9, %v5925_v0  ;;  %4389 = vmatpush3.bf16.msra.mxu0 %v4568_v3 }
 0x3d5   : > { %v2231_v9 = vsub.f32 %v5697_v26, %v5931_v7  ;;  %4390 = vmatprep.subr.bf16.mxu0 %v4569_v30  ;;  %v4570_v26 = vld [vmem:[%s6980_s7 + $0x60] sm:$0xff]  }
 0x3d6   : > { %4653 = vrsqrt.f32 %v2263_v49  ;;  %v2173_v50 = vmul.f32 %v5937_v60, %v5937_v60  ;;  %v2170_v4 = vmul.f32 %v5941_v32, %v5941_v32 }
 0x3d7   : > { %v1953_v58 = vpop.xlane.xlu1 %1952  ;;  %v2051_v43 = vpop.xlane.xlu0 %2050 }
 0x3d8   : > { %v2140_v51 = vmul.f32 0.0078125, %v2051_v43  ;;  %v5947_v38 = vmul.f32 0.0078125, %v1953_v58  ;;  %4391 = vmatpush3.bf16.msra.mxu0 %v4569_v30 }
 0x3d9   : > { %4392 = vmatprep.subr.bf16.mxu0 %v4570_v26 }
 0x3da   : > { %v2204_v14 = vsub.f32 %v2140_v51, %v2172_v16  ;;  %v2171_v58 = vmul.f32 %v5947_v38, %v5947_v38 }
 0x3db   : > { %v2053_v18 = vpop.xlane.xlu1 %2052  ;;  %v2047_v46 = vpop.xlane.xlu0 %2046 }
 0x3dc   : > { %v2141_v27 = vmul.f32 0.0078125, %v2053_v18  ;;  %v2138_v2 = vmul.f32 0.0078125, %v2047_v46  ;;  %v2268_v61 = vadd.f32 1e-05, %v2204_v14  ;;  %v4648_v52 = vpop.eup %4647  ;;  %v5971_v46 = vld [vmem:[%s6982_s9] ss:$0 sm:$0xff]  ;;  %4393 = vmatpush3.bf16.msra.mxu0 %v4570_v26  ;;  %v2236_v26 = vsub.f32 %v5713_v36, %v5935_v44 }
 0x3dd   : > { %v2328_v0 = vmul.f32 %v4648_v52, %v2232_v10  ;;  %v4573_v36 = vld [vmem:[%s6980_s7 + $0x48] sm:$0xff]  }
 0x3de   : > { %v2205_v37 = vsub.f32 %v2141_v27, %v2173_v50  ;;  %v2202_v48 = vsub.f32 %v2138_v2, %v2170_v4  ;;  %4655 = vrsqrt.f32 %v2268_v61 }
 0x3df   : > { %v4650_v39 = vpop.eup %4649  ;;  %v2049_v55 = vpop.xlane.xlu1 %2048  ;;  %v2366_v61 = vmul.f32 %v5971_v46, %v2328_v0 }
 0x3e0   : > { %v1963_v12 = vpop.xlane.xlu0 %1962  ;;  %v4652_v49 = vpop.eup %4651  ;;  %v2269_v43 = vadd.f32 1e-05, %v2205_v37  ;;  %v2266_v16 = vadd.f32 1e-05, %v2202_v48  ;;  %v2139_v51 = vmul.f32 0.0078125, %v2049_v55  ;;  %v2329_v15 = vmul.f32 %v4650_v39, %v2233_v20 }
 0x3e1   : > { %v2326_v53 = vmul.f32 %v4652_v49, %v2230_v13  ;;  %v5973_v27 = vmul.f32 0.0078125, %v1963_v12  ;;  %v5988_v39 = vld [vmem:[%s6983_s10] ss:$0 sm:$0xff]  ;;  %v4571_v12 = vld [vmem:[%s6980_s7 + $0x58] sm:$0xff]  }
 0x3e2   : > { %4657 = vrsqrt.f32 %v2269_v43  ;;  %v2203_v45 = vsub.f32 %v2139_v51, %v2171_v58  ;;  %v2367_v25 = vmul.f32 %v5971_v46, %v2329_v15  ;;  %4394 = vmatprep.subr.bf16.mxu0 %v4571_v12 }
 0x3e3   : > { %v4654_v14 = vpop.eup %4653  ;;  %4659 = vrsqrt.f32 %v2266_v16  ;;  %v1965_v50 = vpop.xlane.xlu1 %1964  ;;  %v2364_v7 = vmul.f32 %v5971_v46, %v2326_v53  ;;  %v2176_v20 = vmul.f32 %v5973_v27, %v5973_v27  ;;  %v6006_v16 = vadd.f32 %v5988_v39, %v2366_v61  ;;  %4395 = vmatpush3.bf16.msra.mxu0 %v4571_v12 }
 0x3e4   : > { %v1959_v18 = vpop.xlane.xlu0 %1958  ;;  %v2267_v4 = vadd.f32 1e-05, %v2203_v45  ;;  %v2327_v2 = vmul.f32 %v4654_v14, %v2231_v9  ;;  %v5981_v52 = vmul.f32 0.0078125, %v1965_v50  ;;  %v5994_v55 = vadd.f32 %v5988_v39, %v2367_v25 }
 0x3e5   : > { %v5983_v37 = vmul.f32 0.0078125, %v1959_v18  ;;  %v6000_v49 = vadd.f32 %v5988_v39, %v2364_v7  ;;  %v4572_v18 = vld [vmem:[%s6980_s7 + $0x50] sm:$0xff]  }
 0x3e6   : > { %4661 = vrsqrt.f32 %v2267_v4  ;;  %v2365_v10 = vmul.f32 %v5971_v46, %v2327_v2  ;;  %v2177_v51 = vmul.f32 %v5981_v52, %v5981_v52  ;;  %v2435_v50 = vpack.c.bf16 %v5994_v55, %v6006_v16  ;;  %4396 = vmatprep.subr.bf16.mxu0 %v4572_v18 }
 0x3e7   : > { %v1961_v3 = vpop.xlane.xlu1 %1960  ;;  %v2174_v30 = vmul.f32 %v5983_v37, %v5983_v37  ;;  %4397 = vmatpush3.bf16.msra.mxu0 %v4572_v18 }
 0x3e8   : > { %v2059_v48 = vpop.xlane.xlu0 %2058  ;;  %v6003_v58 = vadd.f32 %v5988_v39, %v2365_v10  ;;  %v6014_v45 = vmul.f32 0.0078125, %v1961_v3  ;;  %v2237_v3 = vsub.f32 %v5720_v23, %v5937_v60  ;;  %4398 = vmatprep.subr.bf16.mxu0 %v4573_v36 }
 0x3e9   : > { %v2144_v13 = vmul.f32 0.0078125, %v2059_v48  ;;  %v2234_v48 = vsub.f32 %v5723_v29, %v5941_v32  ;;  %v2235_v29 = vsub.f32 %v5728_v62, %v5947_v38 }
 0x3ea   : > { %v2434_v9 = vpack.c.bf16 %v6003_v58, %v6000_v49 }
 0x3eb   : > { %v2208_v43 = vsub.f32 %v2144_v13, %v2176_v20  ;;  %v2061_v53 = vpop.xlane.xlu1 %2060  ;;  %v4656_v2 = vpop.eup %4655  ;;  %4399 = vmatpush3.bf16.msra.mxu0 %v4573_v36 }
 0x3ec   : > { %v2055_v15 = vpop.xlane.xlu0 %2054  ;;  %v2145_v0 = vmul.f32 0.0078125, %v2061_v53  ;;  %4354 = vmatprep.mubr.bf16.mxu1 %v2434_v9  ;;  %v2332_v32 = vmul.f32 %v4656_v2, %v2236_v26 }
 0x3ed   : > { %v2142_v14 = vmul.f32 0.0078125, %v2055_v15  ;;  %v2272_v4 = vadd.f32 1e-05, %v2208_v43  ;;  %4355 = vmatmul.mubr.bf16.vlgmr.msra.gmra.mxu1 %v2435_v50  ;;  %v2175_v43 = vmul.f32 %v6014_v45, %v6014_v45 }
 0x3ee   : > { %v2209_v25 = vsub.f32 %v2145_v0, %v2177_v51  ;;  %v2370_v62 = vmul.f32 %v5971_v46, %v2332_v32 }
 0x3ef   : > { %v2206_v7 = vsub.f32 %v2142_v14, %v2174_v30  ;;  %v4658_v61 = vpop.eup %4657  ;;  %v2057_v10 = vpop.xlane.xlu1 %2056  ;;  %4663 = vrsqrt.f32 %v2272_v4 }
 0x3f0   : > { %v1971_v20 = vpop.xlane.xlu0 %1970  ;;  %v4660_v13 = vpop.eup %4659  ;;  %v2273_v51 = vadd.f32 1e-05, %v2209_v25  ;;  %v2143_v53 = vmul.f32 0.0078125, %v2057_v10  ;;  %v2333_v44 = vmul.f32 %v4658_v61, %v2237_v3 }
 0x3f1   : > { %v2270_v30 = vadd.f32 1e-05, %v2206_v7  ;;  %v2330_v23 = vmul.f32 %v4660_v13, %v2234_v48  ;;  %v6034_v14 = vmul.f32 0.0078125, %v1971_v20 }
 0x3f2   : > { %4665 = vrsqrt.f32 %v2273_v51  ;;  %v2207_v60 = vsub.f32 %v2143_v53, %v2175_v43  ;;  %v2371_v25 = vmul.f32 %v5971_v46, %v2333_v44  ;;  %v6056_v43 = vadd.f32 %v5988_v39, %v2370_v62 }
 0x3f3   : > { %v4662_v12 = vpop.eup %4661  ;;  %4667 = vrsqrt.f32 %v2270_v30  ;;  %v1973_v15 = vpop.xlane.xlu1 %1972  ;;  %v2368_v4 = vmul.f32 %v5971_v46, %v2330_v23  ;;  %v2180_v26 = vmul.f32 %v6034_v14, %v6034_v14  ;;  %v2238_v62 = vsub.f32 %v5757_v42, %v5983_v37 }
 0x3f4   : > { %v1967_v9 = vpop.xlane.xlu0 %1966  ;;  %v2271_v0 = vadd.f32 1e-05, %v2207_v60  ;;  %v2331_v50 = vmul.f32 %v4662_v12, %v2235_v29  ;;  %v6039_v38 = vmul.f32 0.0078125, %v1973_v15  ;;  %v6047_v48 = vadd.f32 %v5988_v39, %v2371_v25 }
 0x3f5   : > { %v6041_v2 = vmul.f32 0.0078125, %v1967_v9  ;;  %v6050_v10 = vadd.f32 %v5988_v39, %v2368_v4  ;;  %v2240_v25 = vsub.f32 %v5747_v6, %v5973_v27  ;;  %v2241_v4 = vsub.f32 %v5754_v28, %v5981_v52 }
 0x3f6   : > { %4669 = vrsqrt.f32 %v2271_v0  ;;  %v2369_v18 = vmul.f32 %v5971_v46, %v2331_v50  ;;  %v2181_v51 = vmul.f32 %v6039_v38, %v6039_v38  ;;  %v2437_v32 = vpack.c.bf16 %v6047_v48, %v6056_v43 }
 0x3f7   : > { %v1969_v7 = vpop.xlane.xlu1 %1968  ;;  %v2178_v30 = vmul.f32 %v6041_v2, %v6041_v2  ;;  %v2239_v6 = vsub.f32 %v5762_v59, %v6014_v45 }
 0x3f8   : > { %v2067_v61 = vpop.xlane.xlu0 %2066  ;;  %v6053_v20 = vadd.f32 %v5988_v39, %v2369_v18  ;;  %v6064_v44 = vmul.f32 0.0078125, %v1969_v7 }
 0x3f9   : > { %v2148_v3 = vmul.f32 0.0078125, %v2067_v61 }
 0x3fa   : > { %v2436_v23 = vpack.c.bf16 %v6053_v20, %v6050_v10 }
 0x3fb   : > { %v2212_v13 = vsub.f32 %v2148_v3, %v2180_v26  ;;  %v2069_v53 = vpop.xlane.xlu1 %2068  ;;  %v2179_v26 = vmul.f32 %v6064_v44, %v6064_v44 }
 0x3fc   : > { %v2063_v36 = vpop.xlane.xlu0 %2062  ;;  %v2149_v29 = vmul.f32 0.0078125, %v2069_v53  ;;  %4358 = vmatprep.mubr.bf16.mxu1 %v2436_v23  ;;  %v4664_v15 = vpop.eup %4663 }
 0x3fd   : > { %v2146_v60 = vmul.f32 0.0078125, %v2063_v36  ;;  %v2276_v12 = vadd.f32 1e-05, %v2212_v13  ;;  %4359 = vmatmul.mubr.bf16.gmra.mxu1 %v2437_v32  ;;  %v2336_v27 = vmul.f32 %v4664_v15, %v2240_v25 }
 0x3fe   : > { %v2213_v9 = vsub.f32 %v2149_v29, %v2181_v51 }
 0x3ff   : > { %v2210_v0 = vsub.f32 %v2146_v60, %v2178_v30  ;;  %v4666_v50 = vpop.eup %4665  ;;  %v2065_v7 = vpop.xlane.xlu1 %2064  ;;  %4671 = vrsqrt.f32 %v2276_v12  ;;  %v2374_v12 = vmul.f32 %v5971_v46, %v2336_v27 }
 0x400   : > { %v1979_v61 = vpop.xlane.xlu0 %1978  ;;  %v4668_v18 = vpop.eup %4667  ;;  %v2277_v3 = vadd.f32 1e-05, %v2213_v9  ;;  %v2147_v51 = vmul.f32 0.0078125, %v2065_v7  ;;  %v2337_v53 = vmul.f32 %v4666_v50, %v2241_v4 }
 0x401   : > { %v2274_v13 = vadd.f32 1e-05, %v2210_v0  ;;  %v2334_v30 = vmul.f32 %v4668_v18, %v2238_v62  ;;  %v6078_v23 = vmul.f32 0.0078125, %v1979_v61  ;;  %v6100_v18 = vadd.f32 %v5988_v39, %v2374_v12 }
 0x402   : > { %4673 = vrsqrt.f32 %v2277_v3  ;;  %v2211_v28 = vsub.f32 %v2147_v51, %v2179_v26  ;;  %v2375_v60 = vmul.f32 %v5971_v46, %v2337_v53  ;;  %v2242_v12 = vsub.f32 %v5791_v35, %v6041_v2 }
 0x403   : > { %v4670_v52 = vpop.eup %4669  ;;  %4675 = vrsqrt.f32 %v2274_v13  ;;  %v1981_v42 = vpop.xlane.xlu1 %1980  ;;  %v2372_v32 = vmul.f32 %v5971_v46, %v2334_v30  ;;  %v2184_v50 = vmul.f32 %v6078_v23, %v6078_v23 }
 0x404   : > { %v1975_v37 = vpop.xlane.xlu0 %1974  ;;  %v2275_v36 = vadd.f32 1e-05, %v2211_v28  ;;  %v2335_v29 = vmul.f32 %v4670_v52, %v2239_v6  ;;  %v6083_v9 = vmul.f32 0.0078125, %v1981_v42  ;;  %v6091_v4 = vadd.f32 %v5988_v39, %v2375_v60 }
 0x405   : > { %v6085_v59 = vmul.f32 0.0078125, %v1975_v37  ;;  %v6094_v62 = vadd.f32 %v5988_v39, %v2372_v32  ;;  %v2244_v60 = vsub.f32 %v5781_v57, %v6034_v14  ;;  %v2245_v32 = vsub.f32 %v5788_v1, %v6039_v38 }
 0x406   : > { %4677 = vrsqrt.f32 %v2275_v36  ;;  %v2373_v0 = vmul.f32 %v5971_v46, %v2335_v29  ;;  %v2185_v26 = vmul.f32 %v6083_v9, %v6083_v9  ;;  %v2439_v27 = vpack.c.bf16 %v6091_v4, %v6100_v18 }
 0x407   : > { %v1977_v45 = vpop.xlane.xlu1 %1976  ;;  %v2182_v3 = vmul.f32 %v6085_v59, %v6085_v59  ;;  %v2243_v57 = vsub.f32 %v5796_v54, %v6064_v44 }
 0x408   : > { %v2075_v15 = vpop.xlane.xlu0 %2074  ;;  %v6097_v7 = vadd.f32 %v5988_v39, %v2373_v0  ;;  %v6108_v53 = vmul.f32 0.0078125, %v1977_v45 }
 0x409   : > { %v2152_v25 = vmul.f32 0.0078125, %v2075_v15 }
 0x40a   : > { %v2438_v30 = vpack.c.bf16 %v6097_v7, %v6094_v62 }
 0x40b   : > { %v2216_v61 = vsub.f32 %v2152_v25, %v2184_v50  ;;  %v2077_v13 = vpop.xlane.xlu1 %2076  ;;  %v2183_v50 = vmul.f32 %v6108_v53, %v6108_v53 }
 0x40c   : > { %v2071_v51 = vpop.xlane.xlu0 %2070  ;;  %v2153_v6 = vmul.f32 0.0078125, %v2077_v13  ;;  %4362 = vmatprep.mubr.bf16.mxu1 %v2438_v30  ;;  %v4672_v42 = vpop.eup %4671 }
 0x40d   : > { %v2150_v28 = vmul.f32 0.0078125, %v2071_v51  ;;  %v2280_v52 = vadd.f32 1e-05, %v2216_v61  ;;  %4363 = vmatmul.mubr.bf16.gmra.mxu1 %v2439_v27  ;;  %v2340_v14 = vmul.f32 %v4672_v42, %v2244_v60 }
 0x40e   : > { %v2217_v37 = vsub.f32 %v2153_v6, %v2185_v26 }
 0x40f   : > { %v2214_v36 = vsub.f32 %v2150_v28, %v2182_v3  ;;  %v4674_v29 = vpop.eup %4673  ;;  %v2073_v45 = vpop.xlane.xlu1 %2072  ;;  %4679 = vrsqrt.f32 %v2280_v52  ;;  %v2378_v52 = vmul.f32 %v5971_v46, %v2340_v14 }
 0x410   : > { %v1987_v15 = vpop.xlane.xlu0 %1986  ;;  %v4676_v0 = vpop.eup %4675  ;;  %v2281_v25 = vadd.f32 1e-05, %v2217_v37  ;;  %v2151_v26 = vmul.f32 0.0078125, %v2073_v45  ;;  %v2341_v13 = vmul.f32 %v4674_v29, %v2245_v32 }
 0x411   : > { %v2278_v61 = vadd.f32 1e-05, %v2214_v36  ;;  %v2338_v3 = vmul.f32 %v4676_v0, %v2242_v12  ;;  %v6122_v30 = vmul.f32 0.0078125, %v1987_v15  ;;  %v6144_v0 = vadd.f32 %v5988_v39, %v2378_v52 }
 0x412   : > { %4681 = vrsqrt.f32 %v2281_v25  ;;  %v2215_v1 = vsub.f32 %v2151_v26, %v2183_v50  ;;  %v2379_v28 = vmul.f32 %v5971_v46, %v2341_v13  ;;  %v2246_v52 = vsub.f32 %v5819_v41, %v6085_v59 }
 0x413   : > { %v4678_v38 = vpop.eup %4677  ;;  %4683 = vrsqrt.f32 %v2278_v61  ;;  %v1989_v35 = vpop.xlane.xlu1 %1988  ;;  %v2376_v27 = vmul.f32 %v5971_v46, %v2338_v3  ;;  %v2188_v29 = vmul.f32 %v6122_v30, %v6122_v30 }
 0x414   : > { %v1983_v2 = vpop.xlane.xlu0 %1982  ;;  %v2279_v51 = vadd.f32 1e-05, %v2215_v1  ;;  %v2339_v6 = vmul.f32 %v4678_v38, %v2243_v57  ;;  %v6127_v37 = vmul.f32 0.0078125, %v1989_v35  ;;  %v6135_v32 = vadd.f32 %v5988_v39, %v2379_v28 }
 0x415   : > { %v6129_v54 = vmul.f32 0.0078125, %v1983_v2  ;;  %v6138_v12 = vadd.f32 %v5988_v39, %v2376_v27  ;;  %v2248_v28 = vsub.f32 %v5812_v17, %v6078_v23  ;;  %v2249_v27 = vsub.f32 %v5816_v63, %v6083_v9 }
 0x416   : > { %4685 = vrsqrt.f32 %v2279_v51  ;;  %v2377_v36 = vmul.f32 %v5971_v46, %v2339_v6  ;;  %v2189_v50 = vmul.f32 %v6127_v37, %v6127_v37  ;;  %v2441_v14 = vpack.c.bf16 %v6135_v32, %v6144_v0 }
 0x417   : > { %v1985_v44 = vpop.xlane.xlu1 %1984  ;;  %v2186_v25 = vmul.f32 %v6129_v54, %v6129_v54  ;;  %v2247_v17 = vsub.f32 %v5824_v11, %v6108_v53 }
 0x418   : > { %v2083_v42 = vpop.xlane.xlu0 %2082  ;;  %v6141_v45 = vadd.f32 %v5988_v39, %v2377_v36  ;;  %v6152_v13 = vmul.f32 0.0078125, %v1985_v44 }
 0x419   : > { %v2156_v60 = vmul.f32 0.0078125, %v2083_v42 }
 0x41a   : > { %v2440_v3 = vpack.c.bf16 %v6141_v45, %v6138_v12 }
 0x41b   : > { %v2220_v15 = vsub.f32 %v2156_v60, %v2188_v29  ;;  %v2085_v61 = vpop.xlane.xlu1 %2084  ;;  %v2187_v29 = vmul.f32 %v6152_v13, %v6152_v13 }
 0x41c   : > { %v2079_v26 = vpop.xlane.xlu0 %2078  ;;  %v2157_v57 = vmul.f32 0.0078125, %v2085_v61  ;;  %4366 = vmatprep.mubr.bf16.mxu1 %v2440_v3  ;;  %v4680_v35 = vpop.eup %4679 }
 0x41d   : > { %v2154_v1 = vmul.f32 0.0078125, %v2079_v26  ;;  %v2284_v38 = vadd.f32 1e-05, %v2220_v15  ;;  %4367 = vmatmul.mubr.bf16.gmra.mxu1 %v2441_v14  ;;  %v2344_v23 = vmul.f32 %v4680_v35, %v2248_v28 }
 0x41e   : > { %v2221_v2 = vsub.f32 %v2157_v57, %v2189_v50 }
 0x41f   : > { %v2218_v51 = vsub.f32 %v2154_v1, %v2186_v25  ;;  %v4682_v6 = vpop.eup %4681  ;;  %v2081_v44 = vpop.xlane.xlu1 %2080  ;;  %4687 = vrsqrt.f32 %v2284_v38  ;;  %v2382_v38 = vmul.f32 %v5971_v46, %v2344_v23 }
 0x420   : > { %v1995_v42 = vpop.xlane.xlu0 %1994  ;;  %v4684_v36 = vpop.eup %4683  ;;  %v2285_v60 = vadd.f32 1e-05, %v2221_v2  ;;  %v2155_v50 = vmul.f32 0.0078125, %v2081_v44  ;;  %v2345_v61 = vmul.f32 %v4682_v6, %v2249_v27 }
 0x421   : > { %v2282_v15 = vadd.f32 1e-05, %v2218_v51  ;;  %v2342_v25 = vmul.f32 %v4684_v36, %v2246_v52  ;;  %v6166_v3 = vmul.f32 0.0078125, %v1995_v42  ;;  %v6188_v36 = vadd.f32 %v5988_v39, %v2382_v38 }
 0x422   : > { %4689 = vrsqrt.f32 %v2285_v60  ;;  %v2219_v63 = vsub.f32 %v2155_v50, %v2187_v29  ;;  %v2383_v1 = vmul.f32 %v5971_v46, %v2345_v61  ;;  %v2250_v38 = vsub.f32 %v5847_v34, %v6129_v54 }
 0x423   : > { %v4686_v9 = vpop.eup %4685  ;;  %4691 = vrsqrt.f32 %v2282_v15  ;;  %v1997_v41 = vpop.xlane.xlu1 %1996  ;;  %v2380_v14 = vmul.f32 %v5971_v46, %v2342_v25  ;;  %v2192_v6 = vmul.f32 %v6166_v3, %v6166_v3 }
 0x424   : > { %v1991_v59 = vpop.xlane.xlu0 %1990  ;;  %v2283_v26 = vadd.f32 1e-05, %v2219_v63  ;;  %v2343_v57 = vmul.f32 %v4686_v9, %v2247_v17  ;;  %v6171_v2 = vmul.f32 0.0078125, %v1997_v41  ;;  %v6179_v27 = vadd.f32 %v5988_v39, %v2383_v1 }
 0x425   : > { %v6173_v11 = vmul.f32 0.0078125, %v1991_v59  ;;  %v6182_v52 = vadd.f32 %v5988_v39, %v2380_v14  ;;  %v2252_v1 = vsub.f32 %v5840_v5, %v6122_v30  ;;  %v2253_v14 = vsub.f32 %v5844_v21, %v6127_v37 }
 0x426   : > { %4693 = vrsqrt.f32 %v2283_v26  ;;  %v2381_v51 = vmul.f32 %v5971_v46, %v2343_v57  ;;  %v2193_v29 = vmul.f32 %v6171_v2, %v6171_v2  ;;  %v2443_v23 = vpack.c.bf16 %v6179_v27, %v6188_v36 }
 0x427   : > { %v1993_v53 = vpop.xlane.xlu1 %1992  ;;  %v2190_v60 = vmul.f32 %v6173_v11, %v6173_v11  ;;  %v2251_v5 = vsub.f32 %v5853_v24, %v6152_v13 }
 0x428   : > { %v2091_v35 = vpop.xlane.xlu0 %2090  ;;  %v6185_v44 = vadd.f32 %v5988_v39, %v2381_v51  ;;  %v6196_v61 = vmul.f32 0.0078125, %v1993_v53 }
 0x429   : > { %v2160_v28 = vmul.f32 0.0078125, %v2091_v35 }
 0x42a   : > { %v2442_v25 = vpack.c.bf16 %v6185_v44, %v6182_v52 }
 0x42b   : > { %v2224_v42 = vsub.f32 %v2160_v28, %v2192_v6  ;;  %v2093_v15 = vpop.xlane.xlu1 %2092  ;;  %v2191_v6 = vmul.f32 %v6196_v61, %v6196_v61 }
 0x42c   : > { %v2087_v50 = vpop.xlane.xlu0 %2086  ;;  %v2161_v17 = vmul.f32 0.0078125, %v2093_v15  ;;  %4370 = vmatprep.mubr.bf16.mxu1 %v2442_v25  ;;  %v4688_v41 = vpop.eup %4687 }
 0x42d   : > { %v2158_v63 = vmul.f32 0.0078125, %v2087_v50  ;;  %v2288_v9 = vadd.f32 1e-05, %v2224_v42  ;;  %4371 = vmatmul.mubr.bf16.gmra.mxu1 %v2443_v23  ;;  %v2348_v15 = vmul.f32 %v4688_v41, %v2252_v1 }
 0x42e   : > { %v2225_v59 = vsub.f32 %v2161_v17, %v2193_v29 }
 0x42f   : > { %v2222_v26 = vsub.f32 %v2158_v63, %v2190_v60  ;;  %v4690_v57 = vpop.eup %4689  ;;  %v2089_v53 = vpop.xlane.xlu1 %2088  ;;  %4695 = vrsqrt.f32 %v2288_v9  ;;  %v2386_v9 = vmul.f32 %v5971_v46, %v2348_v15 }
 0x430   : > { %v2003_v35 = vpop.xlane.xlu0 %2002  ;;  %v4692_v51 = vpop.eup %4691  ;;  %v2289_v28 = vadd.f32 1e-05, %v2225_v59  ;;  %v2159_v29 = vmul.f32 0.0078125, %v2089_v53  ;;  %v2349_v50 = vmul.f32 %v4690_v57, %v2253_v14 }
 0x431   : > { %v2286_v42 = vadd.f32 1e-05, %v2222_v26  ;;  %v2346_v60 = vmul.f32 %v4692_v51, %v2250_v38  ;;  %v6215_v41 = vmul.f32 0.0078125, %v2003_v35  ;;  %v6232_v35 = vadd.f32 %v5988_v39, %v2386_v9  ;;  %v4574_v51 = vld [vmem:[%s6980_s7 + $0x40] sm:$0xff]  }
 0x432   : > { %4697 = vrsqrt.f32 %v2289_v28  ;;  %v2223_v21 = vsub.f32 %v2159_v29, %v2191_v6  ;;  %v2387_v54 = vmul.f32 %v5971_v46, %v2349_v50  ;;  %4400 = vmatprep.subr.bf16.mxu0 %v4574_v51  ;;  %v2256_v9 = vsub.f32 %v5868_v8, %v6166_v3 }
 0x433   : > { %v4694_v30 = vpop.eup %4693  ;;  %4699 = vrsqrt.f32 %v2286_v42  ;;  %v2005_v34 = vpop.xlane.xlu1 %2004  ;;  %v2384_v23 = vmul.f32 %v5971_v46, %v2346_v60  ;;  %v2196_v28 = vmul.f32 %v6215_v41, %v6215_v41  ;;  %4401 = vmatpush3.bf16.msra.mxu0 %v4574_v51 }
 0x434   : > { %v1999_v37 = vpop.xlane.xlu0 %1998  ;;  %v2287_v25 = vadd.f32 1e-05, %v2223_v21  ;;  %v2347_v63 = vmul.f32 %v4694_v30, %v2251_v5  ;;  %v6219_v26 = vadd.f32 %v5988_v39, %v2387_v54  ;;  %v6239_v42 = vmul.f32 0.0078125, %v2005_v34 }
 0x435   : > { %v6211_v17 = vmul.f32 0.0078125, %v1999_v37  ;;  %v6226_v38 = vadd.f32 %v5988_v39, %v2384_v23  ;;  %v2257_v34 = vsub.f32 %v5872_v56, %v6171_v2 }
 0x436   : > { %4701 = vrsqrt.f32 %v2287_v25  ;;  %v2385_v59 = vmul.f32 %v5971_v46, %v2347_v63  ;;  %v2445_v50 = vpack.c.bf16 %v6219_v26, %v6232_v35 }
 0x437   : > { %v2001_v24 = vpop.xlane.xlu1 %2000  ;;  %v2194_v57 = vmul.f32 %v6211_v17, %v6211_v17 }
 0x438   : > { %v2095_v13 = vpop.xlane.xlu0 %2094  ;;  %v6223_v1 = vmul.f32 0.0078125, %v2001_v24  ;;  %v6229_v53 = vadd.f32 %v5988_v39, %v2385_v59  ;;  %v2254_v24 = vsub.f32 %v5875_v22, %v6173_v11 }
 0x439   : > { %v2162_v14 = vmul.f32 0.0078125, %v2095_v13  ;;  %v2197_v13 = vmul.f32 %v6239_v42, %v6239_v42 }
 0x43a   : > { %v2444_v15 = vpack.c.bf16 %v6229_v53, %v6226_v38  ;;  %v2195_v5 = vmul.f32 %v6223_v1, %v6223_v1 }
 0x43b   : > { %v2226_v6 = vsub.f32 %v2162_v14, %v2194_v57  ;;  %v2097_v29 = vpop.xlane.xlu1 %2096 }
 0x43c   : > { %v2099_v60 = vpop.xlane.xlu0 %2098  ;;  %v2163_v30 = vmul.f32 0.0078125, %v2097_v29  ;;  %4374 = vmatprep.mubr.bf16.mxu1 %v2444_v15  ;;  %v4696_v54 = vpop.eup %4695 }
 0x43d   : > { %v2290_v21 = vadd.f32 1e-05, %v2226_v6  ;;  %v2164_v37 = vmul.f32 0.0078125, %v2099_v60  ;;  %4375 = vmatmul.mubr.bf16.gmra.mxu1 %v2445_v50  ;;  %v2352_v29 = vmul.f32 %v4696_v54, %v2256_v9 }
 0x43e   : > { %v2227_v25 = vsub.f32 %v2163_v30, %v2195_v5 }
 0x43f   : > { %4703 = vrsqrt.f32 %v2290_v21  ;;  %v2228_v63 = vsub.f32 %v2164_v37, %v2196_v28  ;;  %v4698_v23 = vpop.eup %4697  ;;  %v2101_v59 = vpop.xlane.xlu1 %2100  ;;  %v2255_v28 = vsub.f32 %v5881_v33, %v6196_v61  ;;  %v2390_v50 = vmul.f32 %v5971_v46, %v2352_v29 }
 0x440   : > { %v4700_v57 = vpop.eup %4699  ;;  %v2291_v14 = vadd.f32 1e-05, %v2227_v25  ;;  %v2165_v6 = vmul.f32 0.0078125, %v2101_v59  ;;  %v2353_v56 = vmul.f32 %v4698_v23, %v2257_v34  ;;  %v2258_v37 = vsub.f32 %v5903_v40, %v6211_v17 }
 0x441   : > { %v2292_v51 = vadd.f32 1e-05, %v2228_v63  ;;  %v2350_v2 = vmul.f32 %v4700_v57, %v2254_v24  ;;  %v6271_v30 = vadd.f32 %v5988_v39, %v2390_v50  ;;  %v2259_v23 = vsub.f32 %v5908_v19, %v6223_v1 }
 0x442   : > { %4705 = vrsqrt.f32 %v2291_v14  ;;  %v2229_v60 = vsub.f32 %v2165_v6, %v2197_v13  ;;  %v2391_v22 = vmul.f32 %v5971_v46, %v2353_v56  ;;  %v2260_v24 = vsub.f32 %v5896_v31, %v6215_v41 }
 0x443   : > { %v4702_v8 = vpop.eup %4701  ;;  %4707 = vrsqrt.f32 %v2292_v51  ;;  %v2388_v15 = vmul.f32 %v5971_v46, %v2350_v2  ;;  %v2261_v57 = vsub.f32 %v5900_v47, %v6239_v42 }
 0x444   : > { %v2293_v3 = vadd.f32 1e-05, %v2229_v60  ;;  %v2351_v11 = vmul.f32 %v4702_v8, %v2255_v28  ;;  %v6262_v21 = vadd.f32 %v5988_v39, %v2391_v22  ;;  %v6308_v28 = vld [vmem:[%s6979_s6 + $0x1] ss:$0 sm:$0xff] }
 0x445   : > { %v6265_v33 = vadd.f32 %v5988_v39, %v2388_v15 }
 0x446   : > { %4709 = vrsqrt.f32 %v2293_v3  ;;  %v2389_v5 = vmul.f32 %v5971_v46, %v2351_v11  ;;  %v2447_v25 = vpack.c.bf16 %v6262_v21, %v6271_v30 }
 0x448   : > { %v6268_v61 = vadd.f32 %v5988_v39, %v2389_v5 }
 0x44a   : > { %v2446_v54 = vpack.c.bf16 %v6268_v61, %v6265_v33 }
 0x44c   : > { %v4704_v34 = vpop.eup %4703  ;;  %4378 = vmatprep.mubr.bf16.mxu1 %v2446_v54 }
 0x44d   : > { %v2354_v63 = vmul.f32 %v4704_v34, %v2258_v37  ;;  %4379 = vmatmul.mubr.bf16.gmra.mxu1 %v2447_v25 }
 0x44f   : > { %v4706_v9 = vpop.eup %4705  ;;  %v2392_v40 = vmul.f32 %v5971_v46, %v2354_v63 }
 0x450   : > { %v4708_v13 = vpop.eup %4707  ;;  %v2355_v59 = vmul.f32 %v4706_v9, %v2259_v23 }
 0x451   : > { %v2356_v17 = vmul.f32 %v4708_v13, %v2260_v24  ;;  %v6288_v6 = vadd.f32 %v5988_v39, %v2392_v40 }
 0x452   : > { %v2393_v14 = vmul.f32 %v5971_v46, %v2355_v59 }
 0x453   : > { %v4710_v51 = vpop.eup %4709  ;;  %v2394_v31 = vmul.f32 %v5971_v46, %v2356_v17 }
 0x454   : > { %v6291_v19 = vadd.f32 %v5988_v39, %v2393_v14  ;;  %v2357_v1 = vmul.f32 %v4710_v51, %v2261_v57 }
 0x455   : > { %v6298_v47 = vadd.f32 %v5988_v39, %v2394_v31 }
 0x456   : > { %v2448_v41 = vpack.c.bf16 %v6291_v19, %v6288_v6  ;;  %v2395_v56 = vmul.f32 %v5971_v46, %v2357_v1 }
 0x458   : > { %4382 = vmatprep.mubr.bf16.mxu1 %v2448_v41  ;;  %v6301_v42 = vadd.f32 %v5988_v39, %v2395_v56 }
 0x45a   : > { %v2449_v2 = vpack.c.bf16 %v6301_v42, %v6298_v47 }
 0x45c   : > { %4383 = vmatmul.mubr.bf16.gmra.mxu1 %v2449_v2 }
 0x4ad   : > { %v4356_v29 = vpop.f32.mrf.mxu1 }
 0x4ae   : > { %v2566_v8 = vadd.f32 %v4356_v29, %v6308_v28 }
 0x4af   : > { %v2557_v60 = vpop.f32.mrf.mxu1 }
 0x4b0   : > { %v2558_v46 = vadd.f32 %v6308_v28, %v2557_v60  ;;  %v2686_v5 = vmul.f32 0.1, %v2566_v8 }
 0x4b1   : > { %v4357_v22 = vpop.f32.mrf.mxu1 }
 0x4b2   : > { %v2569_v3 = vadd.f32 %v4357_v22, %v6308_v28  ;;  %v2684_v11 = vmul.f32 0.1, %v2558_v46  ;;  %v2718_v63 = vmax.f32 %v2566_v8, %v2686_v5 }
 0x4b3   : > { %v2560_v39 = vpop.f32.mrf.mxu1 }
 0x4b4   : > { %v2687_v15 = vmul.f32 0.1, %v2569_v3  ;;  %v2561_v50 = vadd.f32 %v6308_v28, %v2560_v39  ;;  %v2716_v34 = vmax.f32 %v2558_v46, %v2684_v11 }
 0x4b6   : > { %v2685_v37 = vmul.f32 0.1, %v2561_v50  ;;  %v2719_v54 = vmax.f32 %v2569_v3, %v2687_v15 }
 0x4b8   : > { %v2717_v25 = vmax.f32 %v2561_v50, %v2685_v37  ;;  %v2749_v9 = vpack.c.bf16 %v2719_v54, %v2718_v63 }
 0x4ba   : > { %v2748_v23 = vpack.c.bf16 %v2717_v25, %v2716_v34 }
 0x4bc   : > { %4402 = vmatprep.mubr.bf16.mxu0 %v2748_v23 }
 0x4bd   : > { %v4360_v24 = vpop.f32.mrf.mxu1  ;;  %4403 = vmatmul.mubr.bf16.vlgmr.msra.gmra.mxu0 %v2749_v9 }
 0x4be   : > { %v2582_v40 = vadd.f32 %v4360_v24, %v6308_v28 }
 0x4bf   : > { %v2573_v13 = vpop.f32.mrf.mxu1 }
 0x4c0   : > { %v2574_v59 = vadd.f32 %v6308_v28, %v2573_v13  ;;  %v2690_v41 = vmul.f32 0.1, %v2582_v40 }
 0x4c1   : > { %v4361_v17 = vpop.f32.mrf.mxu1 }
 0x4c2   : > { %v2585_v57 = vadd.f32 %v4361_v17, %v6308_v28  ;;  %v2688_v51 = vmul.f32 0.1, %v2574_v59  ;;  %v2722_v46 = vmax.f32 %v2582_v40, %v2690_v41 }
 0x4c3   : > { %v2576_v14 = vpop.f32.mrf.mxu1 }
 0x4c4   : > { %v2691_v1 = vmul.f32 0.1, %v2585_v57  ;;  %v2577_v31 = vadd.f32 %v6308_v28, %v2576_v14  ;;  %v2720_v29 = vmax.f32 %v2574_v59, %v2688_v51 }
 0x4c6   : > { %v2689_v56 = vmul.f32 0.1, %v2577_v31  ;;  %v2723_v2 = vmax.f32 %v2585_v57, %v2691_v1 }
 0x4c8   : > { %v2721_v60 = vmax.f32 %v2577_v31, %v2689_v56  ;;  %v2751_v22 = vpack.c.bf16 %v2723_v2, %v2722_v46 }
 0x4ca   : > { %v2750_v8 = vpack.c.bf16 %v2721_v60, %v2720_v29 }
 0x4cc   : > { %4406 = vmatprep.mubr.bf16.mxu0 %v2750_v8 }
 0x4cd   : > { %v4364_v3 = vpop.f32.mrf.mxu1  ;;  %4407 = vmatmul.mubr.bf16.gmra.mxu0 %v2751_v22 }
 0x4ce   : > { %v2598_v15 = vadd.f32 %v4364_v3, %v6308_v28 }
 0x4cf   : > { %v2589_v39 = vpop.f32.mrf.mxu1 }
 0x4d0   : > { %v2590_v11 = vadd.f32 %v6308_v28, %v2589_v39  ;;  %v2694_v63 = vmul.f32 0.1, %v2598_v15 }
 0x4d1   : > { %v4365_v50 = vpop.f32.mrf.mxu1 }
 0x4d2   : > { %v2601_v5 = vadd.f32 %v4365_v50, %v6308_v28  ;;  %v2692_v54 = vmul.f32 0.1, %v2590_v11  ;;  %v2726_v59 = vmax.f32 %v2598_v15, %v2694_v63 }
 0x4d3   : > { %v2592_v37 = vpop.f32.mrf.mxu1 }
 0x4d4   : > { %v2695_v34 = vmul.f32 0.1, %v2601_v5  ;;  %v2593_v25 = vadd.f32 %v6308_v28, %v2592_v37  ;;  %v2724_v24 = vmax.f32 %v2590_v11, %v2692_v54 }
 0x4d6   : > { %v2693_v23 = vmul.f32 0.1, %v2593_v25  ;;  %v2727_v9 = vmax.f32 %v2601_v5, %v2695_v34 }
 0x4d8   : > { %v2725_v13 = vmax.f32 %v2593_v25, %v2693_v23  ;;  %v2753_v17 = vpack.c.bf16 %v2727_v9, %v2726_v59 }
 0x4da   : > { %v2752_v40 = vpack.c.bf16 %v2725_v13, %v2724_v24 }
 0x4dc   : > { %4410 = vmatprep.mubr.bf16.mxu0 %v2752_v40 }
 0x4dd   : > { %v4368_v57 = vpop.f32.mrf.mxu1  ;;  %4411 = vmatmul.mubr.bf16.gmra.mxu0 %v2753_v17 }
 0x4de   : > { %v2614_v1 = vadd.f32 %v4368_v57, %v6308_v28 }
 0x4df   : > { %v2605_v14 = vpop.f32.mrf.mxu1 }
 0x4e0   : > { %v2606_v51 = vadd.f32 %v6308_v28, %v2605_v14  ;;  %v2698_v46 = vmul.f32 0.1, %v2614_v1 }
 0x4e1   : > { %v4369_v31 = vpop.f32.mrf.mxu1 }
 0x4e2   : > { %v2617_v41 = vadd.f32 %v4369_v31, %v6308_v28  ;;  %v2696_v2 = vmul.f32 0.1, %v2606_v51  ;;  %v2730_v11 = vmax.f32 %v2614_v1, %v2698_v46 }
 0x4e3   : > { %v2608_v56 = vpop.f32.mrf.mxu1 }
 0x4e4   : > { %v2699_v29 = vmul.f32 0.1, %v2617_v41  ;;  %v2609_v60 = vadd.f32 %v6308_v28, %v2608_v56  ;;  %v2728_v3 = vmax.f32 %v2606_v51, %v2696_v2 }
 0x4e6   : > { %v2697_v8 = vmul.f32 0.1, %v2609_v60  ;;  %v2731_v22 = vmax.f32 %v2617_v41, %v2699_v29 }
 0x4e8   : > { %v2729_v39 = vmax.f32 %v2609_v60, %v2697_v8  ;;  %v2755_v50 = vpack.c.bf16 %v2731_v22, %v2730_v11 }
 0x4ea   : > { %v2754_v15 = vpack.c.bf16 %v2729_v39, %v2728_v3 }
 0x4ec   : > { %4414 = vmatprep.mubr.bf16.mxu0 %v2754_v15 }
 0x4ed   : > { %v4372_v5 = vpop.f32.mrf.mxu1  ;;  %4415 = vmatmul.mubr.bf16.gmra.mxu0 %v2755_v50 }
 0x4ee   : > { %v2630_v34 = vadd.f32 %v4372_v5, %v6308_v28 }
 0x4ef   : > { %v2621_v37 = vpop.f32.mrf.mxu1 }
 0x4f0   : > { %v2622_v54 = vadd.f32 %v6308_v28, %v2621_v37  ;;  %v2702_v59 = vmul.f32 0.1, %v2630_v34 }
 0x4f1   : > { %v4373_v25 = vpop.f32.mrf.mxu1 }
 0x4f2   : > { %v2633_v63 = vadd.f32 %v4373_v25, %v6308_v28  ;;  %v2700_v9 = vmul.f32 0.1, %v2622_v54  ;;  %v2734_v51 = vmax.f32 %v2630_v34, %v2702_v59 }
 0x4f3   : > { %v2624_v23 = vpop.f32.mrf.mxu1 }
 0x4f4   : > { %v2703_v24 = vmul.f32 0.1, %v2633_v63  ;;  %v2625_v13 = vadd.f32 %v6308_v28, %v2624_v23  ;;  %v2732_v57 = vmax.f32 %v2622_v54, %v2700_v9 }
 0x4f6   : > { %v2701_v40 = vmul.f32 0.1, %v2625_v13  ;;  %v2735_v17 = vmax.f32 %v2633_v63, %v2703_v24 }
 0x4f8   : > { %v2733_v14 = vmax.f32 %v2625_v13, %v2701_v40  ;;  %v2757_v31 = vpack.c.bf16 %v2735_v17, %v2734_v51 }
 0x4fa   : > { %v2756_v1 = vpack.c.bf16 %v2733_v14, %v2732_v57 }
 0x4fc   : > { %4418 = vmatprep.mubr.bf16.mxu0 %v2756_v1 }
 0x4fd   : > { %v4376_v41 = vpop.f32.mrf.mxu1  ;;  %4419 = vmatmul.mubr.bf16.gmra.mxu0 %v2757_v31 }
 0x4fe   : > { %v2646_v29 = vadd.f32 %v4376_v41, %v6308_v28 }
 0x4ff   : > { %v2637_v56 = vpop.f32.mrf.mxu1 }
 0x500   : > { %v2638_v2 = vadd.f32 %v6308_v28, %v2637_v56  ;;  %v2706_v11 = vmul.f32 0.1, %v2646_v29 }
 0x501   : > { %v4377_v60 = vpop.f32.mrf.mxu1 }
 0x502   : > { %v2649_v46 = vadd.f32 %v4377_v60, %v6308_v28  ;;  %v2704_v22 = vmul.f32 0.1, %v2638_v2  ;;  %v2738_v54 = vmax.f32 %v2646_v29, %v2706_v11 }
 0x503   : > { %v2640_v8 = vpop.f32.mrf.mxu1 }
 0x504   : > { %v2707_v3 = vmul.f32 0.1, %v2649_v46  ;;  %v2641_v39 = vadd.f32 %v6308_v28, %v2640_v8  ;;  %v2736_v5 = vmax.f32 %v2638_v2, %v2704_v22 }
 0x506   : > { %v2705_v15 = vmul.f32 0.1, %v2641_v39  ;;  %v2739_v50 = vmax.f32 %v2649_v46, %v2707_v3 }
 0x508   : > { %v2737_v37 = vmax.f32 %v2641_v39, %v2705_v15  ;;  %v2759_v25 = vpack.c.bf16 %v2739_v50, %v2738_v54 }
 0x50a   : > { %v2758_v34 = vpack.c.bf16 %v2737_v37, %v2736_v5 }
 0x50c   : > { %4422 = vmatprep.mubr.bf16.mxu0 %v2758_v34 }
 0x50d   : > { %v4380_v63 = vpop.f32.mrf.mxu1  ;;  %4423 = vmatmul.mubr.bf16.gmra.mxu0 %v2759_v25 }
 0x50e   : > { %v2662_v24 = vadd.f32 %v4380_v63, %v6308_v28 }
 0x50f   : > { %v2653_v23 = vpop.f32.mrf.mxu1 }
 0x510   : > { %v2654_v9 = vadd.f32 %v6308_v28, %v2653_v23  ;;  %v2710_v51 = vmul.f32 0.1, %v2662_v24 }
 0x511   : > { %v4381_v13 = vpop.f32.mrf.mxu1 }
 0x512   : > { %v2665_v59 = vadd.f32 %v4381_v13, %v6308_v28  ;;  %v2708_v17 = vmul.f32 0.1, %v2654_v9  ;;  %v2742_v2 = vmax.f32 %v2662_v24, %v2710_v51 }
 0x513   : > { %v2656_v40 = vpop.f32.mrf.mxu1 }
 0x514   : > { %v2711_v57 = vmul.f32 0.1, %v2665_v59  ;;  %v2657_v14 = vadd.f32 %v6308_v28, %v2656_v40  ;;  %v2740_v41 = vmax.f32 %v2654_v9, %v2708_v17 }
 0x516   : > { %v2709_v1 = vmul.f32 0.1, %v2657_v14  ;;  %v2743_v31 = vmax.f32 %v2665_v59, %v2711_v57  ;;  %v6345_v59 = vld [vmem:[%s6981_s8 + $0x1] ss:$0 sm:$0xff] }
 0x518   : > { %v2741_v56 = vmax.f32 %v2657_v14, %v2709_v1  ;;  %v2761_v60 = vpack.c.bf16 %v2743_v31, %v2742_v2 }
 0x51a   : > { %v2760_v29 = vpack.c.bf16 %v2741_v56, %v2740_v41 }
 0x51c   : > { %v4384_v46 = vpop.f32.mrf.mxu1  ;;  %4426 = vmatprep.mubr.bf16.mxu0 %v2760_v29 }
 0x51d   : > { %4427 = vmatmul.mubr.bf16.gmra.mxu0 %v2761_v60  ;;  %v2678_v3 = vadd.f32 %v4384_v46, %v6308_v28 }
 0x51e   : > { %v2669_v8 = vpop.f32.mrf.mxu1 }
 0x51f   : > { %v2670_v22 = vadd.f32 %v6308_v28, %v2669_v8  ;;  %v2714_v54 = vmul.f32 0.1, %v2678_v3 }
 0x520   : > { %v4385_v39 = vpop.f32.mrf.mxu1 }
 0x521   : > { %v2681_v11 = vadd.f32 %v4385_v39, %v6308_v28  ;;  %v2712_v50 = vmul.f32 0.1, %v2670_v22  ;;  %v2746_v9 = vmax.f32 %v2678_v3, %v2714_v54 }
 0x522   : > { %v2672_v15 = vpop.f32.mrf.mxu1 }
 0x523   : > { %v2715_v5 = vmul.f32 0.1, %v2681_v11  ;;  %v2673_v37 = vadd.f32 %v6308_v28, %v2672_v15  ;;  %v2744_v63 = vmax.f32 %v2670_v22, %v2712_v50 }
 0x525   : > { %v2713_v34 = vmul.f32 0.1, %v2673_v37  ;;  %v2747_v25 = vmax.f32 %v2681_v11, %v2715_v5 }
 0x527   : > { %v2745_v23 = vmax.f32 %v2673_v37, %v2713_v34  ;;  %v2763_v13 = vpack.c.bf16 %v2747_v25, %v2746_v9 }
 0x529   : > { %v2762_v24 = vpack.c.bf16 %v2745_v23, %v2744_v63 }
 0x52b   : > { %4430 = vmatprep.mubr.bf16.mxu0 %v2762_v24 }
 0x52c   : > { %4431 = vmatmul.mubr.bf16.gmra.mxu0 %v2763_v13 }
 0x57d   : > { %v4404_v40 = vpop.f32.mrf.mxu0 }
 0x57e   : > { %v2880_v17 = vadd.f32 %v4404_v40, %v6345_v59 }
 0x57f   : > { %v2871_v57 = vpop.f32.mrf.mxu0 }
 0x580   : > { %v3000_v28 = vmul.f32 0.1, %v2880_v17  ;;  %v2872_v14 = vadd.f32 %v6345_v59, %v2871_v57 }
 0x581   : > { %v4405_v51 = vpop.f32.mrf.mxu0 }
 0x582   : > { %v3032_v1 = vmax.f32 %v2880_v17, %v3000_v28  ;;  %v2998_v31 = vmul.f32 0.1, %v2872_v14  ;;  %v2883_v41 = vadd.f32 %v4405_v51, %v6345_v59 }
 0x583   : > { %v2874_v56 = vpop.f32.mrf.mxu0 }
 0x584   : > { %v3030_v2 = vmax.f32 %v2872_v14, %v2998_v31  ;;  %v3001_v29 = vmul.f32 0.1, %v2883_v41  ;;  %v2875_v60 = vadd.f32 %v6345_v59, %v2874_v56  ;;  %v6352_v46 = vadd.f32 %v3032_v1, %v6006_v16  ;;  %v4575_v56 = vld [vmem:[%s6984_s11 + $0x38] sm:$0xff]  }
 0x585   : > { %4434 = vmatprep.subr.bf16.mxu0 %v4575_v56  ;;  %4482 = vmatprep.subr.bf16.mxu1 %v4575_v56 }
 0x586   : > { %v3033_v8 = vmax.f32 %v2883_v41, %v3001_v29  ;;  %v2999_v22 = vmul.f32 0.1, %v2875_v60  ;;  %3102 = vadd.xlane.f32.xlu0 %v6352_v46  ;;  %v6359_v11 = vadd.f32 %v3030_v2, %v6000_v49  ;;  %v3164_v16 = vmul.f32 %v6352_v46, %v6352_v46  ;;  %4435 = vmatpush3.bf16.msra.mxu0 %v4575_v56 }
 0x587   : > { %4490 = vmatpush3.bf16.msra.mxu1 %v4575_v56 }
 0x588   : > { %v3031_v3 = vmax.f32 %v2875_v60, %v2999_v22  ;;  %v6356_v39 = vadd.f32 %v3033_v8, %v5994_v55  ;;  %v4576_v22 = vld [vmem:[%s6984_s11 + $0x30] sm:$0xff]  }
 0x589   : > { %4436 = vmatprep.subr.bf16.mxu0 %v4576_v22  ;;  %4483 = vmatprep.subr.bf16.mxu1 %v4576_v22 }
 0x58a   : > { %3104 = vadd.xlane.f32.xlu1 %v6356_v39  ;;  %3098 = vadd.xlane.f32.xlu0 %v6359_v11  ;;  %v6364_v15 = vadd.f32 %v3031_v3, %v6003_v58  ;;  %v3165_v54 = vmul.f32 %v6356_v39, %v6356_v39  ;;  %v3162_v58 = vmul.f32 %v6359_v11, %v6359_v11 }
 0x58b   : > { %4437 = vmatpush3.bf16.msra.mxu0 %v4576_v22  ;;  %4491 = vmatpush3.bf16.msra.mxu1 %v4576_v22 }
 0x58c   : > { %v3163_v24 = vmul.f32 %v6364_v15, %v6364_v15 }
 0x58d   : > { %v4408_v50 = vpop.f32.mrf.mxu0 }
 0x58e   : > { %v2896_v5 = vadd.f32 %v4408_v50, %v6345_v59  ;;  %3100 = vadd.xlane.f32.xlu1 %v6364_v15  ;;  %3198 = vadd.xlane.f32.xlu0 %v3164_v16 }
 0x58f   : > { %v2887_v55 = vpop.f32.mrf.mxu0 }
 0x590   : > { %v3004_v37 = vmul.f32 0.1, %v2896_v5  ;;  %v2888_v49 = vadd.f32 %v6345_v59, %v2887_v55 }
 0x591   : > { %v4409_v34 = vpop.f32.mrf.mxu0 }
 0x592   : > { %v3036_v25 = vmax.f32 %v2896_v5, %v3004_v37  ;;  %v3002_v63 = vmul.f32 0.1, %v2888_v49  ;;  %v2899_v23 = vadd.f32 %v4409_v34, %v6345_v59  ;;  %3200 = vadd.xlane.f32.xlu1 %v3165_v54  ;;  %3194 = vadd.xlane.f32.xlu0 %v3162_v58 }
 0x593   : > { %v2890_v9 = vpop.f32.mrf.mxu0 }
 0x594   : > { %v3034_v13 = vmax.f32 %v2888_v49, %v3002_v63  ;;  %v3005_v40 = vmul.f32 0.1, %v2899_v23  ;;  %v2891_v17 = vadd.f32 %v6345_v59, %v2890_v9  ;;  %v6380_v57 = vadd.f32 %v3036_v25, %v6056_v43  ;;  %v4577_v25 = vld [vmem:[%s6984_s11 + $0x28] sm:$0xff]  }
 0x595   : > { %4438 = vmatprep.subr.bf16.mxu0 %v4577_v25  ;;  %4484 = vmatprep.subr.bf16.mxu1 %v4577_v25 }
 0x596   : > { %v3037_v28 = vmax.f32 %v2899_v23, %v3005_v40  ;;  %v3003_v14 = vmul.f32 0.1, %v2891_v17  ;;  %3196 = vadd.xlane.f32.xlu1 %v3163_v24  ;;  %3110 = vadd.xlane.f32.xlu0 %v6380_v57  ;;  %v6387_v31 = vadd.f32 %v3034_v13, %v6050_v10  ;;  %v3168_v43 = vmul.f32 %v6380_v57, %v6380_v57  ;;  %v4578_v13 = vld [vmem:[%s6984_s11 + $0x20] sm:$0xff]  }
 0x597   : > { %4439 = vmatpush3.bf16.msra.mxu0 %v4577_v25  ;;  %4492 = vmatpush3.bf16.msra.mxu1 %v4577_v25 }
 0x598   : > { %v3035_v51 = vmax.f32 %v2891_v17, %v3003_v14  ;;  %v6384_v1 = vadd.f32 %v3037_v28, %v6047_v48  ;;  %v3166_v8 = vmul.f32 %v6387_v31, %v6387_v31  ;;  %4440 = vmatprep.subr.bf16.mxu0 %v4578_v13  ;;  %4485 = vmatprep.subr.bf16.mxu1 %v4578_v13 }
 0x59a   : > { %3112 = vadd.xlane.f32.xlu1 %v6384_v1  ;;  %3106 = vadd.xlane.f32.xlu0 %v6387_v31  ;;  %v6392_v41 = vadd.f32 %v3035_v51, %v6053_v20  ;;  %v3169_v60 = vmul.f32 %v6384_v1, %v6384_v1 }
 0x59b   : > { %4441 = vmatpush3.bf16.msra.mxu0 %v4578_v13  ;;  %4493 = vmatpush3.bf16.msra.mxu1 %v4578_v13 }
 0x59c   : > { %v3167_v37 = vmul.f32 %v6392_v41, %v6392_v41 }
 0x59d   : > { %v4412_v2 = vpop.f32.mrf.mxu0 }
 0x59e   : > { %v2912_v48 = vadd.f32 %v4412_v2, %v6345_v59  ;;  %3108 = vadd.xlane.f32.xlu1 %v6392_v41  ;;  %3206 = vadd.xlane.f32.xlu0 %v3168_v43  ;;  %v4580_v2 = vld [vmem:[%s6984_s11 + $0x10] sm:$0xff]  }
 0x59f   : > { %v2903_v10 = vpop.f32.mrf.mxu0 }
 0x5a0   : > { %v3008_v29 = vmul.f32 0.1, %v2912_v48  ;;  %v2904_v20 = vadd.f32 %v6345_v59, %v2903_v10 }
 0x5a1   : > { %v4413_v3 = vpop.f32.mrf.mxu0 }
 0x5a2   : > { %v3040_v16 = vmax.f32 %v2912_v48, %v3008_v29  ;;  %v3006_v50 = vmul.f32 0.1, %v2904_v20  ;;  %v2915_v5 = vadd.f32 %v4413_v3, %v6345_v59  ;;  %3208 = vadd.xlane.f32.xlu1 %v3169_v60  ;;  %3202 = vadd.xlane.f32.xlu0 %v3166_v8 }
 0x5a3   : > { %v2906_v55 = vpop.f32.mrf.mxu0 }
 0x5a4   : > { %v3038_v49 = vmax.f32 %v2904_v20, %v3006_v50  ;;  %v3009_v54 = vmul.f32 0.1, %v2915_v5  ;;  %v2907_v58 = vadd.f32 %v6345_v59, %v2906_v55  ;;  %v6414_v34 = vadd.f32 %v3040_v16, %v6100_v18 }
 0x5a6   : > { %v3041_v63 = vmax.f32 %v2915_v5, %v3009_v54  ;;  %v3007_v23 = vmul.f32 0.1, %v2907_v58  ;;  %3204 = vadd.xlane.f32.xlu1 %v3167_v37  ;;  %3118 = vadd.xlane.f32.xlu0 %v6414_v34  ;;  %v6424_v18 = vadd.f32 %v3038_v49, %v6094_v62  ;;  %v4579_v62 = vld [vmem:[%s6984_s11 + $0x18] sm:$0xff]   ;;  %v4581_v5 = vld [vmem:[%s6984_s11 + $0x8] sm:$0xff]  }
 0x5a7   : > { %4442 = vmatprep.subr.bf16.mxu0 %v4579_v62  ;;  %4486 = vmatprep.subr.bf16.mxu1 %v4579_v62 }
 0x5a8   : > { %v3039_v9 = vmax.f32 %v2907_v58, %v3007_v23  ;;  %v6421_v24 = vadd.f32 %v3041_v63, %v6091_v4  ;;  %v3172_v4 = vmul.f32 %v6414_v34, %v6414_v34  ;;  %v3170_v56 = vmul.f32 %v6424_v18, %v6424_v18  ;;  %4443 = vmatpush3.bf16.msra.mxu0 %v4579_v62  ;;  %v4582_v58 = vld [vmem:[%s6984_s11] sm:$0xff]  }
 0x5a9   : > { %4494 = vmatpush3.bf16.msra.mxu1 %v4579_v62  ;;  %4444 = vmatprep.subr.bf16.mxu0 %v4580_v2 }
 0x5aa   : > { %3120 = vadd.xlane.f32.xlu1 %v6421_v24  ;;  %3114 = vadd.xlane.f32.xlu0 %v6424_v18  ;;  %v6432_v40 = vadd.f32 %v3039_v9, %v6097_v7  ;;  %v3173_v43 = vmul.f32 %v6421_v24, %v6421_v24 }
 0x5ab   : > { %4487 = vmatprep.subr.bf16.mxu1 %v4580_v2 }
 0x5ac   : > { %v3171_v8 = vmul.f32 %v6432_v40, %v6432_v40  ;;  %4445 = vmatpush3.bf16.msra.mxu0 %v4580_v2 }
 0x5ad   : > { %v4416_v17 = vpop.f32.mrf.mxu0  ;;  %4495 = vmatpush3.bf16.msra.mxu1 %v4580_v2  ;;  %4446 = vmatprep.subr.bf16.mxu0 %v4581_v5 }
 0x5ae   : > { %v2928_v28 = vadd.f32 %v4416_v17, %v6345_v59  ;;  %3116 = vadd.xlane.f32.xlu1 %v6432_v40  ;;  %3214 = vadd.xlane.f32.xlu0 %v3172_v4 }
 0x5af   : > { %v2919_v14 = vpop.f32.mrf.mxu0  ;;  %4488 = vmatprep.subr.bf16.mxu1 %v4581_v5 }
 0x5b0   : > { %v3012_v7 = vmul.f32 0.1, %v2928_v28  ;;  %v2920_v51 = vadd.f32 %v6345_v59, %v2919_v14  ;;  %4447 = vmatpush3.bf16.msra.mxu0 %v4581_v5 }
 0x5b1   : > { %v4417_v48 = vpop.f32.mrf.mxu0  ;;  %4496 = vmatpush3.bf16.msra.mxu1 %v4581_v5  ;;  %4448 = vmatprep.subr.bf16.mxu0 %v4582_v58 }
 0x5b2   : > { %v3044_v10 = vmax.f32 %v2928_v28, %v3012_v7  ;;  %v3010_v29 = vmul.f32 0.1, %v2920_v51  ;;  %v2931_v20 = vadd.f32 %v4417_v48, %v6345_v59  ;;  %3216 = vadd.xlane.f32.xlu1 %v3173_v43  ;;  %3210 = vadd.xlane.f32.xlu0 %v3170_v56 }
 0x5b3   : > { %v2922_v60 = vpop.f32.mrf.mxu0  ;;  %4489 = vmatprep.subr.bf16.mxu1 %v4582_v58 }
 0x5b4   : > { %v3042_v22 = vmax.f32 %v2920_v51, %v3010_v29  ;;  %v3013_v3 = vmul.f32 0.1, %v2931_v20  ;;  %v2923_v16 = vadd.f32 %v6345_v59, %v2922_v60  ;;  %v6454_v50 = vadd.f32 %v3044_v10, %v6144_v0  ;;  %4449 = vmatpush3.bf16.msra.mxu0 %v4582_v58 }
 0x5b5   : > { %4497 = vmatpush3.bf16.msra.mxu1 %v4582_v58 }
 0x5b6   : > { %v3045_v55 = vmax.f32 %v2931_v20, %v3013_v3  ;;  %v3011_v37 = vmul.f32 0.1, %v2923_v16  ;;  %3212 = vadd.xlane.f32.xlu1 %v3171_v8  ;;  %3126 = vadd.xlane.f32.xlu0 %v6454_v50  ;;  %v6464_v0 = vadd.f32 %v3042_v22, %v6138_v12 }
 0x5b8   : > { %v3043_v49 = vmax.f32 %v2923_v16, %v3011_v37  ;;  %v6461_v54 = vadd.f32 %v3045_v55, %v6135_v32  ;;  %v3176_v32 = vmul.f32 %v6454_v50, %v6454_v50 }
 0x5ba   : > { %3128 = vadd.xlane.f32.xlu1 %v6461_v54  ;;  %3122 = vadd.xlane.f32.xlu0 %v6464_v0  ;;  %v6472_v25 = vadd.f32 %v3043_v49, %v6141_v45  ;;  %v3177_v4 = vmul.f32 %v6461_v54, %v6461_v54  ;;  %v3174_v45 = vmul.f32 %v6464_v0, %v6464_v0 }
 0x5bc   : > { %v3175_v51 = vmul.f32 %v6472_v25, %v6472_v25 }
 0x5bd   : > { %v4420_v12 = vpop.f32.mrf.mxu0 }
 0x5be   : > { %v2944_v63 = vadd.f32 %v4420_v12, %v6345_v59  ;;  %3124 = vadd.xlane.f32.xlu1 %v6472_v25  ;;  %3222 = vadd.xlane.f32.xlu0 %v3176_v32 }
 0x5bf   : > { %v2935_v23 = vpop.f32.mrf.mxu0 }
 0x5c0   : > { %v3016_v9 = vmul.f32 0.1, %v2944_v63  ;;  %v2936_v13 = vadd.f32 %v6345_v59, %v2935_v23 }
 0x5c1   : > { %v4421_v62 = vpop.f32.mrf.mxu0 }
 0x5c2   : > { %v3048_v17 = vmax.f32 %v2944_v63, %v3016_v9  ;;  %v3014_v28 = vmul.f32 0.1, %v2936_v13  ;;  %v2947_v14 = vadd.f32 %v4421_v62, %v6345_v59  ;;  %3224 = vadd.xlane.f32.xlu1 %v3177_v4  ;;  %3218 = vadd.xlane.f32.xlu0 %v3174_v45 }
 0x5c3   : > { %v2938_v7 = vpop.f32.mrf.mxu0 }
 0x5c4   : > { %v3046_v43 = vmax.f32 %v2936_v13, %v3014_v28  ;;  %v3017_v56 = vmul.f32 0.1, %v2947_v14  ;;  %v2939_v2 = vadd.f32 %v6345_v59, %v2938_v7  ;;  %v6488_v48 = vadd.f32 %v3048_v17, %v6188_v36 }
 0x5c6   : > { %v3049_v10 = vmax.f32 %v2947_v14, %v3017_v56  ;;  %v3015_v29 = vmul.f32 0.1, %v2939_v2  ;;  %3220 = vadd.xlane.f32.xlu1 %v3175_v51  ;;  %3134 = vadd.xlane.f32.xlu0 %v6488_v48  ;;  %v6495_v8 = vadd.f32 %v3046_v43, %v6182_v52  ;;  %v3180_v36 = vmul.f32 %v6488_v48, %v6488_v48 }
 0x5c8   : > { %v3047_v20 = vmax.f32 %v2939_v2, %v3015_v29  ;;  %v6492_v60 = vadd.f32 %v3049_v10, %v6179_v27 }
 0x5ca   : > { %3136 = vadd.xlane.f32.xlu1 %v6492_v60  ;;  %3130 = vadd.xlane.f32.xlu0 %v6495_v8  ;;  %v6500_v22 = vadd.f32 %v3047_v20, %v6185_v44  ;;  %v3181_v55 = vmul.f32 %v6492_v60, %v6492_v60  ;;  %v3178_v44 = vmul.f32 %v6495_v8, %v6495_v8 }
 0x5cc   : > { %v3179_v63 = vmul.f32 %v6500_v22, %v6500_v22 }
 0x5cd   : > { %v4424_v3 = vpop.f32.mrf.mxu0 }
 0x5ce   : > { %v2960_v16 = vadd.f32 %v4424_v3, %v6345_v59  ;;  %3132 = vadd.xlane.f32.xlu1 %v6500_v22  ;;  %3230 = vadd.xlane.f32.xlu0 %v3180_v36 }
 0x5cf   : > { %v2951_v27 = vpop.f32.mrf.mxu0 }
 0x5d0   : > { %v3020_v5 = vmul.f32 0.1, %v2960_v16  ;;  %v2952_v52 = vadd.f32 %v6345_v59, %v2951_v27 }
 0x5d1   : > { %v4425_v37 = vpop.f32.mrf.mxu0 }
 0x5d2   : > { %v3052_v49 = vmax.f32 %v2960_v16, %v3020_v5  ;;  %v3018_v58 = vmul.f32 0.1, %v2952_v52  ;;  %v2963_v32 = vadd.f32 %v4425_v37, %v6345_v59  ;;  %3232 = vadd.xlane.f32.xlu1 %v3181_v55  ;;  %3226 = vadd.xlane.f32.xlu0 %v3178_v44 }
 0x5d3   : > { %v2954_v12 = vpop.f32.mrf.mxu0 }
 0x5d4   : > { %v3050_v23 = vmax.f32 %v2952_v52, %v3018_v58  ;;  %v3021_v9 = vmul.f32 0.1, %v2963_v32  ;;  %v2955_v13 = vadd.f32 %v6345_v59, %v2954_v12  ;;  %v6516_v4 = vadd.f32 %v3052_v49, %v6232_v35 }
 0x5d6   : > { %v3053_v45 = vmax.f32 %v2963_v32, %v3021_v9  ;;  %v3019_v62 = vmul.f32 0.1, %v2955_v13  ;;  %3228 = vadd.xlane.f32.xlu1 %v3179_v63  ;;  %3142 = vadd.xlane.f32.xlu0 %v6516_v4  ;;  %v6523_v14 = vadd.f32 %v3050_v23, %v6226_v38  ;;  %v3184_v51 = vmul.f32 %v6516_v4, %v6516_v4 }
 0x5d8   : > { %v3051_v17 = vmax.f32 %v2955_v13, %v3019_v62  ;;  %v6520_v28 = vadd.f32 %v3053_v45, %v6219_v26 }
 0x5da   : > { %3144 = vadd.xlane.f32.xlu1 %v6520_v28  ;;  %3138 = vadd.xlane.f32.xlu0 %v6523_v14  ;;  %v6528_v35 = vadd.f32 %v3051_v17, %v6229_v53  ;;  %v3185_v10 = vmul.f32 %v6520_v28, %v6520_v28  ;;  %v3182_v53 = vmul.f32 %v6523_v14, %v6523_v14 }
 0x5dc   : > { %v3183_v55 = vmul.f32 %v6528_v35, %v6528_v35 }
 0x5dd   : > { %v4428_v7 = vpop.f32.mrf.mxu0 }
 0x5de   : > { %v2976_v43 = vadd.f32 %v4428_v7, %v6345_v59  ;;  %3140 = vadd.xlane.f32.xlu1 %v6528_v35  ;;  %3238 = vadd.xlane.f32.xlu0 %v3184_v51 }
 0x5df   : > { %v2967_v26 = vpop.f32.mrf.mxu0 }
 0x5e0   : > { %v3024_v56 = vmul.f32 0.1, %v2976_v43  ;;  %v2968_v38 = vadd.f32 %v6345_v59, %v2967_v26 }
 0x5e1   : > { %v4429_v2 = vpop.f32.mrf.mxu0 }
 0x5e2   : > { %v3056_v29 = vmax.f32 %v2976_v43, %v3024_v56  ;;  %v3022_v20 = vmul.f32 0.1, %v2968_v38  ;;  %v2979_v36 = vadd.f32 %v4429_v2, %v6345_v59  ;;  %3240 = vadd.xlane.f32.xlu1 %v3185_v10  ;;  %3234 = vadd.xlane.f32.xlu0 %v3182_v53 }
 0x5e3   : > { %v2970_v3 = vpop.f32.mrf.mxu0 }
 0x5e4   : > { %v3025_v16 = vmul.f32 0.1, %v2979_v36  ;;  %v2971_v27 = vadd.f32 %v6345_v59, %v2970_v3  ;;  %v6542_v5 = vadd.f32 %v3056_v29, %v6271_v30  ;;  %v3054_v52 = vmax.f32 %v2968_v38, %v3022_v20 }
 0x5e5   : > { %v4837_v3 = vmov 0  }
 0x5e6   : > { %v3057_v44 = vmax.f32 %v2979_v36, %v3025_v16  ;;  %v3023_v37 = vmul.f32 0.1, %v2971_v27  ;;  %3236 = vadd.xlane.f32.xlu1 %v3183_v55  ;;  %3150 = vadd.xlane.f32.xlu0 %v6542_v5  ;;  %v6551_v32 = vadd.f32 %v3054_v52, %v6265_v33  ;;  %v3188_v23 = vmul.f32 %v6542_v5, %v6542_v5 }
 0x5e7   : > { %4540 = vset.pattern.permute.xlu0 %v4837_v3 }
 0x5e8   : > { %v6548_v49 = vadd.f32 %v3057_v44, %v6262_v21  ;;  %v3055_v58 = vmax.f32 %v2971_v27, %v3023_v37  ;;  %v3186_v45 = vmul.f32 %v6551_v32, %v6551_v32  ;;  %v4053_v44 = vld [vmem:[#allocation2] ss:$0 sm:$0xff] }
 0x5ea   : > { %3152 = vadd.xlane.f32.xlu1 %v6548_v49  ;;  %3146 = vadd.xlane.f32.xlu0 %v6551_v32  ;;  %v6557_v63 = vadd.f32 %v3055_v58, %v6268_v61  ;;  %v3189_v61 = vmul.f32 %v6548_v49, %v6548_v49 }
 0x5ec   : > { %v4432_v30 = vpop.f32.mrf.mxu0  ;;  %v3187_v53 = vmul.f32 %v6557_v63, %v6557_v63 }
 0x5ed   : > { %v2992_v12 = vadd.f32 %v4432_v30, %v6345_v59 }
 0x5ee   : > { %v2983_v9 = vpop.f32.mrf.mxu0  ;;  %3148 = vadd.xlane.f32.xlu1 %v6557_v63  ;;  %3246 = vadd.xlane.f32.xlu0 %v3188_v23 }
 0x5ef   : > { %v3028_v21 = vmul.f32 0.1, %v2992_v12  ;;  %v2984_v33 = vadd.f32 %v6345_v59, %v2983_v9 }
 0x5f0   : > { %v4433_v13 = vpop.f32.mrf.mxu0 }
 0x5f1   : > { %v3060_v62 = vmax.f32 %v2992_v12, %v3028_v21  ;;  %v3026_v17 = vmul.f32 0.1, %v2984_v33  ;;  %v2995_v7 = vadd.f32 %v4433_v13, %v6345_v59 }
 0x5f2   : > { %v2986_v51 = vpop.f32.mrf.mxu0  ;;  %3248 = vadd.xlane.f32.xlu1 %v3189_v61  ;;  %3242 = vadd.xlane.f32.xlu0 %v3186_v45 }
 0x5f3   : > { %v3029_v43 = vmul.f32 0.1, %v2995_v7  ;;  %v2987_v26 = vadd.f32 %v6345_v59, %v2986_v51  ;;  %v6570_v56 = vadd.f32 %v3060_v62, %v6298_v47  ;;  %v3058_v38 = vmax.f32 %v2984_v33, %v3026_v17 }
 0x5f5   : > { %v3061_v2 = vmax.f32 %v2995_v7, %v3029_v43  ;;  %v3027_v10 = vmul.f32 0.1, %v2987_v26  ;;  %v6579_v36 = vadd.f32 %v3058_v38, %v6288_v6  ;;  %v3192_v6 = vmul.f32 %v6570_v56, %v6570_v56 }
 0x5f6   : > { %3244 = vadd.xlane.f32.xlu1 %v3187_v53  ;;  %3158 = vadd.xlane.f32.xlu0 %v6570_v56 }
 0x5f7   : > { %v6576_v29 = vadd.f32 %v3061_v2, %v6301_v42  ;;  %v3059_v20 = vmax.f32 %v2987_v26, %v3027_v10  ;;  %v3190_v59 = vmul.f32 %v6579_v36, %v6579_v36 }
 0x5f9   : > { %v6584_v47 = vadd.f32 %v3059_v20, %v6291_v19  ;;  %v3193_v19 = vmul.f32 %v6576_v29, %v6576_v29 }
 0x5fa   : > { %3160 = vadd.xlane.f32.xlu1 %v6576_v29  ;;  %3154 = vadd.xlane.f32.xlu0 %v6579_v36 }
 0x5fb   : > { %v3191_v42 = vmul.f32 %v6584_v47, %v6584_v47 }
 0x5fe   : > { %3156 = vadd.xlane.f32.xlu1 %v6584_v47  ;;  %3250 = vadd.xlane.f32.xlu0 %v3190_v59 }
 0x602   : > { %3252 = vadd.xlane.f32.xlu1 %v3191_v42  ;;  %3254 = vadd.xlane.f32.xlu0 %v3192_v6 }
 0x606   : > { %3256 = vadd.xlane.f32.xlu1 %v3193_v19 }
 0x60f   : > { %v3103_v16 = vpop.xlane.xlu0 %3102 }
 0x610   : > { %v6595_v55 = vmul.f32 0.0078125, %v3103_v16 }
 0x612   : > { %v3324_v12 = vmul.f32 %v6595_v55, %v6595_v55 }
 0x613   : > { %v3105_v27 = vpop.xlane.xlu1 %3104  ;;  %v3099_v52 = vpop.xlane.xlu0 %3098 }
 0x614   : > { %v3261_v37 = vmul.f32 0.0078125, %v3105_v27  ;;  %v3258_v23 = vmul.f32 0.0078125, %v3099_v52 }
 0x616   : > { %v3325_v33 = vmul.f32 %v3261_v37, %v3261_v37  ;;  %v3322_v62 = vmul.f32 %v3258_v23, %v3258_v23 }
 0x617   : > { %v3101_v58 = vpop.xlane.xlu1 %3100  ;;  %v3199_v30 = vpop.xlane.xlu0 %3198 }
 0x618   : > { %v3292_v9 = vmul.f32 0.0078125, %v3199_v30  ;;  %3629 = vperm.xlu0 %4540, %v4053_v44   ;;  %v6599_v17 = vmul.f32 0.0078125, %v3101_v58 }
 0x61a   : > { %v3356_v21 = vsub.f32 %v3292_v9, %v3324_v12  ;;  %v3323_v10 = vmul.f32 %v6599_v17, %v6599_v17 }
 0x61b   : > { %v3201_v13 = vpop.xlane.xlu1 %3200  ;;  %v3195_v45 = vpop.xlane.xlu0 %3194 }
 0x61c   : > { %v3293_v7 = vmul.f32 0.0078125, %v3201_v13  ;;  %v3290_v61 = vmul.f32 0.0078125, %v3195_v45  ;;  %v3420_v51 = vadd.f32 1e-05, %v3356_v21 }
 0x61e   : > { %v3357_v43 = vsub.f32 %v3293_v7, %v3325_v33  ;;  %v3354_v26 = vsub.f32 %v3290_v61, %v3322_v62  ;;  %4711 = vrsqrt.f32 %v3420_v51 }
 0x61f   : > { %v3197_v38 = vpop.xlane.xlu1 %3196  ;;  %v3111_v2 = vpop.xlane.xlu0 %3110 }
 0x620   : > { %v3421_v53 = vadd.f32 1e-05, %v3357_v43  ;;  %v3418_v20 = vadd.f32 1e-05, %v3354_v26  ;;  %v3291_v59 = vmul.f32 0.0078125, %v3197_v38  ;;  %v6603_v16 = vmul.f32 0.0078125, %v3111_v2 }
 0x621   : > { %v3389_v26 = vsub.f32 %v6356_v39, %v3261_v37  ;;  %v3387_v37 = vsub.f32 %v6364_v15, %v6599_v17 }
 0x622   : > { %4713 = vrsqrt.f32 %v3421_v53  ;;  %v3355_v42 = vsub.f32 %v3291_v59, %v3323_v10  ;;  %v3328_v44 = vmul.f32 %v6603_v16, %v6603_v16  ;;  %v3388_v53 = vsub.f32 %v6352_v46, %v6595_v55 }
 0x623   : > { %4715 = vrsqrt.f32 %v3418_v20  ;;  %v3113_v6 = vpop.xlane.xlu1 %3112  ;;  %v3107_v3 = vpop.xlane.xlu0 %3106  ;;  %v3386_v20 = vsub.f32 %v6359_v11, %v3258_v23 }
 0x624   : > { %v3419_v19 = vadd.f32 1e-05, %v3355_v42  ;;  %v6607_v58 = vmul.f32 0.0078125, %v3113_v6  ;;  %v6609_v30 = vmul.f32 0.0078125, %v3107_v3 }
 0x626   : > { %4717 = vrsqrt.f32 %v3419_v19  ;;  %v3329_v45 = vmul.f32 %v6607_v58, %v6607_v58  ;;  %v3326_v62 = vmul.f32 %v6609_v30, %v6609_v30 }
 0x627   : > { %v3109_v27 = vpop.xlane.xlu1 %3108  ;;  %v3207_v52 = vpop.xlane.xlu0 %3206 }
 0x628   : > { %v3296_v12 = vmul.f32 0.0078125, %v3207_v52  ;;  %v6611_v21 = vmul.f32 0.0078125, %v3109_v27 }
 0x62a   : > { %v3360_v9 = vsub.f32 %v3296_v12, %v3328_v44  ;;  %v3327_v59 = vmul.f32 %v6611_v21, %v6611_v21 }
 0x62b   : > { %v3209_v33 = vpop.xlane.xlu1 %3208  ;;  %v3203_v13 = vpop.xlane.xlu0 %3202 }
 0x62c   : > { %v3297_v7 = vmul.f32 0.0078125, %v3209_v33  ;;  %v3294_v61 = vmul.f32 0.0078125, %v3203_v13  ;;  %v3424_v51 = vadd.f32 1e-05, %v3360_v9  ;;  %v4712_v43 = vpop.eup %4711  ;;  %v6628_v9 = vld [vmem:[%s6982_s9 + $0x1] ss:$0 sm:$0xff] }
 0x62d   : > { %v3484_v12 = vmul.f32 %v4712_v43, %v3388_v53  ;;  %v6640_v43 = vld [vmem:[%s6983_s10 + $0x1] ss:$0 sm:$0xff] }
 0x62e   : > { %v3361_v38 = vsub.f32 %v3297_v7, %v3329_v45  ;;  %v3358_v2 = vsub.f32 %v3294_v61, %v3326_v62  ;;  %4719 = vrsqrt.f32 %v3424_v51 }
 0x62f   : > { %v4714_v10 = vpop.eup %4713  ;;  %v3205_v42 = vpop.xlane.xlu1 %3204  ;;  %v3522_v17 = vmul.f32 %v6628_v9, %v3484_v12 }
 0x630   : > { %v3119_v6 = vpop.xlane.xlu0 %3118  ;;  %v4716_v3 = vpop.eup %4715  ;;  %v3485_v19 = vmul.f32 %v4714_v10, %v3389_v26  ;;  %v3425_v27 = vadd.f32 1e-05, %v3361_v38  ;;  %v3422_v52 = vadd.f32 1e-05, %v3358_v2  ;;  %v3295_v44 = vmul.f32 0.0078125, %v3205_v42 }
 0x631   : > { %v3482_v39 = vmul.f32 %v4716_v3, %v3386_v20  ;;  %v6630_v13 = vmul.f32 0.0078125, %v3119_v6  ;;  %v3560_v6 = vadd.f32 %v6640_v43, %v3522_v17  ;;  %v3390_v17 = vsub.f32 %v6387_v31, %v6609_v30 }
 0x632   : > { %4721 = vrsqrt.f32 %v3425_v27  ;;  %v3359_v46 = vsub.f32 %v3295_v44, %v3327_v59  ;;  %v3523_v62 = vmul.f32 %v6628_v9, %v3485_v19 }
 0x633   : > { %v4718_v55 = vpop.eup %4717  ;;  %4723 = vrsqrt.f32 %v3422_v52  ;;  %v3121_v11 = vpop.xlane.xlu1 %3120  ;;  %v3520_v15 = vmul.f32 %v6628_v9, %v3482_v39  ;;  %v3332_v38 = vmul.f32 %v6630_v13, %v6630_v13 }
 0x634   : > { %v3115_v23 = vpop.xlane.xlu0 %3114  ;;  %v3423_v33 = vadd.f32 1e-05, %v3359_v46  ;;  %v3483_v45 = vmul.f32 %v4718_v55, %v3387_v37  ;;  %v6635_v7 = vmul.f32 0.0078125, %v3121_v11  ;;  %v3561_v53 = vadd.f32 %v6640_v43, %v3523_v62 }
 0x635   : > { %v6645_v2 = vmul.f32 0.0078125, %v3115_v23  ;;  %v3558_v20 = vadd.f32 %v6640_v43, %v3520_v15  ;;  %v3393_v23 = vsub.f32 %v6384_v1, %v6607_v58  ;;  %v3392_v15 = vsub.f32 %v6380_v57, %v6603_v16 }
 0x636   : > { %4725 = vrsqrt.f32 %v3423_v33  ;;  %v3521_v26 = vmul.f32 %v6628_v9, %v3483_v45  ;;  %v3333_v3 = vmul.f32 %v6635_v7, %v6635_v7  ;;  %v3591_v46 = vpack.c.bf16 %v3561_v53, %v3560_v6 }
 0x637   : > { %v3117_v61 = vpop.xlane.xlu1 %3116  ;;  %v3330_v39 = vmul.f32 %v6645_v2, %v6645_v2 }
 0x638   : > { %v3215_v51 = vpop.xlane.xlu0 %3214  ;;  %v3559_v59 = vadd.f32 %v6640_v43, %v3521_v26  ;;  %v6653_v19 = vmul.f32 0.0078125, %v3117_v61 }
 0x639   : > { %v3300_v10 = vmul.f32 0.0078125, %v3215_v51 }
 0x63a   : > { %v3590_v44 = vpack.c.bf16 %v3559_v59, %v3558_v20  ;;  %v3331_v61 = vmul.f32 %v6653_v19, %v6653_v19  ;;  %v3391_v59 = vsub.f32 %v6392_v41, %v6611_v21 }
 0x63b   : > { %v3364_v42 = vsub.f32 %v3300_v10, %v3332_v38  ;;  %v3217_v27 = vpop.xlane.xlu1 %3216  ;;  %v4720_v11 = vpop.eup %4719 }
 0x63c   : > { %v3211_v52 = vpop.xlane.xlu0 %3210  ;;  %v3301_v37 = vmul.f32 0.0078125, %v3217_v27  ;;  %4450 = vmatprep.mubr.bf16.mxu0 %v3590_v44 }
 0x63d   : > { %v3298_v12 = vmul.f32 0.0078125, %v3211_v52  ;;  %v3428_v55 = vadd.f32 1e-05, %v3364_v42  ;;  %4451 = vmatmul.mubr.bf16.vlgmr.msra.gmra.mxu0 %v3591_v46  ;;  %v3488_v42 = vmul.f32 %v4720_v11, %v3392_v15 }
 0x63e   : > { %v3365_v33 = vsub.f32 %v3301_v37, %v3333_v3 }
 0x63f   : > { %v3362_v45 = vsub.f32 %v3298_v12, %v3330_v39  ;;  %v4722_v62 = vpop.eup %4721  ;;  %v3213_v51 = vpop.xlane.xlu1 %3212  ;;  %4727 = vrsqrt.f32 %v3428_v55  ;;  %v3526_v39 = vmul.f32 %v6628_v9, %v3488_v42 }
 0x640   : > { %v3127_v26 = vpop.xlane.xlu0 %3126  ;;  %v4724_v38 = vpop.eup %4723  ;;  %v3489_v10 = vmul.f32 %v4722_v62, %v3393_v23  ;;  %v3429_v53 = vadd.f32 1e-05, %v3365_v33  ;;  %v3299_v1 = vmul.f32 0.0078125, %v3213_v51 }
 0x641   : > { %v3426_v20 = vadd.f32 1e-05, %v3362_v45  ;;  %v3486_v58 = vmul.f32 %v4724_v38, %v3390_v17  ;;  %v6667_v3 = vmul.f32 0.0078125, %v3127_v26  ;;  %v3564_v15 = vadd.f32 %v6640_v43, %v3526_v39 }
 0x642   : > { %4729 = vrsqrt.f32 %v3429_v53  ;;  %v3363_v57 = vsub.f32 %v3299_v1, %v3331_v61  ;;  %v3527_v52 = vmul.f32 %v6628_v9, %v3489_v10 }
 0x643   : > { %v4726_v16 = vpop.eup %4725  ;;  %4731 = vrsqrt.f32 %v3426_v20  ;;  %v3129_v31 = vpop.xlane.xlu1 %3128  ;;  %v3524_v44 = vmul.f32 %v6628_v9, %v3486_v58  ;;  %v3336_v55 = vmul.f32 %v6667_v3, %v6667_v3 }
 0x644   : > { %v3123_v30 = vpop.xlane.xlu0 %3122  ;;  %v3427_v6 = vadd.f32 1e-05, %v3363_v57  ;;  %v3487_v27 = vmul.f32 %v4726_v16, %v3391_v59  ;;  %v6672_v37 = vmul.f32 0.0078125, %v3129_v31  ;;  %v3565_v23 = vadd.f32 %v6640_v43, %v3527_v52 }
 0x645   : > { %v6674_v41 = vmul.f32 0.0078125, %v3123_v30  ;;  %v3562_v33 = vadd.f32 %v6640_v43, %v3524_v44  ;;  %v3396_v31 = vsub.f32 %v6414_v34, %v6630_v13  ;;  %v3397_v30 = vsub.f32 %v6421_v24, %v6635_v7 }
 0x646   : > { %4733 = vrsqrt.f32 %v3427_v6  ;;  %v3525_v46 = vmul.f32 %v6628_v9, %v3487_v27  ;;  %v3337_v17 = vmul.f32 %v6672_v37, %v6672_v37  ;;  %v3593_v1 = vpack.c.bf16 %v3565_v23, %v3564_v15 }
 0x647   : > { %v3125_v21 = vpop.xlane.xlu1 %3124  ;;  %v3334_v61 = vmul.f32 %v6674_v41, %v6674_v41  ;;  %v3394_v6 = vsub.f32 %v6424_v18, %v6645_v2  ;;  %v3395_v34 = vsub.f32 %v6432_v40, %v6653_v19 }
 0x648   : > { %v3223_v12 = vpop.xlane.xlu0 %3222  ;;  %v3563_v45 = vadd.f32 %v6640_v43, %v3525_v46  ;;  %v6687_v10 = vmul.f32 0.0078125, %v3125_v21 }
 0x649   : > { %v3304_v11 = vmul.f32 0.0078125, %v3223_v12 }
 0x64a   : > { %v3592_v38 = vpack.c.bf16 %v3563_v45, %v3562_v33  ;;  %v3335_v39 = vmul.f32 %v6687_v10, %v6687_v10 }
 0x64b   : > { %v3368_v62 = vsub.f32 %v3304_v11, %v3336_v55  ;;  %v3225_v51 = vpop.xlane.xlu1 %3224 }
 0x64c   : > { %v3219_v26 = vpop.xlane.xlu0 %3218  ;;  %v3305_v53 = vmul.f32 0.0078125, %v3225_v51  ;;  %4454 = vmatprep.mubr.bf16.mxu1 %v3592_v38  ;;  %v4728_v59 = vpop.eup %4727 }
 0x64d   : > { %v3302_v20 = vmul.f32 0.0078125, %v3219_v26  ;;  %v3432_v58 = vadd.f32 1e-05, %v3368_v62  ;;  %4455 = vmatmul.mubr.bf16.vlgmr.msra.gmra.mxu1 %v3593_v1  ;;  %v3492_v13 = vmul.f32 %v4728_v59, %v3396_v31 }
 0x64e   : > { %v3369_v42 = vsub.f32 %v3305_v53, %v3337_v17 }
 0x64f   : > { %v3366_v57 = vsub.f32 %v3302_v20, %v3334_v61  ;;  %v4730_v16 = vpop.eup %4729  ;;  %v3221_v27 = vpop.xlane.xlu1 %3220  ;;  %4735 = vrsqrt.f32 %v3432_v58  ;;  %v3530_v17 = vmul.f32 %v6628_v9, %v3492_v13  ;;  %v3398_v13 = vsub.f32 %v6464_v0, %v6674_v41 }
 0x650   : > { %v3135_v52 = vpop.xlane.xlu0 %3134  ;;  %v4732_v44 = vpop.eup %4731  ;;  %v3433_v21 = vadd.f32 1e-05, %v3369_v42  ;;  %v3303_v46 = vmul.f32 0.0078125, %v3221_v27  ;;  %v3493_v11 = vmul.f32 %v4730_v16, %v3397_v30 }
 0x651   : > { %v3430_v12 = vadd.f32 1e-05, %v3366_v57  ;;  %v3490_v55 = vmul.f32 %v4732_v44, %v3394_v6  ;;  %v6699_v33 = vmul.f32 0.0078125, %v3135_v52  ;;  %v3568_v42 = vadd.f32 %v6640_v43, %v3530_v17 }
 0x652   : > { %4737 = vrsqrt.f32 %v3433_v21  ;;  %v3367_v24 = vsub.f32 %v3303_v46, %v3335_v39  ;;  %v3531_v62 = vmul.f32 %v6628_v9, %v3493_v11 }
 0x653   : > { %v4734_v7 = vpop.eup %4733  ;;  %4739 = vrsqrt.f32 %v3430_v12  ;;  %v3137_v18 = vpop.xlane.xlu1 %3136  ;;  %v3528_v15 = vmul.f32 %v6628_v9, %v3490_v55  ;;  %v3340_v38 = vmul.f32 %v6699_v33, %v6699_v33 }
 0x654   : > { %v3131_v2 = vpop.xlane.xlu0 %3130  ;;  %v3431_v23 = vadd.f32 1e-05, %v3367_v24  ;;  %v3491_v45 = vmul.f32 %v4734_v7, %v3395_v34  ;;  %v6704_v61 = vmul.f32 0.0078125, %v3137_v18  ;;  %v3569_v20 = vadd.f32 %v6640_v43, %v3531_v62 }
 0x655   : > { %v6706_v40 = vmul.f32 0.0078125, %v3131_v2  ;;  %v3566_v1 = vadd.f32 %v6640_v43, %v3528_v15  ;;  %v3400_v34 = vsub.f32 %v6454_v50, %v6667_v3  ;;  %v3401_v24 = vsub.f32 %v6461_v54, %v6672_v37 }
 0x656   : > { %4741 = vrsqrt.f32 %v3431_v23  ;;  %v3529_v26 = vmul.f32 %v6628_v9, %v3491_v45  ;;  %v3341_v57 = vmul.f32 %v6704_v61, %v6704_v61  ;;  %v3595_v39 = vpack.c.bf16 %v3569_v20, %v3568_v42 }
 0x657   : > { %v3133_v19 = vpop.xlane.xlu1 %3132  ;;  %v3338_v16 = vmul.f32 %v6706_v40, %v6706_v40  ;;  %v3399_v50 = vsub.f32 %v6472_v25, %v6687_v10 }
 0x658   : > { %v3231_v51 = vpop.xlane.xlu0 %3230  ;;  %v3567_v58 = vadd.f32 %v6640_v43, %v3529_v26  ;;  %v6719_v27 = vmul.f32 0.0078125, %v3133_v19 }
 0x659   : > { %v3308_v53 = vmul.f32 0.0078125, %v3231_v51 }
 0x65a   : > { %v3594_v6 = vpack.c.bf16 %v3567_v58, %v3566_v1  ;;  %v3339_v23 = vmul.f32 %v6719_v27, %v6719_v27 }
 0x65b   : > { %v3372_v59 = vsub.f32 %v3308_v53, %v3340_v38  ;;  %v3233_v31 = vpop.xlane.xlu1 %3232 }
 0x65c   : > { %v3227_v30 = vpop.xlane.xlu0 %3226  ;;  %v3309_v52 = vmul.f32 0.0078125, %v3233_v31  ;;  %4458 = vmatprep.mubr.bf16.mxu1 %v3594_v6  ;;  %v4736_v12 = vpop.eup %4735 }
 0x65d   : > { %v3306_v44 = vmul.f32 0.0078125, %v3227_v30  ;;  %v3436_v21 = vadd.f32 1e-05, %v3372_v59  ;;  %4459 = vmatmul.mubr.bf16.gmra.mxu1 %v3595_v39  ;;  %v3496_v3 = vmul.f32 %v4736_v12, %v3400_v34 }
 0x65e   : > { %v3373_v46 = vsub.f32 %v3309_v52, %v3341_v57 }
 0x65f   : > { %v3370_v55 = vsub.f32 %v3306_v44, %v3338_v16  ;;  %v4738_v11 = vpop.eup %4737  ;;  %v3229_v7 = vpop.xlane.xlu1 %3228  ;;  %4743 = vrsqrt.f32 %v3436_v21  ;;  %v3534_v1 = vmul.f32 %v6628_v9, %v3496_v3 }
 0x660   : > { %v3143_v18 = vpop.xlane.xlu0 %3142  ;;  %v4740_v2 = vpop.eup %4739  ;;  %v3437_v45 = vadd.f32 1e-05, %v3373_v46  ;;  %v3307_v15 = vmul.f32 0.0078125, %v3229_v7  ;;  %v3497_v19 = vmul.f32 %v4738_v11, %v3401_v24 }
 0x661   : > { %v3434_v62 = vadd.f32 1e-05, %v3370_v55  ;;  %v3494_v17 = vmul.f32 %v4740_v2, %v3398_v13  ;;  %v6731_v26 = vmul.f32 0.0078125, %v3143_v18  ;;  %v3572_v44 = vadd.f32 %v6640_v43, %v3534_v1 }
 0x662   : > { %4745 = vrsqrt.f32 %v3437_v45  ;;  %v3371_v54 = vsub.f32 %v3307_v15, %v3339_v23  ;;  %v3535_v53 = vmul.f32 %v6628_v9, %v3497_v19  ;;  %v3405_v15 = vsub.f32 %v6492_v60, %v6704_v61 }
 0x663   : > { %v4742_v37 = vpop.eup %4741  ;;  %4747 = vrsqrt.f32 %v3434_v62  ;;  %v3145_v0 = vpop.xlane.xlu1 %3144  ;;  %v3532_v20 = vmul.f32 %v6628_v9, %v3494_v17  ;;  %v3344_v57 = vmul.f32 %v6731_v26, %v6731_v26  ;;  %v3404_v62 = vsub.f32 %v6488_v48, %v6699_v33 }
 0x664   : > { %v3139_v41 = vpop.xlane.xlu0 %3138  ;;  %v3435_v51 = vadd.f32 1e-05, %v3371_v54  ;;  %v3495_v38 = vmul.f32 %v4742_v37, %v3399_v50  ;;  %v6736_v58 = vmul.f32 0.0078125, %v3145_v0  ;;  %v3573_v31 = vadd.f32 %v6640_v43, %v3535_v53 }
 0x665   : > { %v6738_v25 = vmul.f32 0.0078125, %v3139_v41  ;;  %v3570_v30 = vadd.f32 %v6640_v43, %v3532_v20  ;;  %v3402_v17 = vsub.f32 %v6495_v8, %v6706_v40  ;;  %v3403_v48 = vsub.f32 %v6500_v22, %v6719_v27 }
 0x666   : > { %4749 = vrsqrt.f32 %v3435_v51  ;;  %v3533_v42 = vmul.f32 %v6628_v9, %v3495_v38  ;;  %v3345_v39 = vmul.f32 %v6736_v58, %v6736_v58  ;;  %v3597_v13 = vpack.c.bf16 %v3573_v31, %v3572_v44 }
 0x667   : > { %v3141_v10 = vpop.xlane.xlu1 %3140  ;;  %v3342_v21 = vmul.f32 %v6738_v25, %v6738_v25 }
 0x668   : > { %v3239_v59 = vpop.xlane.xlu0 %3238  ;;  %v3571_v6 = vadd.f32 %v6640_v43, %v3533_v42  ;;  %v6751_v11 = vmul.f32 0.0078125, %v3141_v10 }
 0x669   : > { %v3312_v16 = vmul.f32 0.0078125, %v3239_v59 }
 0x66a   : > { %v3596_v55 = vpack.c.bf16 %v3571_v6, %v3570_v30  ;;  %v3343_v3 = vmul.f32 %v6751_v11, %v6751_v11 }
 0x66b   : > { %v3376_v52 = vsub.f32 %v3312_v16, %v3344_v57  ;;  %v3241_v12 = vpop.xlane.xlu1 %3240 }
 0x66c   : > { %v3235_v46 = vpop.xlane.xlu0 %3234  ;;  %v3313_v34 = vmul.f32 0.0078125, %v3241_v12  ;;  %4462 = vmatprep.mubr.bf16.mxu1 %v3596_v55  ;;  %v4744_v18 = vpop.eup %4743 }
 0x66d   : > { %v3310_v24 = vmul.f32 0.0078125, %v3235_v46  ;;  %v3440_v7 = vadd.f32 1e-05, %v3376_v52  ;;  %4463 = vmatmul.mubr.bf16.gmra.mxu1 %v3597_v13  ;;  %v3500_v33 = vmul.f32 %v4744_v18, %v3404_v62 }
 0x66e   : > { %v3377_v2 = vsub.f32 %v3313_v34, %v3345_v39 }
 0x66f   : > { %v3374_v23 = vsub.f32 %v3310_v24, %v3342_v21  ;;  %v4746_v45 = vpop.eup %4745  ;;  %v3237_v19 = vpop.xlane.xlu1 %3236  ;;  %4751 = vrsqrt.f32 %v3440_v7  ;;  %v3538_v42 = vmul.f32 %v6628_v9, %v3500_v33 }
 0x670   : > { %v3151_v50 = vpop.xlane.xlu0 %3150  ;;  %v4748_v54 = vpop.eup %4747  ;;  %v3441_v37 = vadd.f32 1e-05, %v3377_v2  ;;  %v3311_v41 = vmul.f32 0.0078125, %v3237_v19  ;;  %v3501_v38 = vmul.f32 %v4746_v45, %v3405_v15 }
 0x671   : > { %v3438_v0 = vadd.f32 1e-05, %v3374_v23  ;;  %v3498_v51 = vmul.f32 %v4748_v54, %v3402_v17  ;;  %v6763_v20 = vmul.f32 0.0078125, %v3151_v50  ;;  %v3576_v12 = vadd.f32 %v6640_v43, %v3538_v42 }
 0x672   : > { %4753 = vrsqrt.f32 %v3441_v37  ;;  %v3375_v60 = vsub.f32 %v3311_v41, %v3343_v3  ;;  %v3539_v10 = vmul.f32 %v6628_v9, %v3501_v38  ;;  %v3408_v50 = vsub.f32 %v6516_v4, %v6731_v26 }
 0x673   : > { %v4750_v61 = vpop.eup %4749  ;;  %4755 = vrsqrt.f32 %v3438_v0  ;;  %v3153_v8 = vpop.xlane.xlu1 %3152  ;;  %v3536_v59 = vmul.f32 %v6628_v9, %v3498_v51  ;;  %v3348_v30 = vmul.f32 %v6763_v20, %v6763_v20  ;;  %v3409_v54 = vsub.f32 %v6520_v28, %v6736_v58 }
 0x674   : > { %v3147_v40 = vpop.xlane.xlu0 %3146  ;;  %v3439_v53 = vadd.f32 1e-05, %v3375_v60  ;;  %v3499_v1 = vmul.f32 %v4750_v61, %v3403_v48  ;;  %v6768_v57 = vmul.f32 0.0078125, %v3153_v8  ;;  %v3577_v52 = vadd.f32 %v6640_v43, %v3539_v10 }
 0x675   : > { %v6770_v22 = vmul.f32 0.0078125, %v3147_v40  ;;  %v3574_v44 = vadd.f32 %v6640_v43, %v3536_v59  ;;  %v3406_v3 = vsub.f32 %v6523_v14, %v6738_v25  ;;  %v3407_v4 = vsub.f32 %v6528_v35, %v6751_v11 }
 0x676   : > { %4757 = vrsqrt.f32 %v3439_v53  ;;  %v3537_v31 = vmul.f32 %v6628_v9, %v3499_v1  ;;  %v3349_v46 = vmul.f32 %v6768_v57, %v6768_v57  ;;  %v3599_v23 = vpack.c.bf16 %v3577_v52, %v3576_v12 }
 0x677   : > { %v3149_v27 = vpop.xlane.xlu1 %3148  ;;  %v3346_v55 = vmul.f32 %v6770_v22, %v6770_v22 }
 0x678   : > { %v3247_v16 = vpop.xlane.xlu0 %3246  ;;  %v3575_v39 = vadd.f32 %v6640_v43, %v3537_v31  ;;  %v6783_v7 = vmul.f32 0.0078125, %v3149_v27 }
 0x679   : > { %v3316_v6 = vmul.f32 0.0078125, %v3247_v16 }
 0x67a   : > { %v3598_v13 = vpack.c.bf16 %v3575_v39, %v3574_v44  ;;  %v3347_v51 = vmul.f32 %v6783_v7, %v6783_v7 }
 0x67b   : > { %v3380_v21 = vsub.f32 %v3316_v6, %v3348_v30  ;;  %v3249_v34 = vpop.xlane.xlu1 %3248 }
 0x67c   : > { %v3243_v24 = vpop.xlane.xlu0 %3242  ;;  %v3317_v18 = vmul.f32 0.0078125, %v3249_v34  ;;  %4466 = vmatprep.mubr.bf16.mxu1 %v3598_v13  ;;  %v4752_v62 = vpop.eup %4751 }
 0x67d   : > { %v3314_v2 = vmul.f32 0.0078125, %v3243_v24  ;;  %v3444_v45 = vadd.f32 1e-05, %v3380_v21  ;;  %4467 = vmatmul.mubr.bf16.gmra.mxu1 %v3599_v23  ;;  %v3504_v61 = vmul.f32 %v4752_v62, %v3408_v50 }
 0x67e   : > { %v3381_v15 = vsub.f32 %v3317_v18, %v3349_v46 }
 0x67f   : > { %v3378_v17 = vsub.f32 %v3314_v2, %v3346_v55  ;;  %v4754_v19 = vpop.eup %4753  ;;  %v3245_v37 = vpop.xlane.xlu1 %3244  ;;  %4759 = vrsqrt.f32 %v3444_v45  ;;  %v3542_v59 = vmul.f32 %v6628_v9, %v3504_v61 }
 0x680   : > { %v3159_v0 = vpop.xlane.xlu0 %3158  ;;  %v4756_v41 = vpop.eup %4755  ;;  %v3445_v38 = vadd.f32 1e-05, %v3381_v15  ;;  %v3315_v60 = vmul.f32 0.0078125, %v3245_v37  ;;  %v3505_v8 = vmul.f32 %v4754_v19, %v3409_v54  ;;  %v3413_v15 = vsub.f32 %v6548_v49, %v6768_v57 }
 0x681   : > { %v3442_v48 = vadd.f32 1e-05, %v3378_v17  ;;  %v3502_v33 = vmul.f32 %v4756_v41, %v3406_v3  ;;  %v6800_v42 = vmul.f32 0.0078125, %v3159_v0  ;;  %v3580_v39 = vadd.f32 %v6640_v43, %v3542_v59 }
 0x682   : > { %4761 = vrsqrt.f32 %v3445_v38  ;;  %v3379_v28 = vsub.f32 %v3315_v60, %v3347_v51  ;;  %v3543_v25 = vmul.f32 %v6628_v9, %v3505_v8  ;;  %v3412_v54 = vsub.f32 %v6542_v5, %v6763_v20 }
 0x683   : > { %v4758_v26 = vpop.eup %4757  ;;  %4763 = vrsqrt.f32 %v3442_v48  ;;  %v3161_v14 = vpop.xlane.xlu1 %3160  ;;  %v3540_v10 = vmul.f32 %v6628_v9, %v3502_v33  ;;  %v3352_v12 = vmul.f32 %v6800_v42, %v6800_v42  ;;  %v3410_v3 = vsub.f32 %v6551_v32, %v6770_v22 }
 0x684   : > { %v3155_v58 = vpop.xlane.xlu0 %3154  ;;  %v3443_v40 = vadd.f32 1e-05, %v3379_v28  ;;  %v3503_v1 = vmul.f32 %v4758_v26, %v3407_v4  ;;  %v3581_v16 = vadd.f32 %v6640_v43, %v3543_v25  ;;  %v6813_v46 = vmul.f32 0.0078125, %v3161_v14 }
 0x685   : > { %v6796_v53 = vmul.f32 0.0078125, %v3155_v58  ;;  %v3578_v52 = vadd.f32 %v6640_v43, %v3540_v10  ;;  %v3411_v33 = vsub.f32 %v6557_v63, %v6783_v7 }
 0x686   : > { %4765 = vrsqrt.f32 %v3443_v40  ;;  %v3541_v27 = vmul.f32 %v6628_v9, %v3503_v1  ;;  %v3601_v13 = vpack.c.bf16 %v3581_v16, %v3580_v39  ;;  %v3353_v37 = vmul.f32 %v6813_v46, %v6813_v46 }
 0x687   : > { %v3157_v35 = vpop.xlane.xlu1 %3156  ;;  %v3350_v31 = vmul.f32 %v6796_v53, %v6796_v53  ;;  %v3414_v58 = vsub.f32 %v6579_v36, %v6796_v53  ;;  %v3417_v36 = vsub.f32 %v6576_v29, %v6813_v46 }
 0x688   : > { %v3251_v11 = vpop.xlane.xlu0 %3250  ;;  %v6806_v30 = vmul.f32 0.0078125, %v3157_v35  ;;  %v3579_v44 = vadd.f32 %v6640_v43, %v3541_v27 }
 0x689   : > { %v3318_v6 = vmul.f32 0.0078125, %v3251_v11  ;;  %v3416_v11 = vsub.f32 %v6570_v56, %v6800_v42 }
 0x68a   : > { %v3600_v24 = vpack.c.bf16 %v3579_v44, %v3578_v52  ;;  %v3351_v18 = vmul.f32 %v6806_v30, %v6806_v30  ;;  %v3415_v59 = vsub.f32 %v6584_v47, %v6806_v30 }
 0x68b   : > { %v3382_v21 = vsub.f32 %v3318_v6, %v3350_v31  ;;  %v3253_v55 = vpop.xlane.xlu1 %3252 }
 0x68c   : > { %v3255_v34 = vpop.xlane.xlu0 %3254  ;;  %v3319_v23 = vmul.f32 0.0078125, %v3253_v55  ;;  %4470 = vmatprep.mubr.bf16.mxu1 %v3600_v24  ;;  %v4760_v62 = vpop.eup %4759 }
 0x68d   : > { %v3446_v2 = vadd.f32 1e-05, %v3382_v21  ;;  %v3320_v45 = vmul.f32 0.0078125, %v3255_v34  ;;  %4471 = vmatmul.mubr.bf16.gmra.mxu1 %v3601_v13  ;;  %v3508_v60 = vmul.f32 %v4760_v62, %v3412_v54 }
 0x68e   : > { %v3383_v17 = vsub.f32 %v3319_v23, %v3351_v18 }
 0x68f   : > { %4767 = vrsqrt.f32 %v3446_v2  ;;  %v3384_v19 = vsub.f32 %v3320_v45, %v3352_v12  ;;  %v4762_v50 = vpop.eup %4761  ;;  %v3257_v0 = vpop.xlane.xlu1 %3256  ;;  %v3546_v4 = vmul.f32 %v6628_v9, %v3508_v60 }
 0x690   : > { %v4764_v41 = vpop.eup %4763  ;;  %v3447_v51 = vadd.f32 1e-05, %v3383_v17  ;;  %v3321_v48 = vmul.f32 0.0078125, %v3257_v0  ;;  %v3509_v49 = vmul.f32 %v4762_v50, %v3413_v15 }
 0x691   : > { %v3448_v38 = vadd.f32 1e-05, %v3384_v19  ;;  %v3506_v57 = vmul.f32 %v4764_v41, %v3410_v3  ;;  %v3584_v7 = vadd.f32 %v6640_v43, %v3546_v4 }
 0x692   : > { %4769 = vrsqrt.f32 %v3447_v51  ;;  %v3385_v61 = vsub.f32 %v3321_v48, %v3353_v37  ;;  %v3547_v32 = vmul.f32 %v6628_v9, %v3509_v49 }
 0x693   : > { %v4766_v5 = vpop.eup %4765  ;;  %4771 = vrsqrt.f32 %v3448_v38  ;;  %v3544_v8 = vmul.f32 %v6628_v9, %v3506_v57  ;;  %v6854_v29 = vpop.permute.xlu0 %3629 }
 0x694   : > { %v3449_v20 = vadd.f32 1e-05, %v3385_v61  ;;  %v3507_v22 = vmul.f32 %v4766_v5, %v3411_v33  ;;  %v3585_v26 = vadd.f32 %v6640_v43, %v3547_v32 }
 0x695   : > { %v3582_v14 = vadd.f32 %v6640_v43, %v3544_v8 }
 0x696   : > { %4773 = vrsqrt.f32 %v3449_v20  ;;  %v3545_v28 = vmul.f32 %v6628_v9, %v3507_v22  ;;  %v3603_v1 = vpack.c.bf16 %v3585_v26, %v3584_v7 }
 0x698   : > { %v3583_v63 = vadd.f32 %v6640_v43, %v3545_v28 }
 0x69a   : > { %v3602_v25 = vpack.c.bf16 %v3583_v63, %v3582_v14 }
 0x69c   : > { %v4768_v40 = vpop.eup %4767  ;;  %4474 = vmatprep.mubr.bf16.mxu1 %v3602_v25 }
 0x69d   : > { %v3510_v10 = vmul.f32 %v4768_v40, %v3414_v58  ;;  %4475 = vmatmul.mubr.bf16.gmra.mxu1 %v3603_v1 }
 0x69f   : > { %v4770_v35 = vpop.eup %4769  ;;  %v3548_v31 = vmul.f32 %v6628_v9, %v3510_v10 }
 0x6a0   : > { %v4772_v27 = vpop.eup %4771  ;;  %v3511_v16 = vmul.f32 %v4770_v35, %v3415_v59 }
 0x6a1   : > { %v3512_v6 = vmul.f32 %v4772_v27, %v3416_v11  ;;  %v3586_v44 = vadd.f32 %v6640_v43, %v3548_v31 }
 0x6a2   : > { %v3549_v53 = vmul.f32 %v6628_v9, %v3511_v16 }
 0x6a3   : > { %v4774_v52 = vpop.eup %4773  ;;  %v3550_v56 = vmul.f32 %v6628_v9, %v3512_v6 }
 0x6a4   : > { %v3587_v47 = vadd.f32 %v6640_v43, %v3549_v53  ;;  %v3513_v30 = vmul.f32 %v4774_v52, %v3417_v36 }
 0x6a5   : > { %v3588_v21 = vadd.f32 %v6640_v43, %v3550_v56 }
 0x6a6   : > { %v3604_v42 = vpack.c.bf16 %v3587_v47, %v3586_v44  ;;  %v3551_v39 = vmul.f32 %v6628_v9, %v3513_v30 }
 0x6a8   : > { %4478 = vmatprep.mubr.bf16.mxu1 %v3604_v42  ;;  %v3589_v12 = vadd.f32 %v6640_v43, %v3551_v39 }
 0x6aa   : > { %v3605_v55 = vpack.c.bf16 %v3589_v12, %v3588_v21 }
 0x6ac   : > { %4479 = vmatmul.mubr.bf16.gmra.mxu1 %v3605_v55 }
 0x6fd   : > { %v4452_v46 = vpop.f32.mrf.mxu0 }
 0x6fe   : > { %v3723_v34 = vadd.f32 %v4452_v46, %v6854_v29 }
 0x6ff   : > { %v3714_v24 = vpop.f32.mrf.mxu0 }
 0x700   : > { %3843 = vst [vmem:[%s6857_s26 + $0x10] sm:$0xff] %v3723_v34  ;;  %v3715_v9 = vadd.f32 %v3714_v24, %v6854_v29 }
 0x701   : > { %v4453_v43 = vpop.f32.mrf.mxu0 }
 0x702   : > { %3841 = vst [vmem:[%s6857_s26] sm:$0xff] %v3715_v9  ;;  %v3726_v13 = vadd.f32 %v4453_v43, %v6854_v29 }
 0x703   : > { %v3717_v18 = vpop.f32.mrf.mxu0 }
 0x704   : > { %3844 = vst [vmem:[%s6857_s26 + $0x18] sm:$0xff] %v3726_v13  ;;  %v3718_v2 = vadd.f32 %v3717_v18, %v6854_v29 }
 0x706   : > { %3842 = vst [vmem:[%s6857_s26 + $0x8] sm:$0xff] %v3718_v2 }
 0x70d   : > { %v4456_v23 = vpop.f32.mrf.mxu1 }
 0x70e   : > { %v3739_v45 = vadd.f32 %v4456_v23, %v6854_v29 }
 0x70f   : > { %v3730_v62 = vpop.f32.mrf.mxu1 }
 0x710   : > { %3847 = vst [vmem:[%s6857_s26 + $0x30] sm:$0xff] %v3739_v45  ;;  %v3731_v15 = vadd.f32 %v3730_v62, %v6854_v29 }
 0x711   : > { %v4457_v17 = vpop.f32.mrf.mxu1 }
 0x712   : > { %3845 = vst [vmem:[%s6857_s26 + $0x20] sm:$0xff] %v3731_v15  ;;  %v3742_v19 = vadd.f32 %v4457_v17, %v6854_v29 }
 0x713   : > { %v3733_v50 = vpop.f32.mrf.mxu1 }
 0x714   : > { %3848 = vst [vmem:[%s6857_s26 + $0x38] sm:$0xff] %v3742_v19  ;;  %v3734_v54 = vadd.f32 %v3733_v50, %v6854_v29 }
 0x716   : > { %3846 = vst [vmem:[%s6857_s26 + $0x28] sm:$0xff] %v3734_v54 }
 0x71d   : > { %v4460_v3 = vpop.f32.mrf.mxu1 }
 0x71e   : > { %v3755_v37 = vadd.f32 %v4460_v3, %v6854_v29 }
 0x71f   : > { %v3746_v0 = vpop.f32.mrf.mxu1 }
 0x720   : > { %3851 = vst [vmem:[%s6857_s26 + $0x50] sm:$0xff] %v3755_v37  ;;  %v3747_v41 = vadd.f32 %v3746_v0, %v6854_v29 }
 0x721   : > { %v4461_v51 = vpop.f32.mrf.mxu1 }
 0x722   : > { %3849 = vst [vmem:[%s6857_s26 + $0x40] sm:$0xff] %v3747_v41  ;;  %v3758_v38 = vadd.f32 %v4461_v51, %v6854_v29 }
 0x723   : > { %v3749_v48 = vpop.f32.mrf.mxu1 }
 0x724   : > { %3852 = vst [vmem:[%s6857_s26 + $0x58] sm:$0xff] %v3758_v38  ;;  %v3750_v49 = vadd.f32 %v3749_v48, %v6854_v29 }
 0x726   : > { %3850 = vst [vmem:[%s6857_s26 + $0x48] sm:$0xff] %v3750_v49 }
 0x72d   : > { %v4464_v57 = vpop.f32.mrf.mxu1 }
 0x72e   : > { %v3771_v60 = vadd.f32 %v4464_v57, %v6854_v29 }
 0x72f   : > { %v3762_v33 = vpop.f32.mrf.mxu1 }
 0x730   : > { %3855 = vst [vmem:[%s6857_s26 + $0x70] sm:$0xff] %v3771_v60  ;;  %v3763_v61 = vadd.f32 %v3762_v33, %v6854_v29 }
 0x731   : > { %v4465_v5 = vpop.f32.mrf.mxu1 }
 0x732   : > { %3853 = vst [vmem:[%s6857_s26 + $0x60] sm:$0xff] %v3763_v61  ;;  %v3774_v32 = vadd.f32 %v4465_v5, %v6854_v29 }
 0x733   : > { %v3765_v20 = vpop.f32.mrf.mxu1 }
 0x734   : > { %3856 = vst [vmem:[%s6857_s26 + $0x78] sm:$0xff] %v3774_v32  ;;  %v3766_v22 = vadd.f32 %v3765_v20, %v6854_v29 }
 0x736   : > { %3854 = vst [vmem:[%s6857_s26 + $0x68] sm:$0xff] %v3766_v22 }
 0x73d   : > { %v4468_v8 = vpop.f32.mrf.mxu1 }
 0x73e   : > { %v3787_v4 = vadd.f32 %v4468_v8, %v6854_v29 }
 0x73f   : > { %v3778_v28 = vpop.f32.mrf.mxu1 }
 0x740   : > { %3859 = vst [vmem:[%s6857_s26 + $0x90] sm:$0xff] %v3787_v4  ;;  %v3779_v26 = vadd.f32 %v3778_v28, %v6854_v29 }
 0x741   : > { %v4469_v14 = vpop.f32.mrf.mxu1 }
 0x742   : > { %3857 = vst [vmem:[%s6857_s26 + $0x80] sm:$0xff] %v3779_v26  ;;  %v3790_v63 = vadd.f32 %v4469_v14, %v6854_v29 }
 0x743   : > { %v3781_v7 = vpop.f32.mrf.mxu1 }
 0x744   : > { %3860 = vst [vmem:[%s6857_s26 + $0x98] sm:$0xff] %v3790_v63  ;;  %v3782_v58 = vadd.f32 %v3781_v7, %v6854_v29 }
 0x746   : > { %3858 = vst [vmem:[%s6857_s26 + $0x88] sm:$0xff] %v3782_v58 }
 0x74d   : > { %v4472_v25 = vpop.f32.mrf.mxu1 }
 0x74e   : > { %v3803_v40 = vadd.f32 %v4472_v25, %v6854_v29 }
 0x74f   : > { %v3794_v1 = vpop.f32.mrf.mxu1 }
 0x750   : > { %3863 = vst [vmem:[%s6857_s26 + $0xb0] sm:$0xff] %v3803_v40  ;;  %v3795_v10 = vadd.f32 %v3794_v1, %v6854_v29 }
 0x751   : > { %v4473_v59 = vpop.f32.mrf.mxu1 }
 0x752   : > { %3861 = vst [vmem:[%s6857_s26 + $0xa0] sm:$0xff] %v3795_v10  ;;  %v3806_v35 = vadd.f32 %v4473_v59, %v6854_v29 }
 0x753   : > { %v3797_v11 = vpop.f32.mrf.mxu1 }
 0x754   : > { %3864 = vst [vmem:[%s6857_s26 + $0xb8] sm:$0xff] %v3806_v35  ;;  %v3798_v27 = vadd.f32 %v3797_v11, %v6854_v29 }
 0x756   : > { %3862 = vst [vmem:[%s6857_s26 + $0xa8] sm:$0xff] %v3798_v27 }
 0x75d   : > { %v4476_v16 = vpop.f32.mrf.mxu1 }
 0x75e   : > { %v3819_v31 = vadd.f32 %v4476_v16, %v6854_v29 }
 0x75f   : > { %v3810_v6 = vpop.f32.mrf.mxu1 }
 0x760   : > { %3867 = vst [vmem:[%s6857_s26 + $0xd0] sm:$0xff] %v3819_v31  ;;  %v3811_v36 = vadd.f32 %v3810_v6, %v6854_v29 }
 0x761   : > { %v4477_v53 = vpop.f32.mrf.mxu1 }
 0x762   : > { %3865 = vst [vmem:[%s6857_s26 + $0xc0] sm:$0xff] %v3811_v36  ;;  %v3822_v52 = vadd.f32 %v4477_v53, %v6854_v29 }
 0x763   : > { %v3813_v44 = vpop.f32.mrf.mxu1 }
 0x764   : > { %3868 = vst [vmem:[%s6857_s26 + $0xd8] sm:$0xff] %v3822_v52  ;;  %v3814_v47 = vadd.f32 %v3813_v44, %v6854_v29 }
 0x766   : > { %3866 = vst [vmem:[%s6857_s26 + $0xc8] sm:$0xff] %v3814_v47 }
 0x76c   : > { %v4480_v30 = vpop.f32.mrf.mxu1 }
 0x76d   : > { %v3835_v56 = vadd.f32 %v4480_v30, %v6854_v29 }
 0x76e   : > { %v3826_v42 = vpop.f32.mrf.mxu1 }
 0x76f   : > { %3871 = vst [vmem:[%s6857_s26 + $0xf0] sm:$0xff] %v3835_v56  ;;  %v3827_v39 = vadd.f32 %v3826_v42, %v6854_v29 }
 0x770   : > { %v4481_v21 = vpop.f32.mrf.mxu1 }
 0x771   : > { %3869 = vst [vmem:[%s6857_s26 + $0xe0] sm:$0xff] %v3827_v39  ;;  %v3838_v12 = vadd.f32 %v4481_v21, %v6854_v29 }
 0x772   : > { %v3829_v55 = vpop.f32.mrf.mxu1 }
 0x773   : > { %3872 = vst [vmem:[%s6857_s26 + $0xf8] sm:$0xff] %v3838_v12  ;;  %v3830_v46 = vadd.f32 %v3829_v55, %v6854_v29 }
 0x775   : > { %3870 = vst [vmem:[%s6857_s26 + $0xe8] sm:$0xff] %v3830_v46 }
 0x776   : > { %4788 = shalt.err (!%p4785_p3)
}
 0x777   : > { %s4789_s24 = scalar_lea.hbm %s6924_s22, 4096  ;;  %s4793_s25 = scalar_lea.hbm %s6986_s13, 8192 }
 0x778   : > { %p4790_p4 = scmp.ne.s32.totalorder %s6924_s22, %s4789_s24  ;;  %p4794_p9 = scmp.lt.s32.totalorder %s6924_s22, %s6986_s13 }
 0x779   : > { %p4795_p10 = scmp.lt.s32.totalorder %s4793_s25, %s4789_s24 }
 0x77a   : > { %p4791_p7 = pnand %p4790_p4, %p4952_p5 }
 0x77b   : > { %p4796_p11 = por %p4795_p10, %p4794_p9 }
 0x77c   : > { %p4792_p8 = pneg %p4791_p7 }
 0x77e   : > { %p4797_p12 = pnand %p4796_p11, %p4792_p8 }
 0x780   : > { %4800 = shalt.err (!%p4797_p12)
}
 0x781   : > { %s4839_s23 = smov 128   ;;  %s4840_s14 = smov 8  }
 0x782   : > { %4498 = dma.vmem_to_hbm [thread:$0]  (%p4952_p5), %s6926_s16, 4096, %s6924_s22, %s6933_s12, %s4839_s23, %s4839_s23, %s4840_s14  }
 0x783 PF: > { %p4504_p13 = scmp.ge.s32.totalorder %s4835_s30, 2  ;;  %s3902_s17 = sand.u32 1, %s4823_s27  }
 0x784   : > { %s3903_s0 = scalar_lea.sflag [#allocation4], %s3902_s17 }
 0x785   : > { %p4501_p0 = pnand %p4504_p13, %p4956_p6 }
 0x787   : > { %p4502_p1 = pneg %p4501_p0 }
 0x789   : > { %4818 = dma.done.wait (%p4502_p1), %s3903_s0, 4096  }
 0x78a   : > { %4820 = vsyncadd (%p4502_p1), %s3903_s0, 4294963200  ;;  %p25_p2 = scmp.ge.s32.totalorder %s4939_s15, 4   ;;  %s6993_s27 = smov %s4827_s28 }
 0x78b   : > { %s6994_s28 = smov %s4831_s29  ;;  %s6995_s29 = smov %s4950_s18 }
 0x78c   : > { %s6996_s30 = smov %s4939_s15  ;;  %27 = sbr.rel (!%p25_p2) target bundleno = 6 (0x6), region = 113 }
 0x791   :  { %3908 = vsyncpa [#allocation4], 1 }
 0x792   :  { %3910 = vsyncpa [#allocation4 + $0x1], 1 }

</bundles_post_ra>
